<compile_context>
chip_gen: v6e
topology: v6e:2x2x1
jax: 0.10.0
libtpu: 0.0.40
codegen_flags: <defaults>
</compile_context>

<pallas_src>
import functools

import jax
import jax.numpy as jnp
from jax.experimental import pallas as pl
from jax.experimental.pallas import tpu as pltpu


H1, H2, H3 = 512, 256, 64      # PyTorch layer widths (fc1 / fc2 / fc3)
H3_PAD = 128                   # fc3 width padded to a full lane group
HEAD_PAD = 128                 # fused [mean | log_std] head, lane padded
IN_PAD = 128                   # state_dim padded to a full lane group


def _round_up(x, m):
    return ((x + m - 1) // m) * m


def actor_kernel(x_ref, w1_ref, w2_ref, w3_ref, wh_ref, b_ref, out_ref, *,
                 action_dim):
    wdt = w1_ref.dtype                   # matmul-input dtype (bf16 or f32)
    h1 = w1_ref.shape[1]                 # 512
    h2 = w2_ref.shape[1]                 # 256
    h3 = w3_ref.shape[1]                 # 128 (fc3 padded)
    ho = wh_ref.shape[1]                 # 128 (head padded)

    x = x_ref[...]                       # already weight dtype, lane padded

    # fc1 + relu (MXU accumulates in f32, elementwise stays f32)
    h = jnp.dot(x, w1_ref[...], preferred_element_type=jnp.float32)
    h = jnp.maximum(h + b_ref[0:1, 0:h1], 0.0)

    # fc2 + relu
    h = jnp.dot(h.astype(wdt), w2_ref[...], preferred_element_type=jnp.float32)
    h = jnp.maximum(h + b_ref[1:2, 0:h2], 0.0)

    # fc3 + relu (padded lanes: relu(0 + 0) = 0, so results are unchanged)
    h = jnp.dot(h.astype(wdt), w3_ref[...], preferred_element_type=jnp.float32)
    h = jnp.maximum(h + b_ref[2:3, 0:h3], 0.0)

    # fused heads: one matmul produces [mean | log_std | zero padding]
    head = jnp.dot(h.astype(wdt), wh_ref[...], preferred_element_type=jnp.float32)
    head = head + b_ref[3:4, 0:ho]

    # Clamp only the log_std lanes (lanes >= action_dim); full-width VPU select,
    # no masked lane slicing or partial stores in-kernel.
    lane = jax.lax.broadcasted_iota(jnp.int32, head.shape, 1)
    out_ref[...] = jnp.where(lane >= action_dim,
                             jnp.clip(head, -20.0, 2.0), head)


def actor_forward(state, params, *, action_dim, block_b=512):
    """state: (B, state_dim) f32 -> (mean, log_std), each (B, action_dim) f32."""
    B, sdim = state.shape
    wdt = params["w1"].dtype
    in_pad = params["w1"].shape[0]
    head_pad = params["wh"].shape[1]
    assert 2 * action_dim <= head_pad

    tb = min(block_b, _round_up(B, 8))          # rows per grid step
    bp = _round_up(B, tb)                       # padded batch
    x = jnp.pad(state.astype(wdt), ((0, bp - B), (0, in_pad - sdim)))

    def resident(shape):                        # weights/bias stay in VMEM
        return pl.BlockSpec(shape, lambda i: (0, 0))

    out = pl.pallas_call(
        functools.partial(actor_kernel, action_dim=action_dim),
        out_shape=jax.ShapeDtypeStruct((bp, head_pad), jnp.float32),
        grid=(bp // tb,),
        in_specs=[
            pl.BlockSpec((tb, in_pad), lambda i: (i, 0)),
            resident(params["w1"].shape),
            resident(params["w2"].shape),
            resident(params["w3"].shape),
            resident(params["wh"].shape),
            resident(params["b"].shape),
        ],
        out_specs=pl.BlockSpec((tb, head_pad), lambda i: (i, 0)),
        compiler_params=pltpu.CompilerParams(dimension_semantics=("parallel",)),
    )(x, params["w1"], params["w2"], params["w3"], params["wh"], params["b"])

    mean = out[:B, 0:action_dim]                        # free XLA slices
    log_std = out[:B, action_dim:2 * action_dim]
    return mean, log_std


def init_actor_params(key, state_dim, action_dim, weight_dtype=jnp.bfloat16):
    """Matches PyTorch init (weights ~ N(0, 0.01), biases = 0), lane padded.

    weight_dtype=bf16 uses the bf16 MXU path on all generations; pass
    jnp.float32 on v5e if pure-f32 parity with the torch Actor is preferred.
    """
    assert state_dim <= IN_PAD, "raise IN_PAD for larger state_dim"
    assert 2 * action_dim <= HEAD_PAD, "action_dim too large for fused head slab"
    assert max(H2, H3_PAD, HEAD_PAD) <= H1, "bias slab rows assume H1 is widest"

    ks = jax.random.split(key, 5)
    std = 0.01

    def nrm(k, shape):
        return std * jax.random.normal(k, shape, dtype=jnp.float32)

    w1 = jnp.pad(nrm(ks[0], (state_dim, H1)), ((0, IN_PAD - state_dim), (0, 0)))
    w2 = nrm(ks[1], (H1, H2))
    w3 = jnp.pad(nrm(ks[2], (H2, H3)), ((0, 0), (0, H3_PAD - H3)))
    wm = nrm(ks[3], (H3, action_dim))
    ws = nrm(ks[4], (H3, action_dim))
    wh = jnp.concatenate([wm, ws], axis=1)                        # (64, 2A)
    wh = jnp.pad(wh, ((0, H3_PAD - H3), (0, HEAD_PAD - 2 * action_dim)))

    # Bias slab (4, 512) f32; torch init is all zeros. Rows: fc1/fc2/fc3/head,
    # each holding its bias in the leading columns (zero padded to 512 lanes).
    b = jnp.zeros((4, H1), jnp.float32)

    return {"w1": w1.astype(weight_dtype), "w2": w2.astype(weight_dtype),
            "w3": w3.astype(weight_dtype), "wh": wh.astype(weight_dtype), "b": b}


def actor_forward_ref(state, p, action_dim):
    """Pure-JAX reference with identical padded / bf16-weight / f32-acc semantics."""
    wdt = p["w1"].dtype
    B, sdim = state.shape
    x = jnp.pad(state, ((0, 0), (0, p["w1"].shape[0] - sdim))).astype(wdt)
    b = p["b"]
    h = jnp.maximum(jnp.dot(x, p["w1"], preferred_element_type=jnp.float32)
                    + b[0:1, 0:p["w1"].shape[1]], 0.0)
    h = jnp.maximum(jnp.dot(h.astype(wdt), p["w2"], preferred_element_type=jnp.float32)
                    + b[1:2, 0:p["w2"].shape[1]], 0.0)
    h = jnp.maximum(jnp.dot(h.astype(wdt), p["w3"], preferred_element_type=jnp.float32)
                    + b[2:3, 0:p["w3"].shape[1]], 0.0)
    head = (jnp.dot(h.astype(wdt), p["wh"], preferred_element_type=jnp.float32)
            + b[3:4, 0:p["wh"].shape[1]])
    mean = head[:, 0:action_dim]
    log_std = jnp.clip(head[:, action_dim:2 * action_dim], -20.0, 2.0)
    return mean, log_std


def get_action(key, state, params, action_dim):
    """Sampling path (plain JAX) on top of the fused forward kernel."""
    # TODO(synk): fuse Gaussian sampling / tanh log-prob into the Pallas kernel
    # (pltpu.prng_seed + pltpu.prng_random_bits) so the policy step is one launch.
    mean, log_std = actor_forward(state, params, action_dim=action_dim)
    std = jnp.exp(log_std)
    pre_tanh = mean + std * jax.random.normal(key, mean.shape, dtype=mean.dtype)
    action = jnp.tanh(pre_tanh)
    log_prob = (-0.5 * ((pre_tanh - mean) / std) ** 2
                - log_std - 0.5 * jnp.log(2.0 * jnp.pi)
                - jnp.log(1.0 - action ** 2 + 1e-6))
    return action, log_prob.sum(axis=1, keepdims=True)


if __name__ == "__main__":
    # BipedalWalker-v3: state_dim=24, action_dim=4.  Per perf review, batch many
    # environments per call so per-dispatch overhead and the MXU are amortised;
    # B=1024 with block_b=512 gives a grid of 2 (both v7x TensorCores).
    B, state_dim, action_dim = 1024, 24, 4

    key = jax.random.PRNGKey(0)
    pkey, xkey, skey = jax.random.split(key, 3)
    params = init_actor_params(pkey, state_dim, action_dim)
    state = jax.random.normal(xkey, (B, state_dim), dtype=jnp.float32)

    fwd = jax.jit(actor_forward, static_argnames=("action_dim", "block_b"))
    mean, log_std = fwd(state, params, action_dim=action_dim)
    jax.block_until_ready((mean, log_std))

    mean_ref, log_std_ref = actor_forward_ref(state, params, action_dim)
    assert mean.shape == (B, action_dim) and log_std.shape == (B, action_dim)
    assert jnp.allclose(mean, mean_ref, atol=1e-4, rtol=1e-4), \
        float(jnp.max(jnp.abs(mean - mean_ref)))
    assert jnp.allclose(log_std, log_std_ref, atol=1e-4, rtol=1e-4), \
        float(jnp.max(jnp.abs(log_std - log_std_ref)))
    assert bool(jnp.all(log_std <= 2.0)) and bool(jnp.all(log_std >= -20.0))

    # Exercise the (JAX-side) sampling path once.
    action, log_prob = get_action(skey, state, params, action_dim)
    jax.block_until_ready((action, log_prob))
    assert action.shape == (B, action_dim) and log_prob.shape == (B, 1)

    print("KERNEL_OK")
</pallas_src>

<mosaic_0001>
module attributes {stable_mosaic.version = 11 : i64} {
  func.func @actor_kernel(%arg0: i32, %arg1: memref<512x128xbf16, #tpu.memory_space<vmem>>, %arg2: memref<128x512xbf16, #tpu.memory_space<vmem>>, %arg3: memref<512x256xbf16, #tpu.memory_space<vmem>>, %arg4: memref<256x128xbf16, #tpu.memory_space<vmem>>, %arg5: memref<128x128xbf16, #tpu.memory_space<vmem>>, %arg6: memref<4x512xf32, #tpu.memory_space<vmem>>, %arg7: memref<512x128xf32, #tpu.memory_space<vmem>>) attributes {dimension_semantics = [#tpu.dimension_semantics<parallel>], iteration_bounds = array<i64: 2>, scalar_prefetch = 0 : i64, scratch_operands = 0 : i64, tpu.core_type = #tpu.core_type<tc>, window_params = [{transform_indices = @transform_0, window_bounds = array<i64: 512, 128>}, {pipeline_mode = #tpu.pipeline_mode<synchronous>, transform_indices = @transform_1, window_bounds = array<i64: 128, 512>}, {pipeline_mode = #tpu.pipeline_mode<synchronous>, transform_indices = @transform_2, window_bounds = array<i64: 512, 256>}, {pipeline_mode = #tpu.pipeline_mode<synchronous>, transform_indices = @transform_3, window_bounds = array<i64: 256, 128>}, {pipeline_mode = #tpu.pipeline_mode<synchronous>, transform_indices = @transform_4, window_bounds = array<i64: 128, 128>}, {pipeline_mode = #tpu.pipeline_mode<synchronous>, transform_indices = @transform_5, window_bounds = array<i64: 4, 512>}, {transform_indices = @transform_6, window_bounds = array<i64: 512, 128>}]} {
    %c0 = arith.constant 0 : index
    %c0_0 = arith.constant 0 : index
    %0 = vector.load %arg1[%c0, %c0_0] : memref<512x128xbf16, #tpu.memory_space<vmem>>, vector<512x128xbf16>
    %c0_1 = arith.constant 0 : index
    %c0_2 = arith.constant 0 : index
    %1 = vector.load %arg2[%c0_1, %c0_2] : memref<128x512xbf16, #tpu.memory_space<vmem>>, vector<128x512xbf16>
    %cst = arith.constant dense<0.000000e+00> : vector<512x512xf32>
    %2 = tpu.matmul %0, %1, %cst {dimension_numbers = #tpu.dot_dimension_numbers<[1], [0], [0], [1], [0, 0, 1, 1], [], []>} : vector<512x128xbf16>, vector<128x512xbf16>, vector<512x512xf32> -> vector<512x512xf32>
    %c0_3 = arith.constant 0 : index
    %c0_4 = arith.constant 0 : index
    %3 = vector.load %arg6[%c0_3, %c0_4] : memref<4x512xf32, #tpu.memory_space<vmem>>, vector<1x512xf32>
    %4 = vector.broadcast %3 : vector<1x512xf32> to vector<512x512xf32>
    %5 = arith.addf %2, %4 : vector<512x512xf32>
    %cst_5 = arith.constant 0.000000e+00 : f32
    %6 = vector.broadcast %cst_5 : f32 to vector<512x512xf32>
    %7 = arith.maximumf %5, %6 : vector<512x512xf32>
    %8 = arith.truncf %7 : vector<512x512xf32> to vector<512x512xbf16>
    %c0_6 = arith.constant 0 : index
    %c0_7 = arith.constant 0 : index
    %9 = vector.load %arg3[%c0_6, %c0_7] : memref<512x256xbf16, #tpu.memory_space<vmem>>, vector<512x256xbf16>
    %cst_8 = arith.constant dense<0.000000e+00> : vector<512x256xf32>
    %10 = tpu.matmul %8, %9, %cst_8 {dimension_numbers = #tpu.dot_dimension_numbers<[1], [0], [0], [1], [0, 0, 1, 1], [], []>} : vector<512x512xbf16>, vector<512x256xbf16>, vector<512x256xf32> -> vector<512x256xf32>
    %c1 = arith.constant 1 : index
    %c0_9 = arith.constant 0 : index
    %11 = vector.load %arg6[%c1, %c0_9] : memref<4x512xf32, #tpu.memory_space<vmem>>, vector<1x256xf32>
    %12 = vector.broadcast %11 : vector<1x256xf32> to vector<512x256xf32>
    %13 = arith.addf %10, %12 : vector<512x256xf32>
    %cst_10 = arith.constant 0.000000e+00 : f32
    %14 = vector.broadcast %cst_10 : f32 to vector<512x256xf32>
    %15 = arith.maximumf %13, %14 : vector<512x256xf32>
    %16 = arith.truncf %15 : vector<512x256xf32> to vector<512x256xbf16>
    %c0_11 = arith.constant 0 : index
    %c0_12 = arith.constant 0 : index
    %17 = vector.load %arg4[%c0_11, %c0_12] : memref<256x128xbf16, #tpu.memory_space<vmem>>, vector<256x128xbf16>
    %cst_13 = arith.constant dense<0.000000e+00> : vector<512x128xf32>
    %18 = tpu.matmul %16, %17, %cst_13 {dimension_numbers = #tpu.dot_dimension_numbers<[1], [0], [0], [1], [0, 0, 1, 1], [], []>} : vector<512x256xbf16>, vector<256x128xbf16>, vector<512x128xf32> -> vector<512x128xf32>
    %c2 = arith.constant 2 : index
    %c0_14 = arith.constant 0 : index
    %19 = vector.load %arg6[%c2, %c0_14] : memref<4x512xf32, #tpu.memory_space<vmem>>, vector<1x128xf32>
    %20 = vector.broadcast %19 : vector<1x128xf32> to vector<512x128xf32>
    %21 = arith.addf %18, %20 : vector<512x128xf32>
    %cst_15 = arith.constant 0.000000e+00 : f32
    %22 = vector.broadcast %cst_15 : f32 to vector<512x128xf32>
    %23 = arith.maximumf %21, %22 : vector<512x128xf32>
    %24 = arith.truncf %23 : vector<512x128xf32> to vector<512x128xbf16>
    %c0_16 = arith.constant 0 : index
    %c0_17 = arith.constant 0 : index
    %25 = vector.load %arg5[%c0_16, %c0_17] : memref<128x128xbf16, #tpu.memory_space<vmem>>, vector<128x128xbf16>
    %cst_18 = arith.constant dense<0.000000e+00> : vector<512x128xf32>
    %26 = tpu.matmul %24, %25, %cst_18 {dimension_numbers = #tpu.dot_dimension_numbers<[1], [0], [0], [1], [0, 0, 1, 1], [], []>} : vector<512x128xbf16>, vector<128x128xbf16>, vector<512x128xf32> -> vector<512x128xf32>
    %c3 = arith.constant 3 : index
    %c0_19 = arith.constant 0 : index
    %27 = vector.load %arg6[%c3, %c0_19] : memref<4x512xf32, #tpu.memory_space<vmem>>, vector<1x128xf32>
    %28 = vector.broadcast %27 : vector<1x128xf32> to vector<512x128xf32>
    %29 = arith.addf %26, %28 : vector<512x128xf32>
    %30 = tpu.iota {dimensions = array<i32: 1>} : vector<512x128xi32>
    %c4_i32 = arith.constant 4 : i32
    %31 = vector.broadcast %c4_i32 : i32 to vector<512x128xi32>
    %32 = arith.cmpi sge, %30, %31 : vector<512x128xi32>
    %cst_20 = arith.constant -2.000000e+01 : f32
    %cst_21 = arith.constant 2.000000e+00 : f32
    %33 = vector.broadcast %cst_20 : f32 to vector<512x128xf32>
    %34 = arith.maximumf %33, %29 : vector<512x128xf32>
    %35 = vector.broadcast %cst_21 : f32 to vector<512x128xf32>
    %36 = arith.minimumf %35, %34 : vector<512x128xf32>
    %37 = arith.select %32, %36, %29 : vector<512x128xi1>, vector<512x128xf32>
    %c0_22 = arith.constant 0 : index
    %c0_23 = arith.constant 0 : index
    %38 = vector.load %arg7[%c0_22, %c0_23] : memref<512x128xf32, #tpu.memory_space<vmem>>, vector<512x128xf32>
    tpu.vector_store %arg7[%c0_22, %c0_23], %37 {strides = array<i32>} : memref<512x128xf32, #tpu.memory_space<vmem>>, vector<512x128xf32>,
    return
  }
  func.func @transform_0(%arg0: i32) -> (i32, i32) {
    %c0_i32 = arith.constant 0 : i32
    %c0_i32_0 = arith.constant 0 : i32
    return %arg0, %c0_i32 : i32, i32
  }
  func.func @transform_1(%arg0: i32) -> (i32, i32) {
    %c0_i32 = arith.constant 0 : i32
    %c0_i32_0 = arith.constant 0 : i32
    %c0_i32_1 = arith.constant 0 : i32
    return %c0_i32, %c0_i32_0 : i32, i32
  }
  func.func @transform_2(%arg0: i32) -> (i32, i32) {
    %c0_i32 = arith.constant 0 : i32
    %c0_i32_0 = arith.constant 0 : i32
    %c0_i32_1 = arith.constant 0 : i32
    return %c0_i32, %c0_i32_0 : i32, i32
  }
  func.func @transform_3(%arg0: i32) -> (i32, i32) {
    %c0_i32 = arith.constant 0 : i32
    %c0_i32_0 = arith.constant 0 : i32
    %c0_i32_1 = arith.constant 0 : i32
    return %c0_i32, %c0_i32_0 : i32, i32
  }
  func.func @transform_4(%arg0: i32) -> (i32, i32) {
    %c0_i32 = arith.constant 0 : i32
    %c0_i32_0 = arith.constant 0 : i32
    %c0_i32_1 = arith.constant 0 : i32
    return %c0_i32, %c0_i32_0 : i32, i32
  }
  func.func @transform_5(%arg0: i32) -> (i32, i32) {
    %c0_i32 = arith.constant 0 : i32
    %c0_i32_0 = arith.constant 0 : i32
    %c0_i32_1 = arith.constant 0 : i32
    return %c0_i32, %c0_i32_0 : i32, i32
  }
  func.func @transform_6(%arg0: i32) -> (i32, i32) {
    %c0_i32 = arith.constant 0 : i32
    %c0_i32_0 = arith.constant 0 : i32
    return %arg0, %c0_i32 : i32, i32
  }
}

</mosaic_0001>

<bundles_post_ra>
// kernel: actor_forward.1
= control target key start
LH: loop header
LB: loop body
LE: loop exit
PB: predicated region body
PF: predicated region fallthrough
CT: control target
= control target key end

     0   :  { %s4866_s21 = smov 0   ;;  %s7030_s0 = inlined_call_operand.vmem [shape: bf16[1024,128], index: 0, kind: input, shape index: {}]   ;;  %s7031_s1 = inlined_call_operand.vmem [shape: bf16[128,512], index: 1, kind: input, shape index: {}]   ;;  %s7032_s2 = inlined_call_operand.vmem [shape: bf16[512,256], index: 2, kind: input, shape index: {}]   ;;  %s7033_s3 = inlined_call_operand.vmem [shape: bf16[256,128], index: 3, kind: input, shape index: {}]   ;;  %s7034_s4 = inlined_call_operand.vmem [shape: bf16[128,128], index: 4, kind: input, shape index: {}]   ;;  %s7035_s5 = inlined_call_operand.vmem [shape: f32[4,512], index: 5, kind: input, shape index: {}]   ;;  %s7036_s6 = inlined_call_operand.vmem [shape: f32[1024,128], index: 6, kind: output, shape index: {}]  }
   0x1 LB: > { %s4302_s22 = sadd.s32 4294967295, %s4828_s21   ;;  %p4306_p0 = scmp.ge.s32.totalorder %s4828_s21, 1  ;;  %s4828_s21 = sphi %s4866_s21, %s16_s21  }
   0x2   : > { %p213_p1 = scmp.lt.s32.totalorder %s4828_s21, 3 }
   0x4   : > { %p214_p2 = pnand %p4306_p0, %p213_p1 }
   0x6   : > { %217 = sbr.rel (%p214_p2) target bundleno = 1229 (0x4cd), region = 44 }
   0xb   : > { %v4613_v0 = vld [vmem:[%s7031_s1 + $0xe4] ss:$16 sps:$4 sm:$0xff]   ;;  %s4307_s25 = sshll.u32 %s4302_s22, 6  ;;  %v4615_v1 = vld [vmem:[%s7031_s1 + $0xe0] ss:$16 sps:$4 sm:$0xff]   ;;  %v7042_v2 = vmov 0  }
   0xc   : > { %758 = vmatprep.mubr.bf16.mxu0 %v7042_v2  ;;  %998 = vmatprep.mubr.bf16.mxu1 %v7042_v2  ;;  %p244_p3 = scmp.lt.s32.totalorder %s4307_s25, 127  ;;  %v4616_v3 = vld [vmem:[%s7031_s1 + $0xc4] ss:$16 sps:$4 sm:$0xff]   ;;  %v4618_v4 = vld [vmem:[%s7031_s1 + $0xc0] ss:$16 sps:$4 sm:$0xff]  }
   0xd   : > { %726 = vmatprep.subr.bf16.mxu0 %v4613_v0  ;;  %4588 = vmatprep.subr.bf16.mxu1 %v4613_v0  ;;  %v4619_v5 = vld [vmem:[%s7031_s1 + $0xa4] ss:$16 sps:$4 sm:$0xff]   ;;  %v4621_v6 = vld [vmem:[%s7031_s1 + $0xa0] ss:$16 sps:$4 sm:$0xff]   ;;  %v4641_v17 = vld [vmem:[%s7031_s1 + $0xec] ss:$16 sps:$4 sm:$0xff]  }
   0xe   : > { %727 = vmatpush1.bf16.msra.mxu0 %v4615_v1  ;;  %4596 = vmatpush1.bf16.msra.mxu1 %v4615_v1  ;;  %s7157_s25 = smov (!%p244_p3, %s4307_s25), 127  ;;  %v4622_v7 = vld [vmem:[%s7031_s1 + $0x84] ss:$16 sps:$4 sm:$0xff]   ;;  %v4624_v8 = vld [vmem:[%s7031_s1 + $0x80] ss:$16 sps:$4 sm:$0xff]  }
   0xf   : > { %728 = vmatprep.subr.bf16.mxu0 %v4616_v3  ;;  %4589 = vmatprep.subr.bf16.mxu1 %v4616_v3  ;;  %s4308_s10 = sshll.u32 %s7157_s25, 2  ;;  %v4625_v9 = vld [vmem:[%s7031_s1 + $0x64] ss:$16 sps:$4 sm:$0xff]   ;;  %v4627_v10 = vld [vmem:[%s7031_s1 + $0x60] ss:$16 sps:$4 sm:$0xff]   ;;  %s4310_s19 = sshll.u32 %s7157_s25, 3 }
  0x10   : > { %s4903_s17 = scalar_lea.vmem %s7030_s0, %s4308_s10  ;;  %v4628_v11 = vld [vmem:[%s7031_s1 + $0x44] ss:$16 sps:$4 sm:$0xff]   ;;  %v4630_v12 = vld [vmem:[%s7031_s1 + $0x40] ss:$16 sps:$4 sm:$0xff]   ;;  %v4639_v20 = vld [vmem:[%s7031_s1 + $0xe8] ss:$16 sps:$4 sm:$0xff]   ;;  %s6759_s23 = scalar_lea.vmem %s7036_s6, %s4310_s19 }
  0x11   : > { %v4631_v13 = vld [vmem:[%s7031_s1 + $0x24] ss:$16 sps:$4 sm:$0xff]   ;;  %v4633_v14 = vld [vmem:[%s7031_s1 + $0x20] ss:$16 sps:$4 sm:$0xff]   ;;  %v4646_v21 = vld [vmem:[%s7031_s1 + $0xcc] ss:$16 sps:$4 sm:$0xff]  }
  0x12   : > { %729 = vmatpush1.bf16.msra.mxu0 %v4618_v4  ;;  %4597 = vmatpush1.bf16.msra.mxu1 %v4618_v4  ;;  %v4634_v15 = vld [vmem:[%s7031_s1 + $0x4] ss:$16 sps:$4 sm:$0xff]   ;;  %v4636_v16 = vld [vmem:[%s7031_s1] ss:$16 sps:$4 sm:$0xff]   ;;  %v4644_v22 = vld [vmem:[%s7031_s1 + $0xc8] ss:$16 sps:$4 sm:$0xff]  }
  0x13   : > { %730 = vmatprep.subr.bf16.mxu0 %v4619_v5  ;;  %4590 = vmatprep.subr.bf16.mxu1 %v4619_v5  ;;  %v4936_v18 = vld [vmem:[%s4903_s17] sm:$0xff]   ;;  %v4651_v23 = vld [vmem:[%s7031_s1 + $0xac] ss:$16 sps:$4 sm:$0xff]   ;;  %v4649_v26 = vld [vmem:[%s7031_s1 + $0xa8] ss:$16 sps:$4 sm:$0xff]  }
  0x14   : > { %v4638_v19 = vld [vmem:[%s4903_s17 + $0xc0] sm:$0xff]   ;;  %v4955_v24 = vld [vmem:[%s4903_s17 + $0x8] sm:$0xff]   ;;  %v4682_v28 = vld [vmem:[%s7032_s2 + $0x70] ss:$8 sps:$4 sm:$0xff]  }
  0x15   : > { %v4643_v25 = vld [vmem:[%s4903_s17 + $0xc8] sm:$0xff]   ;;  %v4684_v29 = vld [vmem:[%s7032_s2 + $0x74] ss:$8 sps:$4 sm:$0xff]   ;;  %v4697_v38 = vld [vmem:[%s7032_s2 + $0x50] ss:$8 sps:$4 sm:$0xff]  }
  0x16   : > { %731 = vmatpush1.bf16.msra.mxu0 %v4621_v6  ;;  %4598 = vmatpush1.bf16.msra.mxu1 %v4621_v6  ;;  %v4656_v27 = vld [vmem:[%s7031_s1 + $0x8c] ss:$16 sps:$4 sm:$0xff]   ;;  %v4974_v30 = vld [vmem:[%s4903_s17 + $0x10] sm:$0xff]   ;;  %v4654_v32 = vld [vmem:[%s7031_s1 + $0x88] ss:$16 sps:$4 sm:$0xff]  }
  0x17   : > { %732 = vmatprep.subr.bf16.mxu0 %v4622_v7  ;;  %4591 = vmatprep.subr.bf16.mxu1 %v4622_v7  ;;  %v4648_v31 = vld [vmem:[%s4903_s17 + $0xd0] sm:$0xff]   ;;  %v4661_v33 = vld [vmem:[%s7031_s1 + $0x6c] ss:$16 sps:$4 sm:$0xff]   ;;  %v4690_v34 = vld [vmem:[%s7032_s2 + $0x60] ss:$8 sps:$4 sm:$0xff]  }
  0x18   : > { %v4692_v35 = vld [vmem:[%s7032_s2 + $0x64] ss:$8 sps:$4 sm:$0xff]   ;;  %v4659_v36 = vld [vmem:[%s7031_s1 + $0x68] ss:$16 sps:$4 sm:$0xff]   ;;  %v4699_v39 = vld [vmem:[%s7032_s2 + $0x54] ss:$8 sps:$4 sm:$0xff]  }
  0x19   : > { %v4666_v37 = vld [vmem:[%s7031_s1 + $0x4c] ss:$16 sps:$4 sm:$0xff]   ;;  %v4664_v41 = vld [vmem:[%s7031_s1 + $0x48] ss:$16 sps:$4 sm:$0xff]   ;;  %v5039_v51 = vld [vmem:[%s4903_s17 + $0x20] sm:$0xff]  }
  0x1a   : > { %733 = vmatpush1.bf16.msra.mxu0 %v4624_v8  ;;  %4599 = vmatpush1.bf16.msra.mxu1 %v4624_v8  ;;  %v5005_v40 = vld [vmem:[%s4903_s17 + $0x18] sm:$0xff]   ;;  %v4705_v45 = vld [vmem:[%s7032_s2 + $0x40] ss:$8 sps:$4 sm:$0xff]   ;;  %v4707_v46 = vld [vmem:[%s7032_s2 + $0x44] ss:$8 sps:$4 sm:$0xff]  }
  0x1b   : > { %734 = vmatprep.subr.bf16.mxu0 %v4625_v9  ;;  %4592 = vmatprep.subr.bf16.mxu1 %v4625_v9  ;;  %v4653_v42 = vld [vmem:[%s4903_s17 + $0xd8] sm:$0xff]   ;;  %v4717_v53 = vld [vmem:[%s7032_s2 + $0x20] ss:$8 sps:$4 sm:$0xff]   ;;  %v4719_v54 = vld [vmem:[%s7032_s2 + $0x24] ss:$8 sps:$4 sm:$0xff]  }
  0x1c   : > { %v4671_v43 = vld [vmem:[%s7031_s1 + $0x2c] ss:$16 sps:$4 sm:$0xff]   ;;  %v4669_v44 = vld [vmem:[%s7031_s1 + $0x28] ss:$16 sps:$4 sm:$0xff]   ;;  %v4658_v55 = vld [vmem:[%s4903_s17 + $0xe0] sm:$0xff]  }
  0x1d   : > { %v4676_v47 = vld [vmem:[%s7031_s1 + $0xc] ss:$16 sps:$4 sm:$0xff]   ;;  %v4709_v48 = vld [vmem:[%s7032_s2 + $0x30] ss:$8 sps:$4 sm:$0xff]   ;;  %v4732_v60 = vld [vmem:[%s7032_s2] ss:$8 sps:$4 sm:$0xff]  }
  0x1e   : > { %735 = vmatpush1.bf16.msra.mxu0 %v4627_v10  ;;  %4600 = vmatpush1.bf16.msra.mxu1 %v4627_v10  ;;  %v4711_v49 = vld [vmem:[%s7032_s2 + $0x34] ss:$8 sps:$4 sm:$0xff]   ;;  %v4674_v50 = vld [vmem:[%s7031_s1 + $0x8] ss:$16 sps:$4 sm:$0xff]   ;;  %v4734_v61 = vld [vmem:[%s7032_s2 + $0x4] ss:$8 sps:$4 sm:$0xff]  }
  0x1f   : > { %736 = vmatprep.subr.bf16.mxu0 %v4628_v11  ;;  %4593 = vmatprep.subr.bf16.mxu1 %v4628_v11  ;;  %v4680_v52 = vld [vmem:[%s7032_s2 + $0x174] ss:$8 sps:$4 sm:$0xff]   ;;  %v4724_v56 = vld [vmem:[%s7032_s2 + $0x10] ss:$8 sps:$4 sm:$0xff]   ;;  %v5061_v58 = vld [vmem:[%s4903_s17 + $0x28] sm:$0xff]  }
  0x20   : > { %v4726_v57 = vld [vmem:[%s7032_s2 + $0x14] ss:$8 sps:$4 sm:$0xff]   ;;  %v4663_v59 = vld [vmem:[%s4903_s17 + $0xe8] sm:$0xff]   ;;  %v4736_v62 = vld [vmem:[%s7032_s2 + $0xf0] ss:$8 sps:$4 sm:$0xff]  }
  0x21   : > { %v4738_v63 = vld [vmem:[%s7032_s2 + $0xf4] ss:$8 sps:$4 sm:$0xff]   ;;  %v4743_v3 = vld [vmem:[%s7032_s2 + $0xe0] ss:$8 sps:$4 sm:$0xff]   ;;  %v4745_v4 = vld [vmem:[%s7032_s2 + $0xe4] ss:$8 sps:$4 sm:$0xff]  }
  0x22   : > { %737 = vmatpush1.bf16.msra.mxu0 %v4630_v12  ;;  %4601 = vmatpush1.bf16.msra.mxu1 %v4630_v12  ;;  %v5080_v0 = vld [vmem:[%s4903_s17 + $0x30] sm:$0xff]   ;;  %v5096_v6 = vld [vmem:[%s4903_s17 + $0x38] sm:$0xff]   ;;  %v4752_v9 = vld [vmem:[%s7032_s2 + $0xc4] ss:$8 sps:$4 sm:$0xff]  }
  0x23   : > { %738 = vmatprep.subr.bf16.mxu0 %v4631_v13  ;;  %4594 = vmatprep.subr.bf16.mxu1 %v4631_v13  ;;  %v4668_v1 = vld [vmem:[%s4903_s17 + $0xf0] sm:$0xff]   ;;  %v4673_v7 = vld [vmem:[%s4903_s17 + $0xf8] sm:$0xff]   ;;  %v4750_v10 = vld [vmem:[%s7032_s2 + $0xc0] ss:$8 sps:$4 sm:$0xff]  }
  0x24   : > { %v4748_v5 = vld [vmem:[%s7032_s2 + $0xd4] ss:$8 sps:$4 sm:$0xff]   ;;  %v4746_v8 = vld [vmem:[%s7032_s2 + $0xd0] ss:$8 sps:$4 sm:$0xff]   ;;  %v5112_v11 = vld [vmem:[%s4903_s17 + $0x40] sm:$0xff]  }
  0x25   : > { %v4678_v12 = vld [vmem:[%s7032_s2 + $0x170] ss:$8 sps:$4 sm:$0xff]   ;;  %v4755_v13 = vld [vmem:[%s7032_s2 + $0xb4] ss:$8 sps:$4 sm:$0xff]  }
  0x26   : > { %739 = vmatpush1.bf16.msra.mxu0 %v4633_v14  ;;  %4602 = vmatpush1.bf16.msra.mxu1 %v4633_v14  ;;  %v4688_v14 = vld [vmem:[%s7032_s2 + $0x164] ss:$8 sps:$4 sm:$0xff]  }
  0x27   : > { %740 = vmatprep.subr.bf16.mxu0 %v4634_v15  ;;  %4595 = vmatprep.subr.bf16.mxu1 %v4634_v15  ;;  %v4686_v15 = vld [vmem:[%s7032_s2 + $0x160] ss:$8 sps:$4 sm:$0xff]  }
  0x2a   : > { %741 = vmatpush1.bf16.msra.mxu0 %v4636_v16  ;;  %4603 = vmatpush1.bf16.msra.mxu1 %v4636_v16  ;;  %v4753_v16 = vld [vmem:[%s7032_s2 + $0xb0] ss:$8 sps:$4 sm:$0xff]  }
  0x2b   : > { %1079 = vmatprep.subr.bf16.mxu1 %v4641_v17  ;;  %2213 = vmatprep.subr.bf16.mxu0 %v4684_v29  ;;  %v4761_v17 = vld [vmem:[%s7032_s2 + $0xa4] ss:$8 sps:$4 sm:$0xff]   ;;  %v5174_v29 = vld [vmem:[%s4903_s17 + $0x50] sm:$0xff]  }
  0x2d   : > { %759 = vmatmul.mubr.bf16.vlgmr.msra.gmra.mxu0 %v4936_v18  ;;  %999 = vmatmul.mubr.bf16.vlgmr.msra.gmra.mxu1 %v4638_v19  ;;  %v4696_v19 = vld [vmem:[%s7032_s2 + $0x154] ss:$8 sps:$4 sm:$0xff]  }
  0x2e   : > { %1080 = vmatpush1.bf16.msra.mxu1 %v4639_v20  ;;  %768 = vmatprep.mubr.bf16.mxu0 %v7042_v2  ;;  %v5140_v20 = vld [vmem:[%s4903_s17 + $0x48] sm:$0xff]  }
  0x2f   : > { %1008 = vmatprep.mubr.bf16.mxu1 %v7042_v2  ;;  %1081 = vmatprep.subr.bf16.mxu1 %v4646_v21  ;;  %v4694_v21 = vld [vmem:[%s7032_s2 + $0x150] ss:$8 sps:$4 sm:$0xff]  }
  0x30   : > { %2214 = vmatpush1.bf16.msra.mxu0 %v4682_v28  ;;  %v4715_v28 = vld [vmem:[%s7032_s2 + $0x134] ss:$8 sps:$4 sm:$0xff]  }
  0x31   : > { %2215 = vmatprep.subr.bf16.mxu0 %v4692_v35  ;;  %v5194_v35 = vld [vmem:[%s4903_s17 + $0x58] sm:$0xff]  }
  0x32   : > { %1082 = vmatpush1.bf16.msra.mxu1 %v4644_v22  ;;  %v4764_v22 = vld [vmem:[%s7032_s2 + $0x94] ss:$8 sps:$4 sm:$0xff]  }
  0x33   : > { %1083 = vmatprep.subr.bf16.mxu1 %v4651_v23  ;;  %v4704_v23 = vld [vmem:[%s7032_s2 + $0x144] ss:$8 sps:$4 sm:$0xff]  }
  0x34   : > { %2216 = vmatpush1.bf16.msra.mxu0 %v4690_v34  ;;  %v4731_v34 = vld [vmem:[%s7032_s2 + $0x114] ss:$8 sps:$4 sm:$0xff]  }
  0x35   : > { %769 = vmatmul.mubr.bf16.gmra.mxu0 %v4955_v24  ;;  %1009 = vmatmul.mubr.bf16.gmra.mxu1 %v4643_v25  ;;  %v4762_v25 = vld [vmem:[%s7032_s2 + $0x90] ss:$8 sps:$4 sm:$0xff]  }
  0x36   : > { %778 = vmatprep.mubr.bf16.mxu0 %v7042_v2  ;;  %1018 = vmatprep.mubr.bf16.mxu1 %v7042_v2 }
  0x37   : > { %1084 = vmatpush1.bf16.msra.mxu1 %v4649_v26  ;;  %2217 = vmatprep.subr.bf16.mxu0 %v4699_v39  ;;  %v4767_v26 = vld [vmem:[%s7032_s2 + $0x84] ss:$8 sps:$4 sm:$0xff]  }
  0x38   : > { %1085 = vmatprep.subr.bf16.mxu1 %v4656_v27  ;;  %2218 = vmatpush1.bf16.msra.mxu0 %v4697_v38  ;;  %v4702_v27 = vld [vmem:[%s7032_s2 + $0x140] ss:$8 sps:$4 sm:$0xff]   ;;  %v4758_v38 = vld [vmem:[%s7032_s2 + $0x1f4] ss:$8 sps:$4 sm:$0xff]  }
  0x39   : > { %2219 = vmatprep.subr.bf16.mxu0 %v4707_v46  ;;  %v5213_v39 = vld [vmem:[%s4903_s17 + $0x60] sm:$0xff]   ;;  %v4701_v46 = vld [vmem:[%s4903_s17 + $0x70] sm:$0xff]  }
  0x3b   : > { %1086 = vmatpush1.bf16.msra.mxu1 %v4654_v32  ;;  %v4723_v32 = vld [vmem:[%s7032_s2 + $0x124] ss:$8 sps:$4 sm:$0xff]  }
  0x3c   : > { %1087 = vmatprep.subr.bf16.mxu1 %v4661_v33  ;;  %2220 = vmatpush1.bf16.msra.mxu0 %v4705_v45  ;;  %v4721_v33 = vld [vmem:[%s7032_s2 + $0x120] ss:$8 sps:$4 sm:$0xff]   ;;  %v4771_v45 = vld [vmem:[%s7032_s2 + $0x1d0] ss:$8 sps:$4 sm:$0xff]  }
  0x3d   : > { %779 = vmatmul.mubr.bf16.gmra.mxu0 %v4974_v30  ;;  %1019 = vmatmul.mubr.bf16.gmra.mxu1 %v4648_v31  ;;  %v4713_v31 = vld [vmem:[%s7032_s2 + $0x130] ss:$8 sps:$4 sm:$0xff]  }
  0x3e   : > { %788 = vmatprep.mubr.bf16.mxu0 %v7042_v2  ;;  %1028 = vmatprep.mubr.bf16.mxu1 %v7042_v2 }
  0x3f   : > { %1088 = vmatpush1.bf16.msra.mxu1 %v4659_v36  ;;  %2221 = vmatprep.subr.bf16.mxu0 %v4711_v49  ;;  %v4742_v36 = vld [vmem:[%s7032_s2 + $0x104] ss:$8 sps:$4 sm:$0xff]  }
  0x40   : > { %1089 = vmatprep.subr.bf16.mxu1 %v4666_v37  ;;  %2222 = vmatpush1.bf16.msra.mxu0 %v4709_v48  ;;  %v4740_v37 = vld [vmem:[%s7032_s2 + $0x100] ss:$8 sps:$4 sm:$0xff]   ;;  %v4776_v49 = vld [vmem:[%s7032_s2 + $0x1c4] ss:$8 sps:$4 sm:$0xff]  }
  0x41   : > { %2223 = vmatprep.subr.bf16.mxu0 %v4719_v54  ;;  %v4774_v48 = vld [vmem:[%s7032_s2 + $0x1c0] ss:$8 sps:$4 sm:$0xff]   ;;  %v5273_v54 = vld [vmem:[%s4903_s17 + $0x90] sm:$0xff]  }
  0x43   : > { %1090 = vmatpush1.bf16.msra.mxu1 %v4664_v41  ;;  %v4770_v41 = vld [vmem:[%s7032_s2 + $0x1e4] ss:$8 sps:$4 sm:$0xff]  }
  0x44   : > { %1091 = vmatprep.subr.bf16.mxu1 %v4671_v43  ;;  %2224 = vmatpush1.bf16.msra.mxu0 %v4717_v53  ;;  %v4700_v43 = vld [vmem:[%s4903_s17 + $0x68] sm:$0xff]   ;;  %v4779_v53 = vld [vmem:[%s7032_s2 + $0x1b4] ss:$8 sps:$4 sm:$0xff]  }
  0x45   : > { %789 = vmatmul.mubr.bf16.gmra.mxu0 %v5005_v40  ;;  %1029 = vmatmul.mubr.bf16.gmra.mxu1 %v4653_v42  ;;  %v4768_v42 = vld [vmem:[%s7032_s2 + $0x1e0] ss:$8 sps:$4 sm:$0xff]  }
  0x46   : > { %798 = vmatprep.mubr.bf16.mxu0 %v7042_v2  ;;  %1038 = vmatprep.mubr.bf16.mxu1 %v7042_v2 }
  0x47   : > { %1092 = vmatpush1.bf16.msra.mxu1 %v4669_v44  ;;  %2225 = vmatprep.subr.bf16.mxu0 %v4726_v57  ;;  %v4773_v44 = vld [vmem:[%s7032_s2 + $0x1d4] ss:$8 sps:$4 sm:$0xff]   ;;  %v4783_v57 = vld [vmem:[%s7032_s2 + $0x1a4] ss:$8 sps:$4 sm:$0xff]  }
  0x48   : > { %1093 = vmatprep.subr.bf16.mxu1 %v4676_v47  ;;  %2226 = vmatpush1.bf16.msra.mxu0 %v4724_v56  ;;  %v5243_v47 = vld [vmem:[%s4903_s17 + $0x78] sm:$0xff]   ;;  %v4781_v56 = vld [vmem:[%s7032_s2 + $0x1a0] ss:$8 sps:$4 sm:$0xff]  }
  0x49   : > { %2227 = vmatprep.subr.bf16.mxu0 %v4734_v61  ;;  %v4787_v61 = vld [vmem:[%s7032_s2 + $0x194] ss:$8 sps:$4 sm:$0xff]  }
  0x4b   : > { %1094 = vmatpush1.bf16.msra.mxu1 %v4674_v50  ;;  %v4712_v50 = vld [vmem:[%s4903_s17 + $0x80] sm:$0xff]  }
  0x4c   : > { %2566 = vmatprep.subr.bf16.mxu1 %v4680_v52  ;;  %2228 = vmatpush1.bf16.msra.mxu0 %v4732_v60  ;;  %v4777_v52 = vld [vmem:[%s7032_s2 + $0x1b0] ss:$8 sps:$4 sm:$0xff]  }
  0x4d   : > { %799 = vmatmul.mubr.bf16.gmra.mxu0 %v5039_v51  ;;  %1039 = vmatmul.mubr.bf16.gmra.mxu1 %v4658_v55  ;;  %v5280_v55 = vld [vmem:[%s4903_s17 + $0x98] sm:$0xff]  }
  0x4e   : > { %808 = vmatprep.mubr.bf16.mxu0 %v7042_v2  ;;  %1048 = vmatprep.mubr.bf16.mxu1 %v7042_v2  ;;  %v4785_v60 = vld [vmem:[%s7032_s2 + $0x190] ss:$8 sps:$4 sm:$0xff]  }
  0x4f   : > { %2229 = vmatprep.subr.bf16.mxu0 %v4738_v63  ;;  %v7037_v63 = vlaneseq }
  0x50   : > { %2230 = vmatpush2.bf16.msra.mxu0 %v4736_v62  ;;  %v5312_v62 = vld [vmem:[%s4903_s17 + $0xb0] sm:$0xff]  }
  0x51   : > { %2231 = vmatprep.subr.bf16.mxu0 %v4745_v4  ;;  %v5327_v4 = vshrl.u32 %v7037_v63, 7  ;;  %v4819_v63 = vld [vmem:[%s4903_s17 + $0xf0] sm:$0xff]  }
  0x53   : > { %7044 = vst [vmem:[#allocation2_spill] sm:$0xff] %v5327_v4 }
  0x54   : > { %2232 = vmatpush2.bf16.msra.mxu0 %v4743_v3  ;;  %v4791_v3 = vld [vmem:[%s7032_s2 + $0x184] ss:$8 sps:$4 sm:$0xff]  }
  0x55   : > { %809 = vmatmul.mubr.bf16.gmra.mxu0 %v5061_v58  ;;  %1049 = vmatmul.mubr.bf16.gmra.mxu1 %v4663_v59  ;;  %v5300_v59 = vld [vmem:[%s4903_s17 + $0xa8] sm:$0xff]  }
  0x56   : > { %818 = vmatprep.mubr.bf16.mxu0 %v7042_v2  ;;  %1058 = vmatprep.mubr.bf16.mxu1 %v7042_v2 }
  0x57   : > { %2233 = vmatprep.subr.bf16.mxu0 %v4748_v5  ;;  %v7039_v5 = vsub.s32 0, %v5327_v4 }
  0x58   : > { %2234 = vmatpush2.bf16.msra.mxu0 %v4746_v8 }
  0x59   : > { %2235 = vmatprep.subr.bf16.mxu0 %v4752_v9 }
  0x5c   : > { %2236 = vmatpush2.bf16.msra.mxu0 %v4750_v10 }
  0x5d   : > { %819 = vmatmul.mubr.bf16.gmra.mxu0 %v5080_v0  ;;  %1059 = vmatmul.mubr.bf16.gmra.mxu1 %v4668_v1  ;;  %v4789_v1 = vld [vmem:[%s7032_s2 + $0x180] ss:$8 sps:$4 sm:$0xff]  }
  0x5e   : > { %828 = vmatprep.mubr.bf16.mxu0 %v7042_v2  ;;  %1068 = vmatprep.mubr.bf16.mxu1 %v7042_v2 }
  0x5f   : > { %2237 = vmatprep.subr.bf16.mxu0 %v4755_v13 }
  0x60   : > { %2238 = vmatpush2.bf16.msra.mxu0 %v4753_v16 }
  0x61   : > { %2239 = vmatprep.subr.bf16.mxu0 %v4761_v17 }
  0x65   : > { %829 = vmatmul.mubr.bf16.gmra.mxu0 %v5096_v6  ;;  %1069 = vmatmul.mubr.bf16.gmra.mxu1 %v4673_v7  ;;  %v7038_v7 = vsub.s32 1, %v5327_v4 }
  0x66   : > { %838 = vmatprep.mubr.bf16.mxu0 %v7042_v2  ;;  %1111 = vmatprep.mubr.bf16.mxu1 %v7042_v2 }
  0x6d   : > { %839 = vmatmul.mubr.bf16.gmra.mxu0 %v5112_v11  ;;  %1112 = vmatmul.mubr.bf16.vlgmr.msra.gmra.mxu1 %v4936_v18  ;;  %v4759_v18 = vld [vmem:[%s7032_s2 + $0xa0] ss:$8 sps:$4 sm:$0xff]  }
  0x6e   : > { %2567 = vmatpush1.bf16.msra.mxu1 %v4678_v12  ;;  %848 = vmatprep.mubr.bf16.mxu0 %v7042_v2 }
  0x6f   : > { %1121 = vmatprep.mubr.bf16.mxu1 %v7042_v2  ;;  %2568 = vmatprep.subr.bf16.mxu1 %v4688_v14 }
  0x70   : > { %2240 = vmatpush2.bf16.msra.mxu0 %v4759_v18 }
  0x71   : > { %2241 = vmatprep.subr.bf16.mxu0 %v4764_v22 }
  0x72   : > { %2569 = vmatpush1.bf16.msra.mxu1 %v4686_v15 }
  0x73   : > { %2570 = vmatprep.subr.bf16.mxu1 %v4696_v19 }
  0x74   : > { %2242 = vmatpush2.bf16.msra.mxu0 %v4762_v25 }
  0x75   : > { %849 = vmatmul.mubr.bf16.gmra.mxu0 %v5140_v20  ;;  %1122 = vmatmul.mubr.bf16.gmra.mxu1 %v4955_v24  ;;  %v4765_v24 = vld [vmem:[%s7032_s2 + $0x80] ss:$8 sps:$4 sm:$0xff]  }
  0x76   : > { %858 = vmatprep.mubr.bf16.mxu0 %v7042_v2  ;;  %1131 = vmatprep.mubr.bf16.mxu1 %v7042_v2 }
  0x77   : > { %2571 = vmatpush1.bf16.msra.mxu1 %v4694_v21  ;;  %2243 = vmatprep.subr.bf16.mxu0 %v4767_v26 }
  0x78   : > { %2572 = vmatprep.subr.bf16.mxu1 %v4704_v23  ;;  %2244 = vmatpush2.bf16.msra.mxu0 %v4765_v24 }
  0x79   : > { %3244 = vmatprep.subr.bf16.mxu0 %v7042_v2 }
  0x7b   : > { %2573 = vmatpush1.bf16.msra.mxu1 %v4702_v27 }
  0x7c   : > { %2574 = vmatprep.subr.bf16.mxu1 %v4715_v28 }
  0x7d   : > { %859 = vmatmul.mubr.bf16.gmra.mxu0 %v5174_v29  ;;  %1132 = vmatmul.mubr.bf16.gmra.mxu1 %v4974_v30  ;;  %v4729_v30 = vld [vmem:[%s7032_s2 + $0x110] ss:$8 sps:$4 sm:$0xff]  }
  0x7e   : > { %868 = vmatprep.mubr.bf16.mxu0 %v7042_v2  ;;  %1141 = vmatprep.mubr.bf16.mxu1 %v7042_v2 }
  0x7f   : > { %2575 = vmatpush1.bf16.msra.mxu1 %v4713_v31 }
  0x80   : > { %2576 = vmatprep.subr.bf16.mxu1 %v4723_v32 }
  0x83   : > { %2577 = vmatpush1.bf16.msra.mxu1 %v4721_v33 }
  0x84   : > { %2578 = vmatprep.subr.bf16.mxu1 %v4731_v34 }
  0x85   : > { %869 = vmatmul.mubr.bf16.gmra.mxu0 %v5194_v35  ;;  %1142 = vmatmul.mubr.bf16.gmra.mxu1 %v5005_v40  ;;  %v4756_v40 = vld [vmem:[%s7032_s2 + $0x1f0] ss:$8 sps:$4 sm:$0xff]  }
  0x86   : > { %878 = vmatprep.mubr.bf16.mxu0 %v7042_v2  ;;  %1151 = vmatprep.mubr.bf16.mxu1 %v7042_v2 }
  0x87   : > { %2579 = vmatpush1.bf16.msra.mxu1 %v4729_v30 }
  0x88   : > { %2580 = vmatprep.subr.bf16.mxu1 %v4742_v36 }
  0x8b   : > { %2581 = vmatpush1.bf16.msra.mxu1 %v4740_v37 }
  0x8c   : > { %2582 = vmatprep.subr.bf16.mxu1 %v4758_v38 }
  0x8d   : > { %879 = vmatmul.mubr.bf16.gmra.mxu0 %v5213_v39  ;;  %1152 = vmatmul.mubr.bf16.gmra.mxu1 %v5039_v51  ;;  %v5260_v51 = vld [vmem:[%s4903_s17 + $0x88] sm:$0xff]  }
  0x8e   : > { %888 = vmatprep.mubr.bf16.mxu0 %v7042_v2  ;;  %1161 = vmatprep.mubr.bf16.mxu1 %v7042_v2 }
  0x8f   : > { %2583 = vmatpush2.bf16.msra.mxu1 %v4756_v40 }
  0x90   : > { %2584 = vmatprep.subr.bf16.mxu1 %v4770_v41 }
  0x93   : > { %2585 = vmatpush2.bf16.msra.mxu1 %v4768_v42 }
  0x94   : > { %2586 = vmatprep.subr.bf16.mxu1 %v4773_v44  ;;  %v4780_v44 = vld [vmem:[%s7033_s3 + $0x38] sm:$0xff]  }
  0x95   : > { %889 = vmatmul.mubr.bf16.gmra.mxu0 %v4700_v43  ;;  %1162 = vmatmul.mubr.bf16.gmra.mxu1 %v5061_v58  ;;  %v5293_v58 = vld [vmem:[%s4903_s17 + $0xa0] sm:$0xff]  }
  0x96   : > { %898 = vmatprep.mubr.bf16.mxu0 %v7042_v2  ;;  %1171 = vmatprep.mubr.bf16.mxu1 %v7042_v2 }
  0x97   : > { %2587 = vmatpush2.bf16.msra.mxu1 %v4771_v45 }
  0x98   : > { %2588 = vmatprep.subr.bf16.mxu1 %v4776_v49 }
  0x9b   : > { %2589 = vmatpush2.bf16.msra.mxu1 %v4774_v48 }
  0x9c   : > { %2590 = vmatprep.subr.bf16.mxu1 %v4779_v53 }
  0x9d   : > { %899 = vmatmul.mubr.bf16.gmra.mxu0 %v4701_v46  ;;  %1172 = vmatmul.mubr.bf16.gmra.mxu1 %v5080_v0  ;;  %v5318_v0 = vld [vmem:[%s4903_s17 + $0xb8] sm:$0xff]  }
  0x9e   : > { %908 = vmatprep.mubr.bf16.mxu0 %v7042_v2  ;;  %1181 = vmatprep.mubr.bf16.mxu1 %v7042_v2 }
  0x9f   : > { %2591 = vmatpush2.bf16.msra.mxu1 %v4777_v52 }
  0xa0   : > { %2592 = vmatprep.subr.bf16.mxu1 %v4783_v57 }
  0xa3   : > { %2593 = vmatpush2.bf16.msra.mxu1 %v4781_v56 }
  0xa4   : > { %2594 = vmatprep.subr.bf16.mxu1 %v4787_v61 }
  0xa5   : > { %909 = vmatmul.mubr.bf16.gmra.mxu0 %v5243_v47  ;;  %1182 = vmatmul.mubr.bf16.gmra.mxu1 %v5096_v6  ;;  %v5336_v6 = vld [vmem:[%s7035_s5] ss:$4 sm:$0xf] }
  0xa6   : > { %918 = vmatprep.mubr.bf16.mxu0 %v7042_v2  ;;  %1191 = vmatprep.mubr.bf16.mxu1 %v7042_v2  ;;  %v5342_v8 = vrot.slane %v5336_v6, %v7039_v5 }
  0xa7   : > { %2595 = vmatpush2.bf16.msra.mxu1 %v4785_v60 }
  0xa8   : > { %2596 = vmatprep.subr.bf16.mxu1 %v4791_v3 }
  0xab   : > { %2597 = vmatpush2.bf16.msra.mxu1 %v4789_v1 }
  0xad   : > { %919 = vmatmul.mubr.bf16.gmra.mxu0 %v4712_v50  ;;  %1192 = vmatmul.mubr.bf16.gmra.mxu1 %v5112_v11  ;;  %v5347_v11 = vrot.slane %v5336_v6, %v7038_v7 }
  0xae   : > { %928 = vmatprep.mubr.bf16.mxu0 %v7042_v2  ;;  %1201 = vmatprep.mubr.bf16.mxu1 %v7042_v2 }
  0xb5   : > { %929 = vmatmul.mubr.bf16.gmra.mxu0 %v5260_v51  ;;  %1202 = vmatmul.mubr.bf16.gmra.mxu1 %v5140_v20 }
  0xb6   : > { %938 = vmatprep.mubr.bf16.mxu0 %v7042_v2  ;;  %1211 = vmatprep.mubr.bf16.mxu1 %v7042_v2 }
  0xbd   : > { %939 = vmatmul.mubr.bf16.gmra.mxu0 %v5273_v54  ;;  %1212 = vmatmul.mubr.bf16.gmra.mxu1 %v5174_v29 }
  0xbe   : > { %948 = vmatprep.mubr.bf16.mxu0 %v7042_v2  ;;  %1221 = vmatprep.mubr.bf16.mxu1 %v7042_v2 }
  0xc5   : > { %949 = vmatmul.mubr.bf16.gmra.mxu0 %v5280_v55  ;;  %1222 = vmatmul.mubr.bf16.gmra.mxu1 %v5194_v35 }
  0xc6   : > { %958 = vmatprep.mubr.bf16.mxu0 %v7042_v2  ;;  %1231 = vmatprep.mubr.bf16.mxu1 %v7042_v2 }
  0xcd   : > { %959 = vmatmul.mubr.bf16.gmra.mxu0 %v5293_v58  ;;  %1232 = vmatmul.mubr.bf16.gmra.mxu1 %v5213_v39 }
  0xce   : > { %968 = vmatprep.mubr.bf16.mxu0 %v7042_v2  ;;  %1241 = vmatprep.mubr.bf16.mxu1 %v7042_v2 }
  0xd5   : > { %969 = vmatmul.mubr.bf16.gmra.mxu0 %v5300_v59  ;;  %1242 = vmatmul.mubr.bf16.gmra.mxu1 %v4700_v43 }
  0xd6   : > { %978 = vmatprep.mubr.bf16.mxu0 %v7042_v2  ;;  %1251 = vmatprep.mubr.bf16.mxu1 %v7042_v2 }
  0xdd   : > { %979 = vmatmul.mubr.bf16.gmra.mxu0 %v5312_v62  ;;  %1252 = vmatmul.mubr.bf16.gmra.mxu1 %v4701_v46 }
  0xde   : > { %988 = vmatprep.mubr.bf16.mxu0 %v7042_v2  ;;  %1261 = vmatprep.mubr.bf16.mxu1 %v7042_v2 }
  0xe5   : > { %989 = vmatmul.mubr.bf16.gmra.mxu0 %v5318_v0  ;;  %1262 = vmatmul.mubr.bf16.gmra.mxu1 %v5243_v47 }
  0xe6   : > { %1271 = vmatprep.mubr.bf16.mxu1 %v7042_v2 }
  0xed   : > { %v760_v9 = vpop.f32.mrf.mxu0  ;;  %v1000_v10 = vpop.f32.mrf.mxu1  ;;  %1272 = vmatmul.mubr.bf16.gmra.mxu1 %v4712_v50 }
  0xee   : > { %1281 = vmatprep.mubr.bf16.mxu1 %v7042_v2  ;;  %v761_v12 = vadd.f32 %v760_v9, %v5342_v8  ;;  %v1001_v13 = vadd.f32 %v1000_v10, %v5342_v8  ;;  %v4784_v9 = vld [vmem:[%s7033_s3 + $0x30] sm:$0xff]  }
  0xef   : > { %v762_v14 = vpop.f32.mrf.mxu0  ;;  %v1002_v15 = vpop.f32.mrf.mxu1 }
  0xf0   : > { %v763_v16 = vadd.f32 %v762_v14, %v5347_v11  ;;  %v1003_v20 = vadd.f32 %v1002_v15, %v5347_v11  ;;  %v1432_v22 = vmax.f32 %v761_v12, 0.0  ;;  %v1624_v23 = vmax.f32 %v1001_v13, 0.0 }
  0xf1   : > { %v764_v17 = vpop.f32.mrf.mxu0  ;;  %v1004_v19 = vpop.f32.mrf.mxu1 }
  0xf2   : > { %v765_v18 = vadd.f32 %v764_v17, %v5342_v8  ;;  %v1005_v21 = vadd.f32 %v1004_v19, %v5342_v8  ;;  %v1433_v25 = vmax.f32 %v763_v16, 0.0  ;;  %v1625_v34 = vmax.f32 %v1003_v20, 0.0 }
  0xf3   : > { %v766_v26 = vpop.f32.mrf.mxu0  ;;  %v1006_v27 = vpop.f32.mrf.mxu1 }
  0xf4   : > { %v1436_v28 = vmax.f32 %v765_v18, 0.0  ;;  %v1628_v24 = vmax.f32 %v1005_v21, 0.0  ;;  %v767_v29 = vadd.f32 %v766_v26, %v5347_v11  ;;  %v1007_v31 = vadd.f32 %v1006_v27, %v5347_v11 }
  0xf5   : > { %v770_v32 = vpop.f32.mrf.mxu0  ;;  %v1010_v33 = vpop.f32.mrf.mxu1  ;;  %1282 = vmatmul.mubr.bf16.gmra.mxu1 %v5260_v51 }
  0xf6   : > { %v5359_v35 = vpack.c.bf16 %v1628_v24, %v1624_v23  ;;  %v1437_v30 = vmax.f32 %v767_v29, 0.0  ;;  %v1629_v36 = vmax.f32 %v1007_v31, 0.0  ;;  %1291 = vmatprep.mubr.bf16.mxu1 %v7042_v2  ;;  %v1688_v37 = vpack.c.bf16 %v1436_v28, %v1432_v22 }
  0xf7   : > { %v771_v38 = vadd.f32 %v770_v32, %v5342_v8  ;;  %v1011_v39 = vadd.f32 %v1010_v33, %v5342_v8  ;;  %v772_v40 = vpop.f32.mrf.mxu0  ;;  %v1012_v41 = vpop.f32.mrf.mxu1 }
  0xf8   : > { %v773_v42 = vadd.f32 %v772_v40, %v5347_v11  ;;  %v1689_v43 = vpack.c.bf16 %v1437_v30, %v1433_v25  ;;  %v5368_v45 = vpack.c.bf16 %v1629_v36, %v1625_v34  ;;  %v1013_v48 = vadd.f32 %v1012_v41, %v5347_v11  ;;  %v4792_v40 = vld [vmem:[%s7033_s3 + $0x20] sm:$0xff]  }
  0xf9   : > { %v774_v46 = vpop.f32.mrf.mxu0  ;;  %v1014_v47 = vpop.f32.mrf.mxu1  ;;  %v1440_v51 = vmax.f32 %v771_v38, 0.0  ;;  %v1632_v52 = vmax.f32 %v1011_v39, 0.0 }
  0xfa   : > { %v775_v49 = vadd.f32 %v774_v46, %v5342_v8  ;;  %v1015_v50 = vadd.f32 %v1014_v47, %v5342_v8  ;;  %2245 = vmatprep.mubr.bf16.mxu0 %v1689_v43  ;;  %v1441_v53 = vmax.f32 %v773_v42, 0.0  ;;  %v1633_v13 = vmax.f32 %v1013_v48, 0.0 }
  0xfb   : > { %v776_v56 = vpop.f32.mrf.mxu0  ;;  %v1016_v57 = vpop.f32.mrf.mxu1  ;;  %2246 = vmatmul.mubr.bf16.vlgmr.msra.gmra.mxu0 %v1688_v37 }
  0xfc   : > { %v1444_v60 = vmax.f32 %v775_v49, 0.0  ;;  %v1636_v61 = vmax.f32 %v1015_v50, 0.0  ;;  %v777_v1 = vadd.f32 %v776_v56, %v5347_v11  ;;  %v1017_v3 = vadd.f32 %v1016_v57, %v5347_v11  ;;  %3245 = vmatpush1.bf16.msra.mxu0 %v4780_v44 }
  0xfd   : > { %v780_v10 = vpop.f32.mrf.mxu0  ;;  %v1020_v12 = vpop.f32.mrf.mxu1  ;;  %1292 = vmatmul.mubr.bf16.gmra.mxu1 %v5273_v54  ;;  %3246 = vmatprep.subr.bf16.mxu0 %v7042_v2  ;;  %v4788_v54 = vld [vmem:[%s7033_s3 + $0x28] sm:$0xff]  }
  0xfe   : > { %v5380_v14 = vpack.c.bf16 %v1636_v61, %v1632_v52  ;;  %v1445_v15 = vmax.f32 %v777_v1, 0.0  ;;  %v1637_v16 = vmax.f32 %v1017_v3, 0.0  ;;  %1301 = vmatprep.mubr.bf16.mxu1 %v7042_v2  ;;  %v1692_v17 = vpack.c.bf16 %v1444_v60, %v1440_v51 }
  0xff   : > { %v781_v19 = vadd.f32 %v780_v10, %v5342_v8  ;;  %v1021_v20 = vadd.f32 %v1020_v12, %v5342_v8  ;;  %v782_v18 = vpop.f32.mrf.mxu0  ;;  %v1022_v21 = vpop.f32.mrf.mxu1 }
 0x100   : > { %v783_v22 = vadd.f32 %v782_v18, %v5347_v11  ;;  %v1693_v23 = vpack.c.bf16 %v1445_v15, %v1441_v53  ;;  %3247 = vmatpush1.bf16.msra.mxu0 %v4784_v9  ;;  %v5389_v25 = vpack.c.bf16 %v1637_v16, %v1633_v13  ;;  %v1023_v28 = vadd.f32 %v1022_v21, %v5347_v11 }
 0x101   : > { %v784_v26 = vpop.f32.mrf.mxu0  ;;  %v1024_v27 = vpop.f32.mrf.mxu1  ;;  %3248 = vmatprep.subr.bf16.mxu0 %v7042_v2  ;;  %v1448_v31 = vmax.f32 %v781_v19, 0.0  ;;  %v1640_v32 = vmax.f32 %v1021_v20, 0.0 }
 0x102   : > { %v785_v24 = vadd.f32 %v784_v26, %v5342_v8  ;;  %v1025_v29 = vadd.f32 %v1024_v27, %v5342_v8  ;;  %2255 = vmatprep.mubr.bf16.mxu0 %v1693_v23  ;;  %v1449_v33 = vmax.f32 %v783_v22, 0.0  ;;  %v1641_v43 = vmax.f32 %v1023_v28, 0.0  ;;  %v4794_v28 = vld [vmem:[%s7033_s3 + $0x10] sm:$0xff]  }
 0x103   : > { %v786_v34 = vpop.f32.mrf.mxu0  ;;  %v1026_v30 = vpop.f32.mrf.mxu1  ;;  %2256 = vmatmul.mubr.bf16.gmra.mxu0 %v1692_v17 }
 0x104   : > { %v1452_v36 = vmax.f32 %v785_v24, 0.0  ;;  %v1644_v37 = vmax.f32 %v1025_v29, 0.0  ;;  %v787_v38 = vadd.f32 %v786_v34, %v5347_v11  ;;  %v1027_v39 = vadd.f32 %v1026_v30, %v5347_v11  ;;  %3249 = vmatpush1.bf16.msra.mxu0 %v4788_v54 }
 0x105   : > { %v790_v41 = vpop.f32.mrf.mxu0  ;;  %v1030_v42 = vpop.f32.mrf.mxu1  ;;  %1302 = vmatmul.mubr.bf16.gmra.mxu1 %v5280_v55  ;;  %3250 = vmatprep.subr.bf16.mxu0 %v7042_v2  ;;  %v4793_v55 = vld [vmem:[%s7033_s3 + $0x18] sm:$0xff]  }
 0x106   : > { %v5402_v44 = vpack.c.bf16 %v1644_v37, %v1640_v32  ;;  %v1453_v46 = vmax.f32 %v787_v38, 0.0  ;;  %v1645_v47 = vmax.f32 %v1027_v39, 0.0  ;;  %1311 = vmatprep.mubr.bf16.mxu1 %v7042_v2  ;;  %v1696_v48 = vpack.c.bf16 %v1452_v36, %v1448_v31 }
 0x107   : > { %v791_v49 = vadd.f32 %v790_v41, %v5342_v8  ;;  %v1031_v50 = vadd.f32 %v1030_v42, %v5342_v8  ;;  %v792_v51 = vpop.f32.mrf.mxu0  ;;  %v1032_v52 = vpop.f32.mrf.mxu1 }
 0x108   : > { %v793_v53 = vadd.f32 %v792_v51, %v5347_v11  ;;  %v1697_v56 = vpack.c.bf16 %v1453_v46, %v1449_v33  ;;  %3251 = vmatpush1.bf16.msra.mxu0 %v4792_v40  ;;  %v5411_v57 = vpack.c.bf16 %v1645_v47, %v1641_v43  ;;  %v1033_v1 = vadd.f32 %v1032_v52, %v5347_v11 }
 0x109   : > { %v794_v60 = vpop.f32.mrf.mxu0  ;;  %v1034_v61 = vpop.f32.mrf.mxu1  ;;  %3252 = vmatprep.subr.bf16.mxu0 %v7042_v2  ;;  %v1456_v10 = vmax.f32 %v791_v49, 0.0  ;;  %v1648_v12 = vmax.f32 %v1031_v50, 0.0 }
 0x10a   : > { %v795_v3 = vadd.f32 %v794_v60, %v5342_v8  ;;  %v1035_v9 = vadd.f32 %v1034_v61, %v5342_v8  ;;  %2265 = vmatprep.mubr.bf16.mxu0 %v1697_v56  ;;  %v1457_v13 = vmax.f32 %v793_v53, 0.0  ;;  %v1649_v23 = vmax.f32 %v1033_v1, 0.0 }
 0x10b   : > { %v796_v15 = vpop.f32.mrf.mxu0  ;;  %v1036_v16 = vpop.f32.mrf.mxu1  ;;  %2266 = vmatmul.mubr.bf16.gmra.mxu0 %v1696_v48 }
 0x10c   : > { %v1460_v17 = vmax.f32 %v795_v3, 0.0  ;;  %v1652_v19 = vmax.f32 %v1035_v9, 0.0  ;;  %v797_v20 = vadd.f32 %v796_v15, %v5347_v11  ;;  %v1037_v18 = vadd.f32 %v1036_v16, %v5347_v11  ;;  %3253 = vmatpush1.bf16.msra.mxu0 %v4793_v55 }
 0x10d   : > { %v800_v21 = vpop.f32.mrf.mxu0  ;;  %v1040_v22 = vpop.f32.mrf.mxu1  ;;  %1312 = vmatmul.mubr.bf16.gmra.mxu1 %v5293_v58  ;;  %3254 = vmatprep.subr.bf16.mxu0 %v7042_v2 }
 0x10e   : > { %v5421_v54 = vpack.c.bf16 %v1652_v19, %v1648_v12  ;;  %v1461_v26 = vmax.f32 %v797_v20, 0.0  ;;  %v1653_v27 = vmax.f32 %v1037_v18, 0.0  ;;  %1321 = vmatprep.mubr.bf16.mxu1 %v7042_v2  ;;  %v1700_v24 = vpack.c.bf16 %v1460_v17, %v1456_v10 }
 0x10f   : > { %v801_v29 = vadd.f32 %v800_v21, %v5342_v8  ;;  %v1041_v31 = vadd.f32 %v1040_v22, %v5342_v8  ;;  %v802_v32 = vpop.f32.mrf.mxu0  ;;  %v1042_v58 = vpop.f32.mrf.mxu1 }
 0x110   : > { %v803_v33 = vadd.f32 %v802_v32, %v5347_v11  ;;  %v1701_v34 = vpack.c.bf16 %v1461_v26, %v1457_v13  ;;  %3255 = vmatpush1.bf16.msra.mxu0 %v4794_v28  ;;  %v5430_v30 = vpack.c.bf16 %v1653_v27, %v1649_v23  ;;  %v1043_v38 = vadd.f32 %v1042_v58, %v5347_v11 }
 0x111   : > { %v804_v36 = vpop.f32.mrf.mxu0  ;;  %v1044_v37 = vpop.f32.mrf.mxu1  ;;  %3256 = vmatprep.subr.bf16.mxu0 %v7042_v2  ;;  %v1464_v41 = vmax.f32 %v801_v29, 0.0  ;;  %v1656_v42 = vmax.f32 %v1041_v31, 0.0 }
 0x112   : > { %v805_v39 = vadd.f32 %v804_v36, %v5342_v8  ;;  %v1045_v40 = vadd.f32 %v1044_v37, %v5342_v8  ;;  %2275 = vmatprep.mubr.bf16.mxu0 %v1701_v34  ;;  %v1465_v43 = vmax.f32 %v803_v33, 0.0  ;;  %v1657_v56 = vmax.f32 %v1043_v38, 0.0  ;;  %v4795_v38 = vld [vmem:[%s7033_s3 + $0x8] sm:$0xff]  }
 0x113   : > { %v806_v46 = vpop.f32.mrf.mxu0  ;;  %v1046_v47 = vpop.f32.mrf.mxu1  ;;  %2276 = vmatmul.mubr.bf16.gmra.mxu0 %v1700_v24 }
 0x114   : > { %v1468_v48 = vmax.f32 %v805_v39, 0.0  ;;  %v1660_v49 = vmax.f32 %v1045_v40, 0.0  ;;  %v807_v50 = vadd.f32 %v806_v46, %v5347_v11  ;;  %v1047_v51 = vadd.f32 %v1046_v47, %v5347_v11  ;;  %3257 = vmatpush1.bf16.msra.mxu0 %v4795_v38 }
 0x115   : > { %v810_v52 = vpop.f32.mrf.mxu0  ;;  %v1050_v53 = vpop.f32.mrf.mxu1  ;;  %1322 = vmatmul.mubr.bf16.gmra.mxu1 %v5300_v59  ;;  %3258 = vmatprep.subr.bf16.mxu0 %v7042_v2 }
 0x116   : > { %v5439_v55 = vpack.c.bf16 %v1660_v49, %v1656_v42  ;;  %v1469_v60 = vmax.f32 %v807_v50, 0.0  ;;  %v1661_v61 = vmax.f32 %v1047_v51, 0.0  ;;  %1331 = vmatprep.mubr.bf16.mxu1 %v7042_v2  ;;  %v1704_v1 = vpack.c.bf16 %v1468_v48, %v1464_v41 }
 0x117   : > { %v811_v3 = vadd.f32 %v810_v52, %v5342_v8  ;;  %v1051_v9 = vadd.f32 %v1050_v53, %v5342_v8  ;;  %v812_v10 = vpop.f32.mrf.mxu0  ;;  %v1052_v12 = vpop.f32.mrf.mxu1 }
 0x118   : > { %v813_v13 = vadd.f32 %v812_v10, %v5347_v11  ;;  %v1705_v15 = vpack.c.bf16 %v1469_v60, %v1465_v43  ;;  %v5445_v16 = vpack.c.bf16 %v1661_v61, %v1657_v56  ;;  %v1053_v19 = vadd.f32 %v1052_v12, %v5347_v11 }
 0x119   : > { %v814_v59 = vpop.f32.mrf.mxu0  ;;  %v1054_v17 = vpop.f32.mrf.mxu1  ;;  %v1472_v21 = vmax.f32 %v811_v3, 0.0  ;;  %v1664_v22 = vmax.f32 %v1051_v9, 0.0 }
 0x11a   : > { %v815_v20 = vadd.f32 %v814_v59, %v5342_v8  ;;  %v1055_v18 = vadd.f32 %v1054_v17, %v5342_v8  ;;  %2285 = vmatprep.mubr.bf16.mxu0 %v1705_v15  ;;  %v1473_v23 = vmax.f32 %v813_v13, 0.0  ;;  %v1665_v33 = vmax.f32 %v1053_v19, 0.0 }
 0x11b   : > { %v816_v26 = vpop.f32.mrf.mxu0  ;;  %v1056_v27 = vpop.f32.mrf.mxu1  ;;  %2286 = vmatmul.mubr.bf16.gmra.mxu0 %v1704_v1 }
 0x11c   : > { %v1476_v28 = vmax.f32 %v815_v20, 0.0  ;;  %v1668_v24 = vmax.f32 %v1055_v18, 0.0  ;;  %v817_v29 = vadd.f32 %v816_v26, %v5347_v11  ;;  %v1057_v31 = vadd.f32 %v1056_v27, %v5347_v11 }
 0x11d   : > { %v820_v32 = vpop.f32.mrf.mxu0  ;;  %v1060_v58 = vpop.f32.mrf.mxu1  ;;  %1332 = vmatmul.mubr.bf16.gmra.mxu1 %v5312_v62 }
 0x11e   : > { %v5453_v34 = vpack.c.bf16 %v1668_v24, %v1664_v22  ;;  %v1477_v36 = vmax.f32 %v817_v29, 0.0  ;;  %v1669_v37 = vmax.f32 %v1057_v31, 0.0  ;;  %1341 = vmatprep.mubr.bf16.mxu1 %v7042_v2  ;;  %v1708_v39 = vpack.c.bf16 %v1476_v28, %v1472_v21 }
 0x11f   : > { %v821_v40 = vadd.f32 %v820_v32, %v5342_v8  ;;  %v1061_v41 = vadd.f32 %v1060_v58, %v5342_v8  ;;  %v822_v42 = vpop.f32.mrf.mxu0  ;;  %v1062_v43 = vpop.f32.mrf.mxu1 }
 0x120   : > { %v823_v62 = vadd.f32 %v822_v42, %v5347_v11  ;;  %v1709_v46 = vpack.c.bf16 %v1477_v36, %v1473_v23  ;;  %v5462_v47 = vpack.c.bf16 %v1669_v37, %v1665_v33  ;;  %v1063_v50 = vadd.f32 %v1062_v43, %v5347_v11 }
 0x121   : > { %v824_v48 = vpop.f32.mrf.mxu0  ;;  %v1064_v49 = vpop.f32.mrf.mxu1  ;;  %v1480_v53 = vmax.f32 %v821_v40, 0.0  ;;  %v1672_v56 = vmax.f32 %v1061_v41, 0.0 }
 0x122   : > { %v825_v51 = vadd.f32 %v824_v48, %v5342_v8  ;;  %v1065_v52 = vadd.f32 %v1064_v49, %v5342_v8  ;;  %2295 = vmatprep.mubr.bf16.mxu0 %v1709_v46  ;;  %v1481_v60 = vmax.f32 %v823_v62, 0.0  ;;  %v1673_v59 = vmax.f32 %v1063_v50, 0.0  ;;  %v4813_v48 = vld [vmem:[%s4903_s17 + $0xc0] sm:$0xff]  }
 0x123   : > { %v826_v61 = vpop.f32.mrf.mxu0  ;;  %v1066_v1 = vpop.f32.mrf.mxu1  ;;  %2296 = vmatmul.mubr.bf16.gmra.mxu0 %v1708_v39 }
 0x124   : > { %v1484_v3 = vmax.f32 %v825_v51, 0.0  ;;  %v1676_v9 = vmax.f32 %v1065_v52, 0.0  ;;  %v827_v10 = vadd.f32 %v826_v61, %v5347_v11  ;;  %v1067_v12 = vadd.f32 %v1066_v1, %v5347_v11 }
 0x125   : > { %v830_v13 = vpop.f32.mrf.mxu0  ;;  %v1070_v15 = vpop.f32.mrf.mxu1  ;;  %1342 = vmatmul.mubr.bf16.gmra.mxu1 %v5318_v0 }
 0x126   : > { %v5471_v17 = vpack.c.bf16 %v1676_v9, %v1672_v56  ;;  %v1485_v19 = vmax.f32 %v827_v10, 0.0  ;;  %v1677_v20 = vmax.f32 %v1067_v12, 0.0  ;;  %1351 = vmatprep.mubr.bf16.mxu1 %v7042_v2  ;;  %v1712_v18 = vpack.c.bf16 %v1484_v3, %v1480_v53  ;;  %v4796_v53 = vld [vmem:[%s7033_s3] sm:$0xff]  }
 0x127   : > { %v831_v21 = vadd.f32 %v830_v13, %v5342_v8  ;;  %v1071_v22 = vadd.f32 %v1070_v15, %v5342_v8  ;;  %v832_v23 = vpop.f32.mrf.mxu0  ;;  %v1072_v26 = vpop.f32.mrf.mxu1  ;;  %3259 = vmatpush1.bf16.msra.mxu0 %v4796_v53  ;;  %v4797_v53 = vld [vmem:[%s7033_s3 + $0x78] sm:$0xff]  }
 0x128   : > { %7045 = vst [vmem:[#allocation3_spill] sm:$0xff] %v5471_v17  ;;  %v833_v27 = vadd.f32 %v832_v23, %v5347_v11  ;;  %v1713_v28 = vpack.c.bf16 %v1485_v19, %v1481_v60  ;;  %v5477_v24 = vpack.c.bf16 %v1677_v20, %v1673_v59  ;;  %v1073_v31 = vadd.f32 %v1072_v26, %v5347_v11 }
 0x129   : > { %v834_v0 = vpop.f32.mrf.mxu0  ;;  %v1074_v29 = vpop.f32.mrf.mxu1  ;;  %v1488_v33 = vmax.f32 %v831_v21, 0.0  ;;  %v1680_v36 = vmax.f32 %v1071_v22, 0.0  ;;  %3260 = vmatprep.subr.bf16.mxu0 %v7042_v2 }
 0x12a   : > { %7046 = vst [vmem:[#allocation4_spill] sm:$0xff] %v5477_v24  ;;  %v835_v32 = vadd.f32 %v834_v0, %v5342_v8  ;;  %v1075_v58 = vadd.f32 %v1074_v29, %v5342_v8  ;;  %2305 = vmatprep.mubr.bf16.mxu0 %v1713_v28  ;;  %v1489_v37 = vmax.f32 %v833_v27, 0.0  ;;  %v1681_v49 = vmax.f32 %v1073_v31, 0.0  ;;  %v4814_v27 = vld [vmem:[%s4903_s17 + $0xc8] sm:$0xff]  }
 0x12b   : > { %v836_v38 = vpop.f32.mrf.mxu0  ;;  %v1076_v39 = vpop.f32.mrf.mxu1  ;;  %2306 = vmatmul.mubr.bf16.gmra.mxu0 %v1712_v18 }
 0x12c   : > { %v1492_v40 = vmax.f32 %v835_v32, 0.0  ;;  %v1684_v41 = vmax.f32 %v1075_v58, 0.0  ;;  %v837_v42 = vadd.f32 %v836_v38, %v5347_v11  ;;  %v1077_v43 = vadd.f32 %v1076_v39, %v5347_v11  ;;  %3261 = vmatpush2.bf16.msra.mxu0 %v4797_v53 }
 0x12d   : > { %v840_v62 = vpop.f32.mrf.mxu0  ;;  %v5484_v46 = vpop.f32.mrf.mxu1  ;;  %1352 = vmatmul.mubr.bf16.gmra.mxu1 %v4813_v48  ;;  %3262 = vmatprep.subr.bf16.mxu0 %v7042_v2 }
 0x12e   : > { %v5487_v50 = vpack.c.bf16 %v1684_v41, %v1680_v36  ;;  %v1493_v51 = vmax.f32 %v837_v42, 0.0  ;;  %v1685_v52 = vmax.f32 %v1077_v43, 0.0  ;;  %1361 = vmatprep.mubr.bf16.mxu1 %v7042_v2  ;;  %v1716_v56 = vpack.c.bf16 %v1492_v40, %v1488_v33 }
 0x12f   : > { %v841_v60 = vadd.f32 %v840_v62, %v5342_v8  ;;  %v842_v61 = vpop.f32.mrf.mxu0  ;;  %v5494_v1 = vpop.f32.mrf.mxu1 }
 0x130   : > { %7047 = vst [vmem:[#allocation5_spill] sm:$0xff] %v5487_v50  ;;  %v843_v3 = vadd.f32 %v842_v61, %v5347_v11  ;;  %v1717_v9 = vpack.c.bf16 %v1493_v51, %v1489_v37  ;;  %v5497_v10 = vpack.c.bf16 %v1685_v52, %v1681_v49  ;;  %v4815_v51 = vld [vmem:[%s4903_s17 + $0xd0] sm:$0xff]  }
 0x131   : > { %v844_v12 = vpop.f32.mrf.mxu0  ;;  %v5499_v13 = vpop.f32.mrf.mxu1  ;;  %v1496_v59 = vmax.f32 %v841_v60, 0.0 }
 0x132   : > { %7048 = vst [vmem:[#allocation6_spill] sm:$0xff] %v5497_v10  ;;  %v845_v15 = vadd.f32 %v844_v12, %v5342_v8  ;;  %2315 = vmatprep.mubr.bf16.mxu0 %v1717_v9  ;;  %v1497_v18 = vmax.f32 %v843_v3, 0.0 }
 0x133   : > { %v846_v19 = vpop.f32.mrf.mxu0  ;;  %v5503_v20 = vpop.f32.mrf.mxu1  ;;  %2316 = vmatmul.mubr.bf16.gmra.mxu0 %v1716_v56 }
 0x134   : > { %v1500_v21 = vmax.f32 %v845_v15, 0.0  ;;  %v847_v22 = vadd.f32 %v846_v19, %v5347_v11 }
 0x135   : > { %v850_v23 = vpop.f32.mrf.mxu0  ;;  %v5506_v26 = vpop.f32.mrf.mxu1  ;;  %1362 = vmatmul.mubr.bf16.gmra.mxu1 %v4814_v27 }
 0x136   : > { %v1501_v28 = vmax.f32 %v847_v22, 0.0  ;;  %1371 = vmatprep.mubr.bf16.mxu1 %v7042_v2  ;;  %v1720_v0 = vpack.c.bf16 %v1500_v21, %v1496_v59  ;;  %v851_v29 = vadd.f32 %v850_v23, %v5342_v8 }
 0x137   : > { %v852_v31 = vpop.f32.mrf.mxu0  ;;  %v5511_v32 = vpop.f32.mrf.mxu1 }
 0x138   : > { %v853_v58 = vadd.f32 %v852_v31, %v5347_v11  ;;  %v1721_v33 = vpack.c.bf16 %v1501_v28, %v1497_v18  ;;  %v1504_v39 = vmax.f32 %v851_v29, 0.0  ;;  %v4816_v31 = vld [vmem:[%s4903_s17 + $0xd8] sm:$0xff]  }
 0x139   : > { %v854_v36 = vpop.f32.mrf.mxu0  ;;  %v5514_v37 = vpop.f32.mrf.mxu1 }
 0x13a   : > { %v855_v38 = vadd.f32 %v854_v36, %v5342_v8  ;;  %2325 = vmatprep.mubr.bf16.mxu0 %v1721_v33  ;;  %v1505_v42 = vmax.f32 %v853_v58, 0.0 }
 0x13b   : > { %v856_v40 = vpop.f32.mrf.mxu0  ;;  %v5517_v41 = vpop.f32.mrf.mxu1  ;;  %2326 = vmatmul.mubr.bf16.gmra.mxu0 %v1720_v0 }
 0x13c   : > { %v1508_v43 = vmax.f32 %v855_v38, 0.0  ;;  %v857_v62 = vadd.f32 %v856_v40, %v5347_v11 }
 0x13d   : > { %v860_v48 = vpop.f32.mrf.mxu0  ;;  %v5520_v49 = vpop.f32.mrf.mxu1  ;;  %1372 = vmatmul.mubr.bf16.gmra.mxu1 %v4815_v51 }
 0x13e   : > { %v1509_v52 = vmax.f32 %v857_v62, 0.0  ;;  %1381 = vmatprep.mubr.bf16.mxu1 %v7042_v2  ;;  %v1724_v56 = vpack.c.bf16 %v1508_v43, %v1504_v39  ;;  %v861_v60 = vadd.f32 %v860_v48, %v5342_v8 }
 0x13f   : > { %v862_v61 = vpop.f32.mrf.mxu0  ;;  %v5528_v3 = vpop.f32.mrf.mxu1 }
 0x140   : > { %v863_v9 = vadd.f32 %v862_v61, %v5347_v11  ;;  %v1725_v12 = vpack.c.bf16 %v1509_v52, %v1505_v42  ;;  %v1512_v18 = vmax.f32 %v861_v60, 0.0 }
 0x141   : > { %v864_v15 = vpop.f32.mrf.mxu0  ;;  %v5531_v59 = vpop.f32.mrf.mxu1 }
 0x142   : > { %v865_v19 = vadd.f32 %v864_v15, %v5342_v8  ;;  %2335 = vmatprep.mubr.bf16.mxu0 %v1725_v12  ;;  %v1513_v23 = vmax.f32 %v863_v9, 0.0  ;;  %v4817_v15 = vld [vmem:[%s4903_s17 + $0xe0] sm:$0xff]  }
 0x143   : > { %v866_v21 = vpop.f32.mrf.mxu0  ;;  %v5535_v22 = vpop.f32.mrf.mxu1  ;;  %2336 = vmatmul.mubr.bf16.gmra.mxu0 %v1724_v56 }
 0x144   : > { %v1516_v27 = vmax.f32 %v865_v19, 0.0  ;;  %v867_v28 = vadd.f32 %v866_v21, %v5347_v11 }
 0x145   : > { %v870_v0 = vpop.f32.mrf.mxu0  ;;  %v5538_v29 = vpop.f32.mrf.mxu1  ;;  %1382 = vmatmul.mubr.bf16.gmra.mxu1 %v4816_v31 }
 0x146   : > { %v1517_v58 = vmax.f32 %v867_v28, 0.0  ;;  %1391 = vmatprep.mubr.bf16.mxu1 %v7042_v2  ;;  %v1728_v33 = vpack.c.bf16 %v1516_v27, %v1512_v18  ;;  %v871_v36 = vadd.f32 %v870_v0, %v5342_v8  ;;  %v4798_v18 = vld [vmem:[%s7033_s3 + $0x70] sm:$0xff]  }
 0x147   : > { %v872_v38 = vpop.f32.mrf.mxu0  ;;  %v5543_v39 = vpop.f32.mrf.mxu1  ;;  %3263 = vmatpush2.bf16.msra.mxu0 %v4798_v18 }
 0x148   : > { %v873_v40 = vadd.f32 %v872_v38, %v5347_v11  ;;  %v1729_v42 = vpack.c.bf16 %v1517_v58, %v1513_v23  ;;  %v1520_v51 = vmax.f32 %v871_v36, 0.0  ;;  %3264 = vmatprep.subr.bf16.mxu0 %v7042_v2 }
 0x149   : > { %v874_v43 = vpop.f32.mrf.mxu0  ;;  %v5546_v62 = vpop.f32.mrf.mxu1 }
 0x14a   : > { %v875_v48 = vadd.f32 %v874_v43, %v5342_v8  ;;  %2345 = vmatprep.mubr.bf16.mxu0 %v1729_v42  ;;  %v1521_v56 = vmax.f32 %v873_v40, 0.0 }
 0x14b   : > { %v876_v52 = vpop.f32.mrf.mxu0  ;;  %v5549_v53 = vpop.f32.mrf.mxu1  ;;  %2346 = vmatmul.mubr.bf16.gmra.mxu0 %v1728_v33 }
 0x14c   : > { %v1524_v60 = vmax.f32 %v875_v48, 0.0  ;;  %v877_v61 = vadd.f32 %v876_v52, %v5347_v11 }
 0x14d   : > { %v880_v9 = vpop.f32.mrf.mxu0  ;;  %v5552_v12 = vpop.f32.mrf.mxu1  ;;  %1392 = vmatmul.mubr.bf16.gmra.mxu1 %v4817_v15 }
 0x14e   : > { %v1525_v19 = vmax.f32 %v877_v61, 0.0  ;;  %1401 = vmatprep.mubr.bf16.mxu1 %v7042_v2  ;;  %v1732_v21 = vpack.c.bf16 %v1524_v60, %v1520_v51  ;;  %v881_v23 = vadd.f32 %v880_v9, %v5342_v8  ;;  %v4818_v60 = vld [vmem:[%s4903_s17 + $0xe8] sm:$0xff]   ;;  %v368_v61 = vsub.s32 3, %v5327_v4 }
 0x14f   : > { %v882_v27 = vpop.f32.mrf.mxu0  ;;  %v5560_v28 = vpop.f32.mrf.mxu1 }
 0x150   : > { %v883_v0 = vadd.f32 %v882_v27, %v5347_v11  ;;  %v1733_v31 = vpack.c.bf16 %v1525_v19, %v1521_v56  ;;  %v1528_v38 = vmax.f32 %v881_v23, 0.0 }
 0x151   : > { %v884_v58 = vpop.f32.mrf.mxu0  ;;  %v5563_v33 = vpop.f32.mrf.mxu1 }
 0x152   : > { %v885_v36 = vadd.f32 %v884_v58, %v5342_v8  ;;  %2355 = vmatprep.mubr.bf16.mxu0 %v1733_v31  ;;  %v1529_v43 = vmax.f32 %v883_v0, 0.0  ;;  %v5582_v58 = vrot.slane %v5336_v6, %v368_v61 }
 0x153   : > { %v886_v40 = vpop.f32.mrf.mxu0  ;;  %v5567_v42 = vpop.f32.mrf.mxu1  ;;  %2356 = vmatmul.mubr.bf16.gmra.mxu0 %v1732_v21 }
 0x154   : > { %v1532_v48 = vmax.f32 %v885_v36, 0.0  ;;  %v887_v51 = vadd.f32 %v886_v40, %v5347_v11 }
 0x155   : > { %v890_v52 = vpop.f32.mrf.mxu0  ;;  %v5570_v56 = vpop.f32.mrf.mxu1  ;;  %1402 = vmatmul.mubr.bf16.gmra.mxu1 %v4818_v60 }
 0x156   : > { %v1533_v9 = vmax.f32 %v887_v51, 0.0  ;;  %1411 = vmatprep.mubr.bf16.mxu1 %v7042_v2  ;;  %v1736_v15 = vpack.c.bf16 %v1532_v48, %v1528_v38  ;;  %v891_v19 = vadd.f32 %v890_v52, %v5342_v8  ;;  %v1120_v51 = vadd.f32 %v5503_v20, %v5582_v58  ;;  %v4799_v20 = vld [vmem:[%s7033_s3 + $0x68] sm:$0xff]  }
 0x157   : > { %v892_v18 = vpop.f32.mrf.mxu0  ;;  %v5576_v23 = vpop.f32.mrf.mxu1  ;;  %3265 = vmatpush2.bf16.msra.mxu0 %v4799_v20 }
 0x158   : > { %v893_v21 = vadd.f32 %v892_v18, %v5347_v11  ;;  %v1737_v27 = vpack.c.bf16 %v1533_v9, %v1529_v43  ;;  %v1536_v40 = vmax.f32 %v891_v19, 0.0  ;;  %v364_v9 = vsub.s32 2, %v5327_v4  ;;  %3266 = vmatprep.subr.bf16.mxu0 %v7042_v2 }
 0x159   : > { %v894_v0 = vpop.f32.mrf.mxu0  ;;  %v5579_v31 = vpop.f32.mrf.mxu1  ;;  %v1116_v19 = vadd.f32 %v5494_v1, %v5582_v58 }
 0x15a   : > { %v895_v36 = vadd.f32 %v894_v0, %v5342_v8  ;;  %2365 = vmatprep.mubr.bf16.mxu0 %v1737_v27  ;;  %v1537_v52 = vmax.f32 %v893_v21, 0.0  ;;  %v5605_v1 = vrot.slane %v5336_v6, %v364_v9 }
 0x15b   : > { %v896_v38 = vpop.f32.mrf.mxu0  ;;  %v5585_v48 = vpop.f32.mrf.mxu1  ;;  %2366 = vmatmul.mubr.bf16.gmra.mxu0 %v1736_v15  ;;  %v1435_v4 = vmax.f32 %v1116_v19, 0.0 }
 0x15c   : > { %v1540_v43 = vmax.f32 %v895_v36, 0.0  ;;  %v897_v60 = vadd.f32 %v896_v38, %v5347_v11  ;;  %v1439_v38 = vmax.f32 %v1120_v51, 0.0  ;;  %v1118_v51 = vadd.f32 %v5499_v13, %v5605_v1 }
 0x15d   : > { %v900_v18 = vpop.f32.mrf.mxu0  ;;  %v5591_v61 = vpop.f32.mrf.mxu1  ;;  %1412 = vmatmul.mubr.bf16.gmra.mxu1 %v4819_v63 }
 0x15e   : > { %v1541_v27 = vmax.f32 %v897_v60, 0.0  ;;  %1421 = vmatprep.mubr.bf16.mxu1 %v7042_v2  ;;  %v1740_v15 = vpack.c.bf16 %v1540_v43, %v1536_v40  ;;  %v901_v21 = vadd.f32 %v900_v18, %v5342_v8  ;;  %v1691_v19 = vpack.c.bf16 %v1439_v38, %v1435_v4 }
 0x15f   : > { %v902_v0 = vpop.f32.mrf.mxu0  ;;  %v5601_v36 = vpop.f32.mrf.mxu1  ;;  %v1438_v2 = vmax.f32 %v1118_v51, 0.0  ;;  %v1128_v51 = vadd.f32 %v5514_v37, %v5605_v1  ;;  %v1136_v37 = vadd.f32 %v5528_v3, %v5582_v58 }
 0x160   : > { %v903_v7 = vadd.f32 %v902_v0, %v5347_v11  ;;  %v1741_v63 = vpack.c.bf16 %v1541_v27, %v1537_v52  ;;  %v1130_v52 = vadd.f32 %v5517_v41, %v5582_v58  ;;  %v1544_v43 = vmax.f32 %v901_v21, 0.0  ;;  %v4820_v41 = vld [vmem:[%s4903_s17 + $0xf8] sm:$0xff]  }
 0x161   : > { %v904_v60 = vpop.f32.mrf.mxu0  ;;  %v5607_v5 = vpop.f32.mrf.mxu1  ;;  %v1114_v0 = vadd.f32 %v5484_v46, %v5605_v1 }
 0x162   : > { %v905_v40 = vadd.f32 %v904_v60, %v5342_v8  ;;  %2375 = vmatprep.mubr.bf16.mxu0 %v1741_v63  ;;  %v1545_v9 = vmax.f32 %v903_v7, 0.0  ;;  %v1126_v63 = vadd.f32 %v5511_v32, %v5582_v58 }
 0x163   : > { %v906_v18 = vpop.f32.mrf.mxu0  ;;  %v5615_v6 = vpop.f32.mrf.mxu1  ;;  %2376 = vmatmul.mubr.bf16.gmra.mxu0 %v1740_v15  ;;  %v1447_v15 = vmax.f32 %v1130_v52, 0.0  ;;  %v1434_v50 = vmax.f32 %v1114_v0, 0.0 }
 0x164   : > { %v1548_v27 = vmax.f32 %v905_v40, 0.0  ;;  %v907_v20 = vadd.f32 %v906_v18, %v5347_v11  ;;  %v1443_v32 = vmax.f32 %v1126_v63, 0.0 }
 0x165   : > { %v910_v13 = vpop.f32.mrf.mxu0  ;;  %v5622_v60 = vpop.f32.mrf.mxu1  ;;  %1422 = vmatmul.mubr.bf16.gmra.mxu1 %v4820_v41 }
 0x166   : > { %v1549_v21 = vmax.f32 %v907_v20, 0.0  ;;  %2598 = vmatprep.mubr.bf16.mxu1 %v1691_v19  ;;  %v1744_v7 = vpack.c.bf16 %v1548_v27, %v1544_v43  ;;  %v911_v40 = vadd.f32 %v910_v13, %v5342_v8  ;;  %v1690_v20 = vpack.c.bf16 %v1438_v2, %v1434_v50 }
 0x167   : > { %v912_v18 = vpop.f32.mrf.mxu0  ;;  %v5626_v4 = vpop.f32.mrf.mxu1  ;;  %v1695_v19 = vpack.c.bf16 %v1447_v15, %v1443_v32  ;;  %v1446_v15 = vmax.f32 %v1128_v51, 0.0 }
 0x168   : > { %v913_v46 = vadd.f32 %v912_v18, %v5347_v11  ;;  %v1745_v38 = vpack.c.bf16 %v1549_v21, %v1545_v9  ;;  %v1552_v52 = vmax.f32 %v911_v40, 0.0  ;;  %v1140_v9 = vadd.f32 %v5535_v22, %v5582_v58  ;;  %v4800_v22 = vld [vmem:[%s7033_s3 + $0x60] sm:$0xff]  }
 0x169   : > { %v914_v10 = vpop.f32.mrf.mxu0  ;;  %v5629_v17 = vpop.f32.mrf.mxu1  ;;  %3267 = vmatpush2.bf16.msra.mxu0 %v4800_v22 }
 0x16a   : > { %v915_v41 = vadd.f32 %v914_v10, %v5342_v8  ;;  %2385 = vmatprep.mubr.bf16.mxu0 %v1745_v38  ;;  %v1553_v0 = vmax.f32 %v913_v46, 0.0  ;;  %v1124_v10 = vadd.f32 %v5506_v26, %v5605_v1  ;;  %v1455_v26 = vmax.f32 %v1140_v9, 0.0 }
 0x16b   : > { %v916_v43 = vpop.f32.mrf.mxu0  ;;  %v5634_v27 = vpop.f32.mrf.mxu1  ;;  %2386 = vmatmul.mubr.bf16.gmra.mxu0 %v1744_v7  ;;  %v1150_v9 = vadd.f32 %v5549_v53, %v5582_v58 }
 0x16c   : > { %v1556_v63 = vmax.f32 %v915_v41, 0.0  ;;  %v917_v13 = vadd.f32 %v916_v43, %v5347_v11  ;;  %v1442_v41 = vmax.f32 %v1124_v10, 0.0  ;;  %v7049_v43 = vmov 0  }
 0x16d   : > { %v920_v2 = vpop.f32.mrf.mxu0  ;;  %v5641_v50 = vpop.f32.mrf.mxu1  ;;  %2599 = vmatmul.mubr.bf16.vlgmr.msra.gmra.mxu1 %v1690_v20  ;;  %3268 = vmatprep.subr.bf16.mxu0 %v7049_v43 }
 0x16e   : > { %v1557_v21 = vmax.f32 %v917_v13, 0.0  ;;  %2608 = vmatprep.mubr.bf16.mxu1 %v1695_v19  ;;  %v1748_v7 = vpack.c.bf16 %v1556_v63, %v1552_v52  ;;  %v921_v40 = vadd.f32 %v920_v2, %v5342_v8  ;;  %v1451_v19 = vmax.f32 %v1136_v37, 0.0 }
 0x16f   : > { %v922_v18 = vpop.f32.mrf.mxu0  ;;  %v5649_v46 = vpop.f32.mrf.mxu1  ;;  %v1694_v52 = vpack.c.bf16 %v1446_v15, %v1442_v41  ;;  %v1138_v63 = vadd.f32 %v5531_v59, %v5605_v1  ;;  %v1146_v15 = vadd.f32 %v5543_v39, %v5582_v58  ;;  %v1463_v41 = vmax.f32 %v1150_v9, 0.0 }
 0x170   : > { %v923_v38 = vadd.f32 %v922_v18, %v5347_v11  ;;  %v1749_v32 = vpack.c.bf16 %v1557_v21, %v1553_v0  ;;  %v1560_v13 = vmax.f32 %v921_v40, 0.0  ;;  %v1699_v37 = vpack.c.bf16 %v1455_v26, %v1451_v19 }
 0x171   : > { %v924_v3 = vpop.f32.mrf.mxu0  ;;  %v5652_v20 = vpop.f32.mrf.mxu1  ;;  %v1134_v18 = vadd.f32 %v5520_v49, %v5605_v1  ;;  %v1454_v40 = vmax.f32 %v1138_v63, 0.0  ;;  %v1148_v63 = vadd.f32 %v5546_v62, %v5605_v1  ;;  %v1156_v62 = vadd.f32 %v5560_v28, %v5582_v58 }
 0x172   : > { %v925_v51 = vadd.f32 %v924_v3, %v5342_v8  ;;  %2395 = vmatprep.mubr.bf16.mxu0 %v1749_v32  ;;  %v1561_v10 = vmax.f32 %v923_v38, 0.0 }
 0x173   : > { %v926_v0 = vpop.f32.mrf.mxu0  ;;  %v5660_v2 = vpop.f32.mrf.mxu1  ;;  %2396 = vmatmul.mubr.bf16.gmra.mxu0 %v1748_v7  ;;  %v1450_v19 = vmax.f32 %v1134_v18, 0.0 }
 0x174   : > { %v1564_v21 = vmax.f32 %v925_v51, 0.0  ;;  %v927_v22 = vadd.f32 %v926_v0, %v5347_v11  ;;  %v1459_v0 = vmax.f32 %v1146_v15, 0.0 }
 0x175   : > { %v930_v59 = vpop.f32.mrf.mxu0  ;;  %v5667_v32 = vpop.f32.mrf.mxu1  ;;  %2609 = vmatmul.mubr.bf16.gmra.mxu1 %v1694_v52 }
 0x176   : > { %v1565_v53 = vmax.f32 %v927_v22, 0.0  ;;  %2618 = vmatprep.mubr.bf16.mxu1 %v1699_v37  ;;  %v1752_v7 = vpack.c.bf16 %v1564_v21, %v1560_v13  ;;  %v931_v38 = vadd.f32 %v930_v59, %v5342_v8  ;;  %v1698_v22 = vpack.c.bf16 %v1454_v40, %v1450_v19 }
 0x177   : > { %v932_v3 = vpop.f32.mrf.mxu0  ;;  %v5670_v51 = vpop.f32.mrf.mxu1  ;;  %v1703_v37 = vpack.c.bf16 %v1463_v41, %v1459_v0  ;;  %v1462_v41 = vmax.f32 %v1148_v63, 0.0 }
 0x178   : > { %v933_v26 = vadd.f32 %v932_v3, %v5347_v11  ;;  %v1753_v49 = vpack.c.bf16 %v1565_v53, %v1561_v10  ;;  %v1568_v9 = vmax.f32 %v931_v38, 0.0  ;;  %v1160_v10 = vadd.f32 %v5567_v42, %v5582_v58  ;;  %v4801_v42 = vld [vmem:[%s7033_s3 + $0x58] sm:$0xff]  }
 0x179   : > { %v934_v39 = vpop.f32.mrf.mxu0  ;;  %v5673_v24 = vpop.f32.mrf.mxu1  ;;  %v1144_v53 = vadd.f32 %v5538_v29, %v5605_v1  ;;  %3269 = vmatpush2.bf16.msra.mxu0 %v4801_v42  ;;  %v1154_v42 = vadd.f32 %v5552_v12, %v5605_v1 }
 0x17a   : > { %v935_v52 = vadd.f32 %v934_v39, %v5342_v8  ;;  %2405 = vmatprep.mubr.bf16.mxu0 %v1753_v49  ;;  %v1569_v18 = vmax.f32 %v933_v26, 0.0  ;;  %v1471_v29 = vmax.f32 %v1160_v10, 0.0  ;;  %3270 = vmatprep.subr.bf16.mxu0 %v7049_v43  ;;  %v1170_v10 = vadd.f32 %v5585_v48, %v5582_v58 }
 0x17b   : > { %v936_v13 = vpop.f32.mrf.mxu0  ;;  %v5678_v21 = vpop.f32.mrf.mxu1  ;;  %2406 = vmatmul.mubr.bf16.gmra.mxu0 %v1752_v7 }
 0x17c   : > { %v1572_v15 = vmax.f32 %v935_v52, 0.0  ;;  %v937_v59 = vadd.f32 %v936_v13, %v5347_v11  ;;  %v1458_v52 = vmax.f32 %v1144_v53, 0.0  ;;  %v1467_v13 = vmax.f32 %v1156_v62, 0.0 }
 0x17d   : > { %v940_v40 = vpop.f32.mrf.mxu0  ;;  %v5685_v3 = vpop.f32.mrf.mxu1  ;;  %2619 = vmatmul.mubr.bf16.gmra.mxu1 %v1698_v22 }
 0x17e   : > { %v1573_v38 = vmax.f32 %v937_v59, 0.0  ;;  %2628 = vmatprep.mubr.bf16.mxu1 %v1703_v37  ;;  %v1756_v7 = vpack.c.bf16 %v1572_v15, %v1568_v9  ;;  %v941_v26 = vadd.f32 %v940_v40, %v5342_v8  ;;  %v1702_v9 = vpack.c.bf16 %v1462_v41, %v1458_v52 }
 0x17f   : > { %v942_v49 = vpop.f32.mrf.mxu0  ;;  %v5693_v19 = vpop.f32.mrf.mxu1  ;;  %v1158_v37 = vadd.f32 %v5563_v33, %v5605_v1  ;;  %v1707_v62 = vpack.c.bf16 %v1471_v29, %v1467_v13  ;;  %v1166_v41 = vadd.f32 %v5576_v23, %v5582_v58  ;;  %v1466_v13 = vmax.f32 %v1154_v42, 0.0 }
 0x180   : > { %v943_v0 = vadd.f32 %v942_v49, %v5347_v11  ;;  %v1757_v39 = vpack.c.bf16 %v1573_v38, %v1569_v18  ;;  %v1576_v15 = vmax.f32 %v941_v26, 0.0 }
 0x181   : > { %v944_v28 = vpop.f32.mrf.mxu0  ;;  %v5696_v22 = vpop.f32.mrf.mxu1  ;;  %v1470_v26 = vmax.f32 %v1158_v37, 0.0  ;;  %v1168_v37 = vadd.f32 %v5579_v31, %v5605_v1  ;;  %v1176_v31 = vadd.f32 %v5601_v36, %v5582_v58 }
 0x182   : > { %v945_v63 = vadd.f32 %v944_v28, %v5342_v8  ;;  %2415 = vmatprep.mubr.bf16.mxu0 %v1757_v39  ;;  %v1577_v53 = vmax.f32 %v943_v0, 0.0  ;;  %v1479_v39 = vmax.f32 %v1170_v10, 0.0 }
 0x183   : > { %v946_v18 = vpop.f32.mrf.mxu0  ;;  %v5704_v59 = vpop.f32.mrf.mxu1  ;;  %2416 = vmatmul.mubr.bf16.gmra.mxu0 %v1756_v7 }
 0x184   : > { %v1580_v40 = vmax.f32 %v945_v63, 0.0  ;;  %v947_v38 = vadd.f32 %v946_v18, %v5347_v11  ;;  %v1475_v63 = vmax.f32 %v1166_v41, 0.0 }
 0x185   : > { %v950_v33 = vpop.f32.mrf.mxu0  ;;  %v5711_v49 = vpop.f32.mrf.mxu1  ;;  %2629 = vmatmul.mubr.bf16.gmra.mxu1 %v1702_v9 }
 0x186   : > { %v1581_v48 = vmax.f32 %v947_v38, 0.0  ;;  %2638 = vmatprep.mubr.bf16.mxu1 %v1707_v62  ;;  %v1760_v7 = vpack.c.bf16 %v1580_v40, %v1576_v15  ;;  %v951_v0 = vadd.f32 %v950_v33, %v5342_v8  ;;  %v1706_v38 = vpack.c.bf16 %v1470_v26, %v1466_v13 }
 0x187   : > { %v952_v52 = vpop.f32.mrf.mxu0  ;;  %v5714_v28 = vpop.f32.mrf.mxu1  ;;  %v1711_v62 = vpack.c.bf16 %v1479_v39, %v1475_v63  ;;  %v1478_v39 = vmax.f32 %v1168_v37, 0.0 }
 0x188   : > { %v953_v29 = vadd.f32 %v952_v52, %v5347_v11  ;;  %v1761_v12 = vpack.c.bf16 %v1581_v48, %v1577_v53  ;;  %v1584_v10 = vmax.f32 %v951_v0, 0.0  ;;  %v1180_v53 = vadd.f32 %v5615_v6, %v5582_v58  ;;  %v4802_v6 = vld [vmem:[%s7033_s3 + $0x50] sm:$0xff]  }
 0x189   : > { %v954_v23 = vpop.f32.mrf.mxu0  ;;  %v5717_v18 = vpop.f32.mrf.mxu1  ;;  %v1164_v48 = vadd.f32 %v5570_v56, %v5605_v1  ;;  %3271 = vmatpush2.bf16.msra.mxu0 %v4802_v6  ;;  %v1174_v6 = vadd.f32 %v5591_v61, %v5605_v1 }
 0x18a   : > { %v955_v9 = vadd.f32 %v954_v23, %v5342_v8  ;;  %2425 = vmatprep.mubr.bf16.mxu0 %v1761_v12  ;;  %v1585_v42 = vmax.f32 %v953_v29, 0.0  ;;  %v1487_v56 = vmax.f32 %v1180_v53, 0.0  ;;  %3272 = vmatprep.subr.bf16.mxu0 %v7049_v43  ;;  %v1190_v53 = vadd.f32 %v5634_v27, %v5582_v58 }
 0x18b   : > { %v956_v15 = vpop.f32.mrf.mxu0  ;;  %v5722_v40 = vpop.f32.mrf.mxu1  ;;  %2426 = vmatmul.mubr.bf16.gmra.mxu0 %v1760_v7 }
 0x18c   : > { %v1588_v41 = vmax.f32 %v955_v9, 0.0  ;;  %v957_v33 = vadd.f32 %v956_v15, %v5347_v11  ;;  %v1474_v9 = vmax.f32 %v1164_v48, 0.0  ;;  %v1483_v15 = vmax.f32 %v1176_v31, 0.0 }
 0x18d   : > { %v960_v26 = vpop.f32.mrf.mxu0  ;;  %v5729_v52 = vpop.f32.mrf.mxu1  ;;  %2639 = vmatmul.mubr.bf16.gmra.mxu1 %v1706_v38 }
 0x18e   : > { %v1589_v0 = vmax.f32 %v957_v33, 0.0  ;;  %2648 = vmatprep.mubr.bf16.mxu1 %v1711_v62  ;;  %v1764_v7 = vpack.c.bf16 %v1588_v41, %v1584_v10  ;;  %v961_v29 = vadd.f32 %v960_v26, %v5342_v8  ;;  %v1710_v10 = vpack.c.bf16 %v1478_v39, %v1474_v9 }
 0x18f   : > { %v962_v12 = vpop.f32.mrf.mxu0  ;;  %v5737_v13 = vpop.f32.mrf.mxu1  ;;  %v1178_v62 = vadd.f32 %v5607_v5, %v5605_v1  ;;  %v1715_v31 = vpack.c.bf16 %v1487_v56, %v1483_v15  ;;  %v1186_v39 = vadd.f32 %v5626_v4, %v5582_v58  ;;  %v1482_v15 = vmax.f32 %v1174_v6, 0.0 }
 0x190   : > { %v963_v63 = vadd.f32 %v962_v12, %v5347_v11  ;;  %v1765_v23 = vpack.c.bf16 %v1589_v0, %v1585_v42  ;;  %v1592_v41 = vmax.f32 %v961_v29, 0.0 }
 0x191   : > { %v964_v36 = vpop.f32.mrf.mxu0  ;;  %v5740_v38 = vpop.f32.mrf.mxu1  ;;  %v1486_v29 = vmax.f32 %v1178_v62, 0.0  ;;  %v1188_v62 = vadd.f32 %v5629_v17, %v5605_v1  ;;  %v1196_v17 = vadd.f32 %v5649_v46, %v5582_v58 }
 0x192   : > { %v965_v37 = vadd.f32 %v964_v36, %v5342_v8  ;;  %2435 = vmatprep.mubr.bf16.mxu0 %v1765_v23  ;;  %v1593_v48 = vmax.f32 %v963_v63, 0.0  ;;  %v1495_v23 = vmax.f32 %v1190_v53, 0.0 }
 0x193   : > { %v966_v42 = vpop.f32.mrf.mxu0  ;;  %v5748_v33 = vpop.f32.mrf.mxu1  ;;  %2436 = vmatmul.mubr.bf16.gmra.mxu0 %v1764_v7 }
 0x194   : > { %v1596_v26 = vmax.f32 %v965_v37, 0.0  ;;  %v967_v0 = vadd.f32 %v966_v42, %v5347_v11  ;;  %v1491_v37 = vmax.f32 %v1186_v39, 0.0 }
 0x195   : > { %v970_v5 = vpop.f32.mrf.mxu0  ;;  %v5755_v12 = vpop.f32.mrf.mxu1  ;;  %2649 = vmatmul.mubr.bf16.gmra.mxu1 %v1710_v10 }
 0x196   : > { %v1597_v27 = vmax.f32 %v967_v0, 0.0  ;;  %2658 = vmatprep.mubr.bf16.mxu1 %v1715_v31  ;;  %v1768_v7 = vpack.c.bf16 %v1596_v26, %v1592_v41  ;;  %v971_v63 = vadd.f32 %v970_v5, %v5342_v8  ;;  %v1714_v0 = vpack.c.bf16 %v1486_v29, %v1482_v15 }
 0x197   : > { %v972_v9 = vpop.f32.mrf.mxu0  ;;  %v5758_v36 = vpop.f32.mrf.mxu1  ;;  %v1719_v31 = vpack.c.bf16 %v1495_v23, %v1491_v37  ;;  %v1494_v23 = vmax.f32 %v1188_v62, 0.0 }
 0x198   : > { %v973_v56 = vadd.f32 %v972_v9, %v5347_v11  ;;  %v1769_v61 = vpack.c.bf16 %v1597_v27, %v1593_v48  ;;  %v1600_v53 = vmax.f32 %v971_v63, 0.0  ;;  %v1200_v48 = vadd.f32 %v5660_v2, %v5582_v58  ;;  %v4803_v2 = vld [vmem:[%s7033_s3 + $0x48] sm:$0xff]  }
 0x199   : > { %v974_v4 = vpop.f32.mrf.mxu0  ;;  %v5761_v42 = vpop.f32.mrf.mxu1  ;;  %v1184_v27 = vadd.f32 %v5622_v60, %v5605_v1  ;;  %3273 = vmatpush2.bf16.msra.mxu0 %v4803_v2  ;;  %v1206_v2 = vadd.f32 %v5670_v51, %v5582_v58 }
 0x19a   : > { %v975_v10 = vadd.f32 %v974_v4, %v5342_v8  ;;  %2445 = vmatprep.mubr.bf16.mxu0 %v1769_v61  ;;  %v1601_v6 = vmax.f32 %v973_v56, 0.0  ;;  %v1503_v60 = vmax.f32 %v1200_v48, 0.0  ;;  %3274 = vmatprep.subr.bf16.mxu0 %v7049_v43  ;;  %v1210_v48 = vadd.f32 %v5678_v21, %v5582_v58 }
 0x19b   : > { %v976_v41 = vpop.f32.mrf.mxu0  ;;  %v5766_v26 = vpop.f32.mrf.mxu1  ;;  %2446 = vmatmul.mubr.bf16.gmra.mxu0 %v1768_v7 }
 0x19c   : > { %v1604_v39 = vmax.f32 %v975_v10, 0.0  ;;  %v977_v5 = vadd.f32 %v976_v41, %v5347_v11  ;;  %v1490_v10 = vmax.f32 %v1184_v27, 0.0  ;;  %v1499_v41 = vmax.f32 %v1196_v17, 0.0 }
 0x19d   : > { %v980_v29 = vpop.f32.mrf.mxu0  ;;  %v5773_v9 = vpop.f32.mrf.mxu1  ;;  %2659 = vmatmul.mubr.bf16.gmra.mxu1 %v1714_v0 }
 0x19e   : > { %v1605_v63 = vmax.f32 %v977_v5, 0.0  ;;  %2668 = vmatprep.mubr.bf16.mxu1 %v1719_v31  ;;  %v1772_v7 = vpack.c.bf16 %v1604_v39, %v1600_v53  ;;  %v981_v56 = vadd.f32 %v980_v29, %v5342_v8  ;;  %v1718_v53 = vpack.c.bf16 %v1494_v23, %v1490_v10 }
 0x19f   : > { %v982_v61 = vpop.f32.mrf.mxu0  ;;  %v5781_v15 = vpop.f32.mrf.mxu1  ;;  %v1198_v31 = vadd.f32 %v5652_v20, %v5605_v1  ;;  %v1723_v17 = vpack.c.bf16 %v1503_v60, %v1499_v41  ;;  %v1507_v41 = vmax.f32 %v1206_v2, 0.0 }
 0x1a0   : > { %v983_v37 = vadd.f32 %v982_v61, %v5347_v11  ;;  %v1773_v4 = vpack.c.bf16 %v1605_v63, %v1601_v6  ;;  %v1608_v39 = vmax.f32 %v981_v56, 0.0  ;;  %v1194_v63 = vadd.f32 %v5641_v50, %v5605_v1 }
 0x1a1   : > { %v984_v46 = vpop.f32.mrf.mxu0  ;;  %v5784_v0 = vpop.f32.mrf.mxu1  ;;  %v1502_v56 = vmax.f32 %v1198_v31, 0.0  ;;  %v1511_v61 = vmax.f32 %v1210_v48, 0.0  ;;  %v1208_v31 = vadd.f32 %v5673_v24, %v5605_v1  ;;  %v1216_v24 = vadd.f32 %v5693_v19, %v5582_v58 }
 0x1a2   : > { %v985_v62 = vadd.f32 %v984_v46, %v5342_v8  ;;  %2455 = vmatprep.mubr.bf16.mxu0 %v1773_v4  ;;  %v1609_v27 = vmax.f32 %v983_v37, 0.0  ;;  %v1498_v46 = vmax.f32 %v1194_v63, 0.0  ;;  %v1218_v19 = vadd.f32 %v5696_v22, %v5605_v1 }
 0x1a3   : > { %v986_v6 = vpop.f32.mrf.mxu0  ;;  %v5792_v5 = vpop.f32.mrf.mxu1  ;;  %2456 = vmatmul.mubr.bf16.gmra.mxu0 %v1772_v7 }
 0x1a4   : > { %v1612_v29 = vmax.f32 %v985_v62, 0.0  ;;  %v987_v43 = vadd.f32 %v986_v6, %v5347_v11  ;;  %v1722_v6 = vpack.c.bf16 %v1502_v56, %v1498_v46  ;;  %v4804_v56 = vld [vmem:[%s7033_s3 + $0x40] sm:$0xff]   ;;  %v1518_v22 = vmax.f32 %v1218_v19, 0.0 }
 0x1a5   : > { %v990_v20 = vpop.f32.mrf.mxu0  ;;  %v5799_v23 = vpop.f32.mrf.mxu1  ;;  %2669 = vmatmul.mubr.bf16.gmra.mxu1 %v1718_v53  ;;  %3275 = vmatpush2.bf16.msra.mxu0 %v4804_v56 }
 0x1a6   : > { %v1613_v21 = vmax.f32 %v987_v43, 0.0  ;;  %2678 = vmatprep.mubr.bf16.mxu1 %v1723_v17  ;;  %v1776_v7 = vpack.c.bf16 %v1612_v29, %v1608_v39  ;;  %v991_v37 = vadd.f32 %v990_v20, %v5342_v8  ;;  %v1727_v43 = vpack.c.bf16 %v1511_v61, %v1507_v41 }
 0x1a7   : > { %v992_v4 = vpop.f32.mrf.mxu0  ;;  %v5802_v10 = vpop.f32.mrf.mxu1  ;;  %v1230_v41 = vadd.f32 %v5722_v40, %v5582_v58 }
 0x1a8   : > { %v993_v60 = vadd.f32 %v992_v4, %v5347_v11  ;;  %v1777_v50 = vpack.c.bf16 %v1613_v21, %v1609_v27  ;;  %v1616_v48 = vmax.f32 %v991_v37, 0.0  ;;  %v1220_v27 = vadd.f32 %v5704_v59, %v5582_v58 }
 0x1a9   : > { %v994_v51 = vpop.f32.mrf.mxu0  ;;  %v5805_v62 = vpop.f32.mrf.mxu1  ;;  %v1510_v59 = vmax.f32 %v1208_v31, 0.0  ;;  %v1226_v31 = vadd.f32 %v5714_v28, %v5582_v58  ;;  %v1240_v28 = vadd.f32 %v5748_v33, %v5582_v58 }
 0x1aa   : > { %v995_v53 = vadd.f32 %v994_v51, %v5342_v8  ;;  %2465 = vmatprep.mubr.bf16.mxu0 %v1777_v50  ;;  %v1617_v17 = vmax.f32 %v993_v60, 0.0  ;;  %v1204_v8 = vadd.f32 %v5667_v32, %v5605_v1  ;;  %v1515_v60 = vmax.f32 %v1216_v24, 0.0 }
 0x1ab   : > { %v996_v39 = vpop.f32.mrf.mxu0  ;;  %v5810_v29 = vpop.f32.mrf.mxu1  ;;  %2466 = vmatmul.mubr.bf16.gmra.mxu0 %v1776_v7  ;;  %v1523_v40 = vmax.f32 %v1226_v31, 0.0  ;;  %v1535_v33 = vmax.f32 %v1240_v28, 0.0  ;;  %v1260_v28 = vadd.f32 %v5792_v5, %v5582_v58 }
 0x1ac   : > { %v1620_v63 = vmax.f32 %v995_v53, 0.0  ;;  %v997_v2 = vadd.f32 %v996_v39, %v5347_v11  ;;  %v1519_v11 = vmax.f32 %v1220_v27, 0.0  ;;  %v1506_v32 = vmax.f32 %v1204_v8, 0.0 }
 0x1ad   : > { %v5817_v20 = vpop.f32.mrf.mxu1  ;;  %2679 = vmatmul.mubr.bf16.gmra.mxu1 %v1722_v6  ;;  %v1214_v53 = vadd.f32 %v5685_v3, %v5605_v1  ;;  %v1527_v39 = vmax.f32 %v1230_v41, 0.0  ;;  %v1224_v8 = vadd.f32 %v5711_v49, %v5605_v1  ;;  %v1234_v41 = vadd.f32 %v5729_v52, %v5605_v1 }
 0x1ae   : > { %v1621_v21 = vmax.f32 %v997_v2, 0.0  ;;  %2688 = vmatprep.mubr.bf16.mxu1 %v1727_v43  ;;  %v1780_v61 = vpack.c.bf16 %v1620_v63, %v1616_v48  ;;  %v1726_v50 = vpack.c.bf16 %v1510_v59, %v1506_v32  ;;  %v1731_v51 = vpack.c.bf16 %v1519_v11, %v1515_v60 }
 0x1af   : > { %v5824_v7 = vpop.f32.mrf.mxu1  ;;  %v1514_v43 = vmax.f32 %v1214_v53, 0.0  ;;  %v1735_v2 = vpack.c.bf16 %v1527_v39, %v1523_v40  ;;  %v1238_v32 = vadd.f32 %v5740_v38, %v5605_v1  ;;  %v1246_v38 = vadd.f32 %v5758_v36, %v5582_v58 }
 0x1b0   : > { %v1781_v37 = vpack.c.bf16 %v1621_v21, %v1617_v17  ;;  %v1228_v17 = vadd.f32 %v5717_v18, %v5605_v1  ;;  %v1236_v18 = vadd.f32 %v5737_v13, %v5582_v58  ;;  %v1551_v5 = vmax.f32 %v1260_v28, 0.0 }
 0x1b1   : > { %v5826_v4 = vpop.f32.mrf.mxu1  ;;  %v1534_v31 = vmax.f32 %v1238_v32, 0.0  ;;  %v1539_v52 = vmax.f32 %v1246_v38, 0.0 }
 0x1b2   : > { %2475 = vmatprep.mubr.bf16.mxu0 %v1781_v37  ;;  %v1526_v56 = vmax.f32 %v1228_v17, 0.0  ;;  %v1531_v49 = vmax.f32 %v1236_v18, 0.0 }
 0x1b3   : > { %v5830_v46 = vpop.f32.mrf.mxu1  ;;  %2476 = vmatmul.mubr.bf16.gmra.mxu0 %v1780_v61 }
 0x1b4   : > { %2485 = vmatprep.mubr.bf16.mxu0 %v5368_v45  ;;  %v1730_v45 = vpack.c.bf16 %v1518_v22, %v1514_v43  ;;  %v1739_v19 = vpack.c.bf16 %v1535_v33, %v1531_v49 }
 0x1b5   : > { %v5837_v6 = vpop.f32.mrf.mxu1  ;;  %2689 = vmatmul.mubr.bf16.gmra.mxu1 %v1726_v50  ;;  %v1250_v50 = vadd.f32 %v5766_v26, %v5582_v58 }
 0x1b6   : > { %2698 = vmatprep.mubr.bf16.mxu1 %v1731_v51 }
 0x1b7   : > { %v5841_v48 = vpop.f32.mrf.mxu1  ;;  %v1543_v26 = vmax.f32 %v1250_v50, 0.0  ;;  %v1258_v50 = vadd.f32 %v5784_v0, %v5605_v1  ;;  %v1266_v0 = vadd.f32 %v5802_v10, %v5582_v58 }
 0x1b9   : > { %v5843_v27 = vpop.f32.mrf.mxu1 }
 0x1bb   : > { %v5847_v3 = vpop.f32.mrf.mxu1  ;;  %v5849_v63 = vpop.f32.mrf.mxu0  ;;  %2486 = vmatmul.mubr.bf16.gmra.mxu0 %v5359_v35 }
 0x1bc   : > { %2495 = vmatprep.mubr.bf16.mxu0 %v5389_v25  ;;  %v1522_v25 = vmax.f32 %v1224_v8, 0.0  ;;  %v1244_v8 = vadd.f32 %v5755_v12, %v5605_v1 }
 0x1bd   : > { %v5857_v24 = vpop.f32.mrf.mxu1  ;;  %v5859_v21 = vpop.f32.mrf.mxu0  ;;  %2699 = vmatmul.mubr.bf16.gmra.mxu1 %v1730_v45  ;;  %v1248_v45 = vadd.f32 %v5761_v42, %v5605_v1  ;;  %v1256_v42 = vadd.f32 %v5781_v15, %v5582_v58 }
 0x1be   : > { %2708 = vmatprep.mubr.bf16.mxu1 %v1735_v2  ;;  %v1734_v37 = vpack.c.bf16 %v1526_v56, %v1522_v25  ;;  %v1743_v2 = vpack.c.bf16 %v1543_v26, %v1539_v52  ;;  %v1550_v52 = vmax.f32 %v1258_v50, 0.0 }
 0x1bf   : > { %v5863_v35 = vpop.f32.mrf.mxu1  ;;  %v5865_v59 = vpop.f32.mrf.mxu0  ;;  %v1542_v33 = vmax.f32 %v1248_v45, 0.0  ;;  %v1547_v12 = vmax.f32 %v1256_v42, 0.0 }
 0x1c1   : > { %v5867_v61 = vpop.f32.mrf.mxu1  ;;  %v5869_v11 = vpop.f32.mrf.mxu0  ;;  %v1747_v38 = vpack.c.bf16 %v1551_v5, %v1547_v12 }
 0x1c3   : > { %v5873_v60 = vpop.f32.mrf.mxu1  ;;  %v5875_v13 = vpop.f32.mrf.mxu0  ;;  %2496 = vmatmul.mubr.bf16.gmra.mxu0 %v5380_v14 }
 0x1c4   : > { %2505 = vmatprep.mubr.bf16.mxu0 %v5411_v57  ;;  %v1530_v57 = vmax.f32 %v1234_v41, 0.0  ;;  %v1270_v41 = vadd.f32 %v5810_v29, %v5582_v58 }
 0x1c5   : > { %v5883_v51 = vpop.f32.mrf.mxu1  ;;  %v5885_v53 = vpop.f32.mrf.mxu0  ;;  %2709 = vmatmul.mubr.bf16.gmra.mxu1 %v1734_v37 }
 0x1c6   : > { %2718 = vmatprep.mubr.bf16.mxu1 %v1739_v19  ;;  %v1738_v40 = vpack.c.bf16 %v1534_v31, %v1530_v57  ;;  %v1254_v31 = vadd.f32 %v5773_v9, %v5605_v1  ;;  %v1559_v29 = vmax.f32 %v1270_v41, 0.0  ;;  %v1555_v9 = vmax.f32 %v1266_v0, 0.0 }
 0x1c7   : > { %v5889_v14 = vpop.f32.mrf.mxu1  ;;  %v5891_v22 = vpop.f32.mrf.mxu0 }
 0x1c8   : > { %v1751_v5 = vpack.c.bf16 %v1559_v29, %v1555_v9  ;;  %v7051_v9 = vld [vmem:[#allocation4_spill] sm:$0xff] }
 0x1c9   : > { %v5893_v39 = vpop.f32.mrf.mxu1  ;;  %v5895_v43 = vpop.f32.mrf.mxu0 }
 0x1cb   : > { %v5899_v17 = vpop.f32.mrf.mxu1  ;;  %v5901_v36 = vpop.f32.mrf.mxu0  ;;  %2506 = vmatmul.mubr.bf16.gmra.mxu0 %v5402_v44 }
 0x1cc   : > { %2515 = vmatprep.mubr.bf16.mxu0 %v5430_v30  ;;  %v1538_v30 = vmax.f32 %v1244_v8, 0.0  ;;  %v1268_v8 = vadd.f32 %v5805_v62, %v5605_v1  ;;  %v1276_v62 = vadd.f32 %v5824_v7, %v5582_v58 }
 0x1cd   : > { %v5909_v18 = vpop.f32.mrf.mxu1  ;;  %v5911_v56 = vpop.f32.mrf.mxu0  ;;  %2719 = vmatmul.mubr.bf16.gmra.mxu1 %v1738_v40 }
 0x1ce   : > { %2728 = vmatprep.mubr.bf16.mxu1 %v1743_v2  ;;  %v1742_v32 = vpack.c.bf16 %v1542_v33, %v1538_v30  ;;  %v1280_v33 = vadd.f32 %v5830_v46, %v5582_v58  ;;  %v1264_v30 = vadd.f32 %v5799_v23, %v5605_v1  ;;  %v1558_v50 = vmax.f32 %v1268_v8, 0.0 }
 0x1cf   : > { %v5915_v44 = vpop.f32.mrf.mxu1  ;;  %v5917_v25 = vpop.f32.mrf.mxu0  ;;  %v1563_v23 = vmax.f32 %v1276_v62, 0.0  ;;  %v1274_v8 = vadd.f32 %v5817_v20, %v5605_v1 }
 0x1d0   : > { %v1567_v46 = vmax.f32 %v1280_v33, 0.0 }
 0x1d1   : > { %v5919_v49 = vpop.f32.mrf.mxu1  ;;  %v5921_v37 = vpop.f32.mrf.mxu0 }
 0x1d3   : > { %v5925_v19 = vpop.f32.mrf.mxu1  ;;  %v5927_v15 = vpop.f32.mrf.mxu0  ;;  %2516 = vmatmul.mubr.bf16.gmra.mxu0 %v5421_v54 }
 0x1d4   : > { %2525 = vmatprep.mubr.bf16.mxu0 %v5445_v16  ;;  %v1546_v16 = vmax.f32 %v1254_v31, 0.0 }
 0x1d5   : > { %v5935_v26 = vpop.f32.mrf.mxu1  ;;  %v5937_v57 = vpop.f32.mrf.mxu0  ;;  %2729 = vmatmul.mubr.bf16.gmra.mxu1 %v1742_v32 }
 0x1d6   : > { %2738 = vmatprep.mubr.bf16.mxu1 %v1747_v38  ;;  %v1746_v2 = vpack.c.bf16 %v1550_v52, %v1546_v16  ;;  %v1278_v52 = vadd.f32 %v5826_v4, %v5605_v1  ;;  %v1290_v16 = vadd.f32 %v5847_v3, %v5582_v58  ;;  %v1286_v4 = vadd.f32 %v5841_v48, %v5582_v58 }
 0x1d7   : > { %v5941_v54 = vpop.f32.mrf.mxu1  ;;  %v5943_v40 = vpop.f32.mrf.mxu0 }
 0x1d8   : > { %v1575_v3 = vmax.f32 %v1290_v16, 0.0  ;;  %v1571_v20 = vmax.f32 %v1286_v4, 0.0  ;;  %v7056_v16 = vld [vmem:[#allocation6_spill] sm:$0xff] }
 0x1d9   : > { %v5945_v45 = vpop.f32.mrf.mxu1  ;;  %v5947_v28 = vpop.f32.mrf.mxu0 }
 0x1db   : > { %v5951_v42 = vpop.f32.mrf.mxu1  ;;  %v5953_v10 = vpop.f32.mrf.mxu0  ;;  %2526 = vmatmul.mubr.bf16.gmra.mxu0 %v5439_v55 }
 0x1dc   : > { %2535 = vmatprep.mubr.bf16.mxu0 %v5462_v47  ;;  %v1554_v47 = vmax.f32 %v1264_v30, 0.0  ;;  %v1566_v30 = vmax.f32 %v1278_v52, 0.0  ;;  %v7055_v52 = vld [vmem:[#allocation3_spill] sm:$0xff] }
 0x1dd   : > { %v5961_v12 = vpop.f32.mrf.mxu1  ;;  %v5963_v32 = vpop.f32.mrf.mxu0  ;;  %2739 = vmatmul.mubr.bf16.gmra.mxu1 %v1746_v2  ;;  %v1755_v2 = vpack.c.bf16 %v1567_v46, %v1563_v23 }
 0x1de   : > { %2748 = vmatprep.mubr.bf16.mxu1 %v1751_v5  ;;  %v1750_v0 = vpack.c.bf16 %v1558_v50, %v1554_v47  ;;  %v1562_v50 = vmax.f32 %v1274_v8, 0.0  ;;  %v1759_v8 = vpack.c.bf16 %v1575_v3, %v1571_v20 }
 0x1df   : > { %v5967_v55 = vpop.f32.mrf.mxu1  ;;  %v5969_v41 = vpop.f32.mrf.mxu0 }
 0x1e0   : > { %v1754_v23 = vpack.c.bf16 %v1566_v30, %v1562_v50 }
 0x1e1   : > { %v5971_v38 = vpop.f32.mrf.mxu1  ;;  %v5973_v31 = vpop.f32.mrf.mxu0 }
 0x1e3   : > { %v5977_v29 = vpop.f32.mrf.mxu1  ;;  %v5979_v7 = vpop.f32.mrf.mxu0  ;;  %2536 = vmatmul.mubr.bf16.gmra.mxu0 %v5453_v34 }
 0x1e4   : > { %7050 = vst [vmem:[#allocation7_spill] sm:$0xff] %v5979_v7  ;;  %2545 = vmatprep.mubr.bf16.mxu0 %v7051_v9 }
 0x1e5   : > { %v5987_v33 = vpop.f32.mrf.mxu1  ;;  %v5989_v5 = vpop.f32.mrf.mxu0  ;;  %2749 = vmatmul.mubr.bf16.gmra.mxu1 %v1750_v0  ;;  %v1288_v0 = vadd.f32 %v5843_v27, %v5605_v1  ;;  %v1296_v27 = vadd.f32 %v5863_v35, %v5582_v58 }
 0x1e6   : > { %2758 = vmatprep.mubr.bf16.mxu1 %v1755_v2  ;;  %v1300_v2 = vadd.f32 %v5873_v60, %v5582_v58 }
 0x1e7   : > { %v5993_v34 = vpop.f32.mrf.mxu1  ;;  %v5995_v62 = vpop.f32.mrf.mxu0  ;;  %v1574_v50 = vmax.f32 %v1288_v0, 0.0  ;;  %v7061_v0 = vld [vmem:[#allocation5_spill] sm:$0xff] }
 0x1e8   : > { %7052 = vst [vmem:[#allocation4_spill] sm:$0xff] %v5995_v62  ;;  %v1583_v60 = vmax.f32 %v1300_v2, 0.0 }
 0x1e9   : > { %v5997_v46 = vpop.f32.mrf.mxu1  ;;  %v5999_v47 = vpop.f32.mrf.mxu0 }
 0x1ea   : > { %7053 = vst [vmem:[#allocation8_spill] sm:$0xff] %v5999_v47  ;;  %v1284_v47 = vadd.f32 %v5837_v6, %v5605_v1  ;;  %v1579_v6 = vmax.f32 %v1296_v27, 0.0 }
 0x1eb   : > { %v6003_v9 = vpop.f32.mrf.mxu1  ;;  %v6005_v48 = vpop.f32.mrf.mxu0  ;;  %2546 = vmatmul.mubr.bf16.gmra.mxu0 %v7055_v52 }
 0x1ec   : > { %7054 = vst [vmem:[#allocation9_spill] sm:$0xff] %v6005_v48  ;;  %2555 = vmatprep.mubr.bf16.mxu0 %v7056_v16  ;;  %v1570_v16 = vmax.f32 %v1284_v47, 0.0  ;;  %v1763_v2 = vpack.c.bf16 %v1583_v60, %v1579_v6  ;;  %v1294_v47 = vadd.f32 %v5857_v24, %v5605_v1 }
 0x1ed   : > { %v6013_v4 = vpop.f32.mrf.mxu1  ;;  %v6015_v30 = vpop.f32.mrf.mxu0  ;;  %2759 = vmatmul.mubr.bf16.gmra.mxu1 %v1754_v23  ;;  %v1298_v23 = vadd.f32 %v5867_v61, %v5605_v1  ;;  %v1306_v61 = vadd.f32 %v5889_v14, %v5582_v58 }
 0x1ee   : > { %7057 = vst [vmem:[#allocation3_spill] sm:$0xff] %v6015_v30  ;;  %2768 = vmatprep.mubr.bf16.mxu1 %v1759_v8  ;;  %v1758_v7 = vpack.c.bf16 %v1574_v50, %v1570_v16  ;;  %v1310_v8 = vadd.f32 %v5899_v17, %v5582_v58  ;;  %v1578_v17 = vmax.f32 %v1294_v47, 0.0 }
 0x1ef   : > { %v6019_v52 = vpop.f32.mrf.mxu1  ;;  %v6021_v48 = vpop.f32.mrf.mxu0  ;;  %v1582_v50 = vmax.f32 %v1298_v23, 0.0  ;;  %v1587_v24 = vmax.f32 %v1306_v61, 0.0  ;;  %v1320_v23 = vadd.f32 %v5925_v19, %v5582_v58  ;;  %v1316_v61 = vadd.f32 %v5915_v44, %v5582_v58 }
 0x1f0   : > { %7058 = vst [vmem:[#allocation6_spill] sm:$0xff] %v6021_v48 }
 0x1f1   : > { %v6023_v3 = vpop.f32.mrf.mxu1  ;;  %v6025_v20 = vpop.f32.mrf.mxu0 }
 0x1f2   : > { %7059 = vst [vmem:[#allocation10_spill] sm:$0xff] %v6025_v20  ;;  %v1762_v20 = vpack.c.bf16 %v1582_v50, %v1578_v17 }
 0x1f3   : > { %v6029_v30 = vpop.f32.mrf.mxu1  ;;  %v6031_v35 = vpop.f32.mrf.mxu0  ;;  %2556 = vmatmul.mubr.bf16.gmra.mxu0 %v7061_v0 }
 0x1f4   : > { %7060 = vst [vmem:[#allocation11_spill] sm:$0xff] %v6031_v35  ;;  %v1591_v35 = vmax.f32 %v1310_v8, 0.0  ;;  %v1304_v8 = vadd.f32 %v5883_v51, %v5605_v1  ;;  %v1595_v51 = vmax.f32 %v1316_v61, 0.0  ;;  %v1326_v61 = vadd.f32 %v5941_v54, %v5582_v58 }
 0x1f5   : > { %v6038_v48 = vpop.f32.mrf.mxu1  ;;  %v6040_v27 = vpop.f32.mrf.mxu0  ;;  %2769 = vmatmul.mubr.bf16.gmra.mxu1 %v1758_v7  ;;  %v1308_v7 = vadd.f32 %v5893_v39, %v5605_v1  ;;  %v1328_v54 = vadd.f32 %v5945_v45, %v5605_v1  ;;  %v1336_v45 = vadd.f32 %v5967_v55, %v5582_v58 }
 0x1f6   : > { %7062 = vst [vmem:[#allocation5_spill] sm:$0xff] %v6040_v27  ;;  %2778 = vmatprep.mubr.bf16.mxu1 %v1763_v2  ;;  %v1767_v2 = vpack.c.bf16 %v1591_v35, %v1587_v24  ;;  %v1586_v19 = vmax.f32 %v1304_v8, 0.0 }
 0x1f7   : > { %v6044_v16 = vpop.f32.mrf.mxu1  ;;  %v6046_v0 = vpop.f32.mrf.mxu0  ;;  %v1590_v39 = vmax.f32 %v1308_v7, 0.0  ;;  %v1330_v7 = vadd.f32 %v5951_v42, %v5582_v58  ;;  %v4805_v42 = vld [vmem:[%s7034_s4 + $0x38] sm:$0xff]  }
 0x1f8   : > { %7063 = vst [vmem:[#allocation12_spill] sm:$0xff] %v6046_v0  ;;  %4508 = vmatprep.subr.bf16.mxu1 %v4805_v42 }
 0x1f9   : > { %v6048_v60 = vpop.f32.mrf.mxu1  ;;  %v6050_v6 = vpop.f32.mrf.mxu0  ;;  %4509 = vmatpush3.bf16.msra.mxu1 %v4805_v42 }
 0x1fa   : > { %7064 = vst [vmem:[#allocation13_spill] sm:$0xff] %v6050_v6  ;;  %v1766_v6 = vpack.c.bf16 %v1590_v39, %v1586_v19 }
 0x1fb   : > { %v6054_v27 = vpop.f32.mrf.mxu1  ;;  %v6056_v14 = vpop.f32.mrf.mxu0 }
 0x1fc   : > { %7065 = vst [vmem:[#allocation14_spill] sm:$0xff] %v6056_v14  ;;  %v1599_v14 = vmax.f32 %v1320_v23, 0.0  ;;  %v1314_v23 = vadd.f32 %v5909_v18, %v5605_v1 }
 0x1fd   : > { %v6062_v47 = vpop.f32.mrf.mxu1  ;;  %v6064_v0 = vpop.f32.mrf.mxu0  ;;  %2779 = vmatmul.mubr.bf16.gmra.mxu1 %v1762_v20  ;;  %v1318_v20 = vadd.f32 %v5919_v49, %v5605_v1 }
 0x1fe   : > { %7066 = vst [vmem:[#allocation15_spill] sm:$0xff] %v6064_v0  ;;  %2788 = vmatprep.mubr.bf16.mxu1 %v1767_v2  ;;  %v1771_v2 = vpack.c.bf16 %v1599_v14, %v1595_v51  ;;  %v1594_v18 = vmax.f32 %v1314_v23, 0.0  ;;  %v1324_v23 = vadd.f32 %v5935_v26, %v5605_v1  ;;  %v1611_v26 = vmax.f32 %v1336_v45, 0.0 }
 0x1ff   : > { %v6068_v50 = vpop.f32.mrf.mxu1  ;;  %v6070_v17 = vpop.f32.mrf.mxu0  ;;  %v1598_v49 = vmax.f32 %v1318_v20, 0.0  ;;  %v1346_v45 = vadd.f32 %v5993_v34, %v5582_v58 }
 0x200   : > { %7067 = vst [vmem:[#allocation16_spill] sm:$0xff] %v6070_v17 }
 0x201   : > { %v6072_v35 = vpop.f32.mrf.mxu1  ;;  %v6074_v24 = vpop.f32.mrf.mxu0 }
 0x202   : > { %7068 = vst [vmem:[#allocation17_spill] sm:$0xff] %v6074_v24  ;;  %v1378_v62 = vadd.f32 %v6072_v35, %v5605_v1 }
 0x203   : > { %v6078_v0 = vpop.f32.mrf.mxu1  ;;  %v6080_v44 = vpop.f32.mrf.mxu0 }
 0x204   : > { %7069 = vst [vmem:[#allocation18_spill] sm:$0xff] %v6080_v44  ;;  %v1607_v44 = vmax.f32 %v1330_v7, 0.0  ;;  %v1340_v7 = vadd.f32 %v5977_v29, %v5582_v58  ;;  %v1602_v29 = vmax.f32 %v1324_v23, 0.0 }
 0x205   : > { %v6086_v8 = vpop.f32.mrf.mxu1  ;;  %v6088_v17 = vpop.f32.mrf.mxu0  ;;  %2789 = vmatmul.mubr.bf16.gmra.mxu1 %v1766_v6  ;;  %v1603_v6 = vmax.f32 %v1326_v61, 0.0 }
 0x206   : > { %7070 = vst [vmem:[#allocation19_spill] sm:$0xff] %v6088_v17  ;;  %2798 = vmatprep.mubr.bf16.mxu1 %v1771_v2  ;;  %v1770_v17 = vpack.c.bf16 %v1598_v49, %v1594_v18  ;;  %v1606_v49 = vmax.f32 %v1328_v54, 0.0 }
 0x207   : > { %v6092_v39 = vpop.f32.mrf.mxu1  ;;  %v6094_v19 = vpop.f32.mrf.mxu0 }
 0x208   : > { %7071 = vst [vmem:[#allocation20_spill] sm:$0xff] %v6094_v19  ;;  %v1775_v19 = vpack.c.bf16 %v1607_v44, %v1603_v6 }
 0x209   : > { %v6099_v14 = vpop.f32.mrf.mxu1  ;;  %v6101_v51 = vpop.f32.mrf.mxu0 }
 0x20a   : > { %7072 = vst [vmem:[#allocation21_spill] sm:$0xff] %v6101_v51  ;;  %v1774_v51 = vpack.c.bf16 %v1606_v49, %v1602_v29 }
 0x20b   : > { %v6105_v20 = vpop.f32.mrf.mxu1  ;;  %v6107_v2 = vpop.f32.mrf.mxu0 }
 0x20c   : > { %7073 = vst [vmem:[#allocation22_spill] sm:$0xff] %v6107_v2  ;;  %v1615_v2 = vmax.f32 %v1340_v7, 0.0  ;;  %v1334_v7 = vadd.f32 %v5961_v12, %v5605_v1  ;;  %v1619_v12 = vmax.f32 %v1346_v45, 0.0  ;;  %v1356_v45 = vadd.f32 %v6019_v52, %v5582_v58 }
 0x20d   : > { %v6113_v24 = vpop.f32.mrf.mxu1  ;;  %v6115_v61 = vpop.f32.mrf.mxu0  ;;  %2799 = vmatmul.mubr.bf16.gmra.mxu1 %v1770_v17  ;;  %v1338_v17 = vadd.f32 %v5971_v38, %v5605_v1 }
 0x20e   : > { %7074 = vst [vmem:[#allocation23_spill] sm:$0xff] %v6115_v61  ;;  %2808 = vmatprep.mubr.bf16.mxu1 %v1775_v19  ;;  %v1350_v19 = vadd.f32 %v6003_v9, %v5582_v58  ;;  %v1779_v54 = vpack.c.bf16 %v1615_v2, %v1611_v26  ;;  %v1610_v9 = vmax.f32 %v1334_v7, 0.0 }
 0x20f   : > { %v6119_v18 = vpop.f32.mrf.mxu1  ;;  %v6121_v42 = vpop.f32.mrf.mxu0  ;;  %v1614_v38 = vmax.f32 %v1338_v17, 0.0  ;;  %v1360_v17 = vadd.f32 %v6029_v30, %v5582_v58 }
 0x210   : > { %7075 = vst [vmem:[#allocation24_spill] sm:$0xff] %v6121_v42 }
 0x211   : > { %v6123_v44 = vpop.f32.mrf.mxu1  ;;  %v6125_v6 = vpop.f32.mrf.mxu0 }
 0x212   : > { %7076 = vst [vmem:[#allocation25_spill] sm:$0xff] %v6125_v6  ;;  %v1778_v6 = vpack.c.bf16 %v1614_v38, %v1610_v9 }
 0x213   : > { %v6129_v61 = vpop.f32.mrf.mxu1  ;;  %v6131_v55 = vpop.f32.mrf.mxu0 }
 0x214   : > { %7077 = vst [vmem:[#allocation26_spill] sm:$0xff] %v6131_v55  ;;  %v1623_v55 = vmax.f32 %v1350_v19, 0.0  ;;  %v1344_v19 = vadd.f32 %v5987_v33, %v5605_v1  ;;  %v1627_v33 = vmax.f32 %v1356_v45, 0.0  ;;  %v1366_v45 = vadd.f32 %v6044_v16, %v5582_v58  ;;  %v7091_v16 = vld [vmem:[#allocation2_spill] sm:$0xff] }
 0x215   : > { %v6137_v23 = vpop.f32.mrf.mxu1  ;;  %v6139_v42 = vpop.f32.mrf.mxu0  ;;  %2809 = vmatmul.mubr.bf16.gmra.mxu1 %v1774_v51  ;;  %v1348_v51 = vadd.f32 %v5997_v46, %v5605_v1 }
 0x216   : > { %7078 = vst [vmem:[#allocation27_spill] sm:$0xff] %v6139_v42  ;;  %2818 = vmatprep.mubr.bf16.mxu1 %v1779_v54  ;;  %v1783_v54 = vpack.c.bf16 %v1623_v55, %v1619_v12  ;;  %v1618_v30 = vmax.f32 %v1344_v19, 0.0 }
 0x217   : > { %v6143_v49 = vpop.f32.mrf.mxu1  ;;  %v6145_v29 = vpop.f32.mrf.mxu0  ;;  %v1622_v46 = vmax.f32 %v1348_v51, 0.0  ;;  %v1370_v51 = vadd.f32 %v6054_v27, %v5582_v58 }
 0x218   : > { %7079 = vst [vmem:[#allocation28_spill] sm:$0xff] %v6145_v29 }
 0x219   : > { %v6147_v2 = vpop.f32.mrf.mxu1  ;;  %v6149_v26 = vpop.f32.mrf.mxu0 }
 0x21a   : > { %7080 = vst [vmem:[#allocation29_spill] sm:$0xff] %v6149_v26  ;;  %v1782_v26 = vpack.c.bf16 %v1622_v46, %v1618_v30 }
 0x21b   : > { %v6153_v42 = vpop.f32.mrf.mxu1  ;;  %v6155_v34 = vpop.f32.mrf.mxu0 }
 0x21c   : > { %7081 = vst [vmem:[#allocation30_spill] sm:$0xff] %v6155_v34  ;;  %v1631_v34 = vmax.f32 %v1360_v17, 0.0  ;;  %v1354_v17 = vadd.f32 %v6013_v4, %v5605_v1  ;;  %v4806_v4 = vld [vmem:[%s7034_s4 + $0x30] sm:$0xff]  }
 0x21d   : > { %v6161_v7 = vpop.f32.mrf.mxu1  ;;  %v6163_v29 = vpop.f32.mrf.mxu0  ;;  %2819 = vmatmul.mubr.bf16.gmra.mxu1 %v1778_v6  ;;  %v1358_v6 = vadd.f32 %v6023_v3, %v5605_v1  ;;  %v4375_v3 = vld [vmem:[%s7035_s5 + $0x1] ss:$4 sm:$0x3]  ;;  %4510 = vmatprep.subr.bf16.mxu1 %v4806_v4 }
 0x21e   : > { %7082 = vst [vmem:[#allocation31_spill] sm:$0xff] %v6163_v29  ;;  %2828 = vmatprep.mubr.bf16.mxu1 %v1783_v54  ;;  %v1787_v54 = vpack.c.bf16 %v1631_v34, %v1627_v33  ;;  %v1639_v34 = vmax.f32 %v1370_v51, 0.0  ;;  %v1626_v33 = vmax.f32 %v1354_v17, 0.0  ;;  %4511 = vmatpush3.bf16.msra.mxu1 %v4806_v4  ;;  %v7094_v17 = vsub.s32 1, %v7091_v16 }
 0x21f   : > { %v6167_v38 = vpop.f32.mrf.mxu1  ;;  %v6169_v9 = vpop.f32.mrf.mxu0  ;;  %v1630_v46 = vmax.f32 %v1358_v6, 0.0  ;;  %v1376_v4 = vadd.f32 %v6068_v50, %v5582_v58 }
 0x220   : > { %7083 = vst [vmem:[#allocation32_spill] sm:$0xff] %v6169_v9 }
 0x221   : > { %v6171_v55 = vpop.f32.mrf.mxu1  ;;  %v6173_v12 = vpop.f32.mrf.mxu0  ;;  %v1786_v6 = vpack.c.bf16 %v1630_v46, %v1626_v33 }
 0x222   : > { %7084 = vst [vmem:[#allocation33_spill] sm:$0xff] %v6173_v12  ;;  %v1635_v12 = vmax.f32 %v1366_v45, 0.0  ;;  %v1364_v45 = vadd.f32 %v6038_v48, %v5605_v1 }
 0x223   : > { %v6177_v29 = vpop.f32.mrf.mxu1  ;;  %v6179_v52 = vpop.f32.mrf.mxu0 }
 0x224   : > { %7085 = vst [vmem:[#allocation34_spill] sm:$0xff] %v6179_v52 }
 0x225   : > { %v6185_v19 = vpop.f32.mrf.mxu1  ;;  %v6187_v9 = vpop.f32.mrf.mxu0  ;;  %2829 = vmatmul.mubr.bf16.gmra.mxu1 %v1782_v26 }
 0x226   : > { %7086 = vst [vmem:[#allocation35_spill] sm:$0xff] %v6185_v19  ;;  %7087 = vst [vmem:[#allocation36_spill] sm:$0xff] %v6187_v9  ;;  %2838 = vmatprep.mubr.bf16.mxu1 %v1787_v54  ;;  %v7092_v54 = vsub.s32 0, %v7091_v16 }
 0x227   : > { %v6194_v30 = vpop.f32.mrf.mxu1  ;;  %v6196_v27 = vpop.f32.mrf.mxu0 }
 0x228   : > { %7088 = vst [vmem:[#allocation37_spill] sm:$0xff] %v6196_v27  ;;  %v6207_v9 = vrot.slane %v4375_v3, %v7092_v54  ;;  %v1368_v27 = vadd.f32 %v6048_v60, %v5605_v1  ;;  %v1791_v54 = vpack.c.bf16 %v1639_v34, %v1635_v12 }
 0x229   : > { %v6201_v26 = vpop.f32.mrf.mxu1  ;;  %v6203_v52 = vpop.f32.mrf.mxu0 }
 0x22a   : > { %7089 = vst [vmem:[#allocation38_spill] sm:$0xff] %v6201_v26  ;;  %7090 = vst [vmem:[#allocation39_spill] sm:$0xff] %v6203_v52  ;;  %v6217_v26 = vrot.slane %v4375_v3, %v7094_v17  ;;  %v1380_v52 = vadd.f32 %v6078_v0, %v5582_v58  ;;  %v2248_v60 = vadd.f32 %v5849_v63, %v6207_v9  ;;  %v1638_v3 = vmax.f32 %v1368_v27, 0.0 }
 0x22b   : > { %v6211_v51 = vpop.f32.mrf.mxu1  ;;  %v6213_v19 = vpop.f32.mrf.mxu0  ;;  %v2252_v48 = vadd.f32 %v5865_v59, %v6207_v9  ;;  %v2258_v35 = vadd.f32 %v5875_v13, %v6207_v9 }
 0x22c   : > { %7093 = vst [vmem:[#allocation2_spill] sm:$0xff] %v6213_v19  ;;  %v2250_v0 = vadd.f32 %v5859_v21, %v6217_v26  ;;  %v1647_v12 = vmax.f32 %v1380_v52, 0.0  ;;  %v2254_v50 = vadd.f32 %v5869_v11, %v6217_v26  ;;  %v1390_v21 = vadd.f32 %v6105_v20, %v5582_v58 }
 0x22d   : > { %v6223_v46 = vpop.f32.mrf.mxu0  ;;  %v2600_v33 = vpop.f32.mrf.mxu1  ;;  %2839 = vmatmul.mubr.bf16.gmra.mxu1 %v1786_v6  ;;  %v1634_v6 = vmax.f32 %v1364_v45, 0.0  ;;  %v1374_v11 = vadd.f32 %v6062_v47, %v5605_v1  ;;  %v2260_v47 = vadd.f32 %v5885_v53, %v6217_v26  ;;  %v1388_v53 = vadd.f32 %v6099_v14, %v5605_v1 }
 0x22e   : > { %7095 = vst [vmem:[#allocation40_spill] sm:$0xff] %v6223_v46  ;;  %2848 = vmatprep.mubr.bf16.mxu1 %v1791_v54  ;;  %v2601_v34 = vadd.f32 %v2600_v33, %v2248_v60  ;;  %v1643_v54 = vmax.f32 %v1376_v4, 0.0  ;;  %v1386_v4 = vadd.f32 %v6092_v39, %v5582_v58  ;;  %v2262_v39 = vadd.f32 %v5891_v22, %v6207_v9 }
 0x22f   : > { %v6229_v16 = vpop.f32.mrf.mxu0  ;;  %v2602_v17 = vpop.f32.mrf.mxu1 }
 0x230   : > { %7096 = vst [vmem:[#allocation41_spill] sm:$0xff] %v6229_v16  ;;  %v2603_v27 = vadd.f32 %v2602_v17, %v2250_v0  ;;  %v1790_v16 = vpack.c.bf16 %v1638_v3, %v1634_v6  ;;  %v2919_v45 = vmax.f32 %v2601_v34, 0.0  ;;  %v1655_v34 = vmax.f32 %v1390_v21, 0.0 }
 0x231   : > { %v6235_v19 = vpop.f32.mrf.mxu0  ;;  %v2604_v63 = vpop.f32.mrf.mxu1 }
 0x232   : > { %7097 = vst [vmem:[#allocation42_spill] sm:$0xff] %v6235_v19  ;;  %v2605_v46 = vadd.f32 %v2604_v63, %v2252_v48  ;;  %v1795_v19 = vpack.c.bf16 %v1647_v12, %v1643_v54  ;;  %v2920_v20 = vmax.f32 %v2603_v27, 0.0  ;;  %v1651_v54 = vmax.f32 %v1386_v4, 0.0 }
 0x233   : > { %v6243_v59 = vpop.f32.mrf.mxu0  ;;  %v2606_v52 = vpop.f32.mrf.mxu1 }
 0x234   : > { %v2921_v33 = vmax.f32 %v2605_v46, 0.0  ;;  %v2607_v60 = vadd.f32 %v2606_v52, %v2254_v50  ;;  %v1646_v46 = vmax.f32 %v1378_v62, 0.0  ;;  %v1642_v50 = vmax.f32 %v1374_v11, 0.0 }
 0x235   : > { %v6249_v3 = vpop.f32.mrf.mxu0  ;;  %v2610_v17 = vpop.f32.mrf.mxu1  ;;  %2849 = vmatmul.mubr.bf16.gmra.mxu1 %v1790_v16  ;;  %v2264_v62 = vadd.f32 %v5895_v43, %v6217_v26  ;;  %v2268_v43 = vadd.f32 %v5901_v36, %v6207_v9 }
 0x236   : > { %v3047_v0 = vpack.c.bf16 %v2921_v33, %v2919_v45  ;;  %v2922_v48 = vmax.f32 %v2607_v60, 0.0  ;;  %2858 = vmatprep.mubr.bf16.mxu1 %v1795_v19  ;;  %v2611_v63 = vadd.f32 %v2610_v17, %v2258_v35  ;;  %v1794_v52 = vpack.c.bf16 %v1646_v46, %v1642_v50 }
 0x237   : > { %v6253_v12 = vpop.f32.mrf.mxu0  ;;  %v2612_v6 = vpop.f32.mrf.mxu1  ;;  %v1799_v33 = vpack.c.bf16 %v1655_v34, %v1651_v54  ;;  %v1400_v60 = vadd.f32 %v6129_v61, %v5582_v58  ;;  %v1384_v35 = vadd.f32 %v6086_v8, %v5605_v1  ;;  %v2270_v61 = vadd.f32 %v5911_v56, %v6217_v26 }
 0x238   : > { %v3048_v16 = vpack.c.bf16 %v2922_v48, %v2920_v20  ;;  %v2613_v19 = vadd.f32 %v2612_v6, %v2260_v47  ;;  %v2923_v11 = vmax.f32 %v2611_v63, 0.0  ;;  %v1654_v6 = vmax.f32 %v1388_v53, 0.0 }
 0x239   : > { %v6259_v13 = vpop.f32.mrf.mxu0  ;;  %v2614_v27 = vpop.f32.mrf.mxu1  ;;  %v2272_v8 = vadd.f32 %v5917_v25, %v6207_v9  ;;  %v1650_v50 = vmax.f32 %v1384_v35, 0.0  ;;  %v1410_v25 = vadd.f32 %v6153_v42, %v5582_v58  ;;  %v2278_v42 = vadd.f32 %v5927_v15, %v6207_v9  ;;  %v4807_v15 = vld [vmem:[%s7034_s4 + $0x28] sm:$0xff]  }
 0x23a   : > { %v2615_v21 = vadd.f32 %v2614_v27, %v2262_v39  ;;  %3276 = vmatprep.mubr.bf16.mxu0 %v3048_v16  ;;  %v2924_v48 = vmax.f32 %v2613_v19, 0.0  ;;  %v1663_v39 = vmax.f32 %v1400_v60, 0.0  ;;  %v2274_v27 = vadd.f32 %v5921_v37, %v6217_v26  ;;  %4512 = vmatprep.subr.bf16.mxu1 %v4807_v15 }
 0x23b   : > { %v6265_v45 = vpop.f32.mrf.mxu0  ;;  %v2616_v22 = vpop.f32.mrf.mxu1  ;;  %3277 = vmatmul.mubr.bf16.vlgmr.msra.gmra.mxu0 %v3047_v0  ;;  %v1396_v0 = vadd.f32 %v6119_v18, %v5582_v58  ;;  %v1394_v37 = vadd.f32 %v6113_v24, %v5605_v1  ;;  %v2280_v24 = vadd.f32 %v5937_v57, %v6217_v26  ;;  %4513 = vmatpush3.bf16.msra.mxu1 %v4807_v15 }
 0x23c   : > { %v2925_v4 = vmax.f32 %v2615_v21, 0.0  ;;  %v2617_v17 = vadd.f32 %v2616_v22, %v2264_v62  ;;  %v1798_v21 = vpack.c.bf16 %v1654_v6, %v1650_v50  ;;  %v2284_v50 = vadd.f32 %v5947_v28, %v6217_v26 }
 0x23d   : > { %v6273_v20 = vpop.f32.mrf.mxu0  ;;  %v2620_v14 = vpop.f32.mrf.mxu1  ;;  %2859 = vmatmul.mubr.bf16.gmra.mxu1 %v1794_v52  ;;  %v1659_v62 = vmax.f32 %v1396_v0, 0.0  ;;  %v1398_v52 = vadd.f32 %v6123_v44, %v5605_v1 }
 0x23e   : > { %v3049_v46 = vpack.c.bf16 %v2925_v4, %v2923_v11  ;;  %v2926_v34 = vmax.f32 %v2617_v17, 0.0  ;;  %2868 = vmatprep.mubr.bf16.mxu1 %v1799_v33  ;;  %v2621_v63 = vadd.f32 %v2620_v14, %v2268_v43  ;;  %v1406_v17 = vadd.f32 %v6143_v49, %v5582_v58 }
 0x23f   : > { %v6279_v47 = vpop.f32.mrf.mxu0  ;;  %v2622_v36 = vpop.f32.mrf.mxu1  ;;  %v1803_v4 = vpack.c.bf16 %v1663_v39, %v1659_v62  ;;  %v2282_v49 = vadd.f32 %v5943_v40, %v6207_v9  ;;  %v1408_v40 = vadd.f32 %v6147_v2, %v5605_v1  ;;  %v1416_v2 = vadd.f32 %v6167_v38, %v5582_v58 }
 0x240   : > { %v3050_v16 = vpack.c.bf16 %v2926_v34, %v2924_v48  ;;  %v2623_v19 = vadd.f32 %v2622_v36, %v2270_v61  ;;  %v2927_v33 = vmax.f32 %v2621_v63, 0.0  ;;  %v1662_v48 = vmax.f32 %v1398_v52, 0.0 }
 0x241   : > { %v6283_v54 = vpop.f32.mrf.mxu0  ;;  %v2624_v18 = vpop.f32.mrf.mxu1  ;;  %v1667_v39 = vmax.f32 %v1406_v17, 0.0  ;;  %v1670_v17 = vmax.f32 %v1408_v40, 0.0 }
 0x242   : > { %v2625_v56 = vadd.f32 %v2624_v18, %v2272_v8  ;;  %3284 = vmatprep.mubr.bf16.mxu0 %v3050_v16  ;;  %v2928_v35 = vmax.f32 %v2623_v19, 0.0  ;;  %v1658_v8 = vmax.f32 %v1394_v37, 0.0 }
 0x243   : > { %v6291_v53 = vpop.f32.mrf.mxu0  ;;  %v2626_v22 = vpop.f32.mrf.mxu1  ;;  %3285 = vmatmul.mubr.bf16.gmra.mxu0 %v3049_v46  ;;  %v1671_v46 = vmax.f32 %v1410_v25, 0.0 }
 0x244   : > { %v2929_v60 = vmax.f32 %v2625_v56, 0.0  ;;  %v2627_v11 = vadd.f32 %v2626_v22, %v2274_v27  ;;  %v1802_v57 = vpack.c.bf16 %v1662_v48, %v1658_v8  ;;  %v1404_v22 = vadd.f32 %v6137_v23, %v5605_v1 }
 0x245   : > { %v6297_v43 = vpop.f32.mrf.mxu0  ;;  %v2630_v44 = vpop.f32.mrf.mxu1  ;;  %2869 = vmatmul.mubr.bf16.gmra.mxu1 %v1798_v21  ;;  %v1807_v56 = vpack.c.bf16 %v1671_v46, %v1667_v39  ;;  %v1420_v21 = vadd.f32 %v6177_v29, %v5582_v58  ;;  %v2292_v23 = vadd.f32 %v5969_v41, %v6207_v9  ;;  %v1418_v41 = vadd.f32 %v6171_v55, %v5605_v1 }
 0x246   : > { %v3051_v14 = vpack.c.bf16 %v2929_v60, %v2927_v33  ;;  %v2930_v0 = vmax.f32 %v2627_v11, 0.0  ;;  %2878 = vmatprep.mubr.bf16.mxu1 %v1803_v4  ;;  %v2631_v6 = vadd.f32 %v2630_v44, %v2278_v42  ;;  %v2290_v42 = vadd.f32 %v5963_v32, %v6217_v26 }
 0x247   : > { %v6301_v34 = vpop.f32.mrf.mxu0  ;;  %v2632_v61 = vpop.f32.mrf.mxu1  ;;  %v1666_v38 = vmax.f32 %v1404_v22, 0.0  ;;  %v1426_v55 = vadd.f32 %v6194_v30, %v5582_v58 }
 0x248   : > { %v3052_v36 = vpack.c.bf16 %v2930_v0, %v2928_v35  ;;  %v2633_v18 = vadd.f32 %v2632_v61, %v2280_v24  ;;  %v2931_v52 = vmax.f32 %v2631_v6, 0.0  ;;  %v1679_v35 = vmax.f32 %v1420_v21, 0.0 }
 0x249   : > { %v6310_v63 = vpop.f32.mrf.mxu0  ;;  %v2634_v16 = vpop.f32.mrf.mxu1  ;;  %v2288_v0 = vadd.f32 %v5953_v10, %v6207_v9  ;;  %v2294_v61 = vadd.f32 %v5973_v31, %v6217_v26  ;;  %v1675_v24 = vmax.f32 %v1416_v2, 0.0  ;;  %v1806_v32 = vpack.c.bf16 %v1670_v17, %v1666_v38 }
 0x24a   : > { %v2635_v27 = vadd.f32 %v2634_v16, %v2282_v49  ;;  %3292 = vmatprep.mubr.bf16.mxu0 %v3052_v36  ;;  %v2932_v11 = vmax.f32 %v2633_v18, 0.0  ;;  %v1430_v10 = vadd.f32 %v6211_v51, %v5582_v58  ;;  %v1414_v31 = vadd.f32 %v6161_v7, %v5605_v1  ;;  %v7098_v7 = vld [vmem:[#allocation4_spill] sm:$0xff] }
 0x24b   : > { %v6316_v62 = vpop.f32.mrf.mxu0  ;;  %v2636_v19 = vpop.f32.mrf.mxu1  ;;  %3293 = vmatmul.mubr.bf16.gmra.mxu0 %v3051_v14  ;;  %v1811_v16 = vpack.c.bf16 %v1679_v35, %v1675_v24  ;;  %v7101_v35 = vld [vmem:[#allocation38_spill] sm:$0xff] }
 0x24c   : > { %v2933_v25 = vmax.f32 %v2635_v27, 0.0  ;;  %v2637_v28 = vadd.f32 %v2636_v19, %v2284_v50  ;;  %v1678_v19 = vmax.f32 %v1418_v41, 0.0  ;;  %v1674_v58 = vmax.f32 %v1414_v31, 0.0 }
 0x24d   : > { %v6322_v33 = vpop.f32.mrf.mxu0  ;;  %v2640_v60 = vpop.f32.mrf.mxu1  ;;  %2879 = vmatmul.mubr.bf16.gmra.mxu1 %v1802_v57 }
 0x24e   : > { %v3053_v4 = vpack.c.bf16 %v2933_v25, %v2931_v52  ;;  %v2934_v37 = vmax.f32 %v2637_v28, 0.0  ;;  %2888 = vmatprep.mubr.bf16.mxu1 %v1807_v56  ;;  %v2641_v36 = vadd.f32 %v2640_v60, %v2288_v0  ;;  %v2300_v52 = vadd.f32 %v5989_v5, %v6217_v26  ;;  %v7099_v60 = vld [vmem:[#allocation7_spill] sm:$0xff] }
 0x24f   : > { %v6326_v44 = vpop.f32.mrf.mxu0  ;;  %v2642_v29 = vpop.f32.mrf.mxu1  ;;  %v2302_v25 = vadd.f32 %v7098_v7, %v6207_v9  ;;  %v1687_v28 = vmax.f32 %v1430_v10, 0.0  ;;  %v2298_v2 = vadd.f32 %v7099_v60, %v6207_v9  ;;  %v1810_v5 = vpack.c.bf16 %v1678_v19, %v1674_v58  ;;  %v7105_v19 = vld [vmem:[#allocation9_spill] sm:$0xff] }
 0x250   : > { %v3054_v14 = vpack.c.bf16 %v2934_v37, %v2932_v11  ;;  %v2643_v49 = vadd.f32 %v2642_v29, %v2290_v42  ;;  %v2935_v56 = vmax.f32 %v2641_v36, 0.0  ;;  %v7100_v37 = vld [vmem:[#allocation8_spill] sm:$0xff]  ;;  %v1683_v29 = vmax.f32 %v1426_v55, 0.0 }
 0x251   : > { %v6334_v48 = vpop.f32.mrf.mxu0  ;;  %v2644_v46 = vpop.f32.mrf.mxu1  ;;  %v2304_v17 = vadd.f32 %v7100_v37, %v6217_v26 }
 0x252   : > { %v2645_v6 = vadd.f32 %v2644_v46, %v2292_v23  ;;  %3300 = vmatprep.mubr.bf16.mxu0 %v3054_v14  ;;  %v2936_v57 = vmax.f32 %v2643_v49, 0.0  ;;  %v1428_v14 = vadd.f32 %v7101_v35, %v5605_v1  ;;  %v1815_v24 = vpack.c.bf16 %v1687_v28, %v1683_v29  ;;  %v7102_v49 = vld [vmem:[#allocation35_spill] sm:$0xff]  ;;  %v7106_v28 = vld [vmem:[#allocation10_spill] sm:$0xff] }
 0x253   : > { %v6340_v15 = vpop.f32.mrf.mxu0  ;;  %v2646_v8 = vpop.f32.mrf.mxu1  ;;  %3301 = vmatmul.mubr.bf16.gmra.mxu0 %v3053_v4 }
 0x254   : > { %v2647_v39 = vadd.f32 %v2646_v8, %v2294_v61  ;;  %v2937_v50 = vmax.f32 %v2645_v6, 0.0  ;;  %v1424_v6 = vadd.f32 %v7102_v49, %v5605_v1  ;;  %v7108_v49 = vld [vmem:[#allocation12_spill] sm:$0xff] }
 0x255   : > { %v6346_v18 = vpop.f32.mrf.mxu0  ;;  %v2650_v27 = vpop.f32.mrf.mxu1  ;;  %2889 = vmatmul.mubr.bf16.gmra.mxu1 %v1806_v32 }
 0x256   : > { %v2938_v40 = vmax.f32 %v2647_v39, 0.0  ;;  %2898 = vmatprep.mubr.bf16.mxu1 %v1811_v16  ;;  %v3055_v30 = vpack.c.bf16 %v2937_v50, %v2935_v56  ;;  %v2651_v0 = vadd.f32 %v2650_v27, %v2298_v2  ;;  %v1686_v39 = vmax.f32 %v1428_v14, 0.0  ;;  %v7103_v27 = vld [vmem:[#allocation3_spill] sm:$0xff] }
 0x257   : > { %v6350_v21 = vpop.f32.mrf.mxu0  ;;  %v2652_v51 = vpop.f32.mrf.mxu1  ;;  %v2310_v55 = vadd.f32 %v7103_v27, %v6217_v26  ;;  %v2308_v56 = vadd.f32 %v7105_v19, %v6207_v9  ;;  %v7110_v27 = vld [vmem:[#allocation13_spill] sm:$0xff] }
 0x258   : > { %v3056_v22 = vpack.c.bf16 %v2938_v40, %v2936_v57  ;;  %v2653_v42 = vadd.f32 %v2652_v51, %v2300_v52  ;;  %v2939_v16 = vmax.f32 %v2651_v0, 0.0  ;;  %v7104_v57 = vld [vmem:[#allocation6_spill] sm:$0xff]  ;;  %v1682_v51 = vmax.f32 %v1424_v6, 0.0 }
 0x259   : > { %v6358_v11 = vpop.f32.mrf.mxu0  ;;  %v2654_v4 = vpop.f32.mrf.mxu1  ;;  %v2312_v40 = vadd.f32 %v7104_v57, %v6207_v9  ;;  %v2322_v6 = vadd.f32 %v7108_v49, %v6207_v9  ;;  %v7114_v49 = vld [vmem:[#allocation17_spill] sm:$0xff] }
 0x25a   : > { %v2655_v23 = vadd.f32 %v2654_v4, %v2302_v25  ;;  %3308 = vmatprep.mubr.bf16.mxu0 %v3056_v22  ;;  %v2940_v8 = vmax.f32 %v2653_v42, 0.0  ;;  %v2314_v22 = vadd.f32 %v7106_v28, %v6217_v26  ;;  %v1814_v58 = vpack.c.bf16 %v1686_v39, %v1682_v51 }
 0x25b   : > { %v6364_v38 = vpop.f32.mrf.mxu0  ;;  %v2656_v46 = vpop.f32.mrf.mxu1  ;;  %3309 = vmatmul.mubr.bf16.gmra.mxu0 %v3055_v30 }
 0x25c   : > { %v2657_v61 = vadd.f32 %v2656_v46, %v2304_v17  ;;  %v2941_v32 = vmax.f32 %v2655_v23, 0.0 }
 0x25d   : > { %v6368_v41 = vpop.f32.mrf.mxu0  ;;  %v2660_v36 = vpop.f32.mrf.mxu1  ;;  %2899 = vmatmul.mubr.bf16.gmra.mxu1 %v1810_v5 }
 0x25e   : > { %v2942_v10 = vmax.f32 %v2657_v61, 0.0  ;;  %2908 = vmatprep.mubr.bf16.mxu1 %v1815_v24  ;;  %v3057_v52 = vpack.c.bf16 %v2941_v32, %v2939_v16  ;;  %v2661_v30 = vadd.f32 %v2660_v36, %v2308_v56  ;;  %v7107_v61 = vld [vmem:[#allocation5_spill] sm:$0xff]  ;;  %v4808_v36 = vld [vmem:[%s7034_s4 + $0x20] sm:$0xff]  }
 0x25f   : > { %v6370_v31 = vpop.f32.mrf.mxu0  ;;  %v2662_v50 = vpop.f32.mrf.mxu1  ;;  %v2320_v24 = vadd.f32 %v7107_v61, %v6217_v26  ;;  %4514 = vmatprep.subr.bf16.mxu1 %v4808_v36 }
 0x260   : > { %v3058_v1 = vpack.c.bf16 %v2942_v10, %v2940_v8  ;;  %v2663_v60 = vadd.f32 %v2662_v50, %v2310_v55  ;;  %v2943_v14 = vmax.f32 %v2661_v30, 0.0  ;;  %v7109_v8 = vld [vmem:[#allocation11_spill] sm:$0xff]  ;;  %v2324_v55 = vadd.f32 %v7110_v27, %v6217_v26  ;;  %4515 = vmatpush3.bf16.msra.mxu1 %v4808_v36 }
 0x261   : > { %v6378_v7 = vpop.f32.mrf.mxu0  ;;  %v2664_v25 = vpop.f32.mrf.mxu1  ;;  %v2318_v10 = vadd.f32 %v7109_v8, %v6207_v9 }
 0x262   : > { %v2665_v2 = vadd.f32 %v2664_v25, %v2312_v40  ;;  %3316 = vmatprep.mubr.bf16.mxu0 %v3058_v1  ;;  %v2944_v5 = vmax.f32 %v2663_v60, 0.0 }
 0x263   : > { %v6382_v4 = vpop.f32.mrf.mxu0  ;;  %v2666_v37 = vpop.f32.mrf.mxu1  ;;  %3317 = vmatmul.mubr.bf16.gmra.mxu0 %v3057_v52 }
 0x264   : > { %v2667_v17 = vadd.f32 %v2666_v37, %v2314_v22  ;;  %v2945_v29 = vmax.f32 %v2665_v2, 0.0  ;;  %v7111_v37 = vld [vmem:[#allocation15_spill] sm:$0xff] }
 0x265   : > { %v6384_v42 = vpop.f32.mrf.mxu0  ;;  %v2670_v23 = vpop.f32.mrf.mxu1  ;;  %2909 = vmatmul.mubr.bf16.gmra.mxu1 %v1814_v58 }
 0x266   : > { %v2946_v35 = vmax.f32 %v2667_v17, 0.0  ;;  %v3059_v39 = vpack.c.bf16 %v2945_v29, %v2943_v14  ;;  %v2671_v1 = vadd.f32 %v2670_v23, %v2318_v10  ;;  %v2330_v17 = vadd.f32 %v7111_v37, %v6217_v26  ;;  %v7112_v29 = vld [vmem:[#allocation16_spill] sm:$0xff]  ;;  %v7117_v37 = vld [vmem:[#allocation18_spill] sm:$0xff] }
 0x267   : > { %v6386_v0 = vpop.f32.mrf.mxu0  ;;  %v2672_v46 = vpop.f32.mrf.mxu1  ;;  %v2332_v23 = vadd.f32 %v7112_v29, %v6207_v9 }
 0x268   : > { %v3060_v32 = vpack.c.bf16 %v2946_v35, %v2944_v5  ;;  %v2673_v57 = vadd.f32 %v2672_v46, %v2320_v24  ;;  %v2947_v2 = vmax.f32 %v2671_v1, 0.0  ;;  %v7113_v35 = vld [vmem:[#allocation14_spill] sm:$0xff] }
 0x269   : > { %v6397_v16 = vpop.f32.mrf.mxu0  ;;  %v2674_v50 = vpop.f32.mrf.mxu1  ;;  %v2328_v14 = vadd.f32 %v7113_v35, %v6207_v9  ;;  %v7118_v35 = vld [vmem:[#allocation21_spill] sm:$0xff] }
 0x26a   : > { %v2675_v40 = vadd.f32 %v2674_v50, %v2322_v6  ;;  %3324 = vmatprep.mubr.bf16.mxu0 %v3060_v32  ;;  %v2948_v22 = vmax.f32 %v2673_v57, 0.0  ;;  %v2334_v6 = vadd.f32 %v7114_v49, %v6217_v26 }
 0x26b   : > { %v6401_v19 = vpop.f32.mrf.mxu0  ;;  %v2676_v56 = vpop.f32.mrf.mxu1  ;;  %3325 = vmatmul.mubr.bf16.gmra.mxu0 %v3059_v39 }
 0x26c   : > { %v2677_v51 = vadd.f32 %v2676_v56, %v2324_v55  ;;  %v2949_v52 = vmax.f32 %v2675_v40, 0.0 }
 0x26d   : > { %v6403_v25 = vpop.f32.mrf.mxu0  ;;  %v2680_v28 = vpop.f32.mrf.mxu1 }
 0x26e   : > { %v2950_v60 = vmax.f32 %v2677_v51, 0.0  ;;  %v3061_v46 = vpack.c.bf16 %v2949_v52, %v2947_v2  ;;  %v2681_v8 = vadd.f32 %v2680_v28, %v2328_v14  ;;  %v7116_v28 = vld [vmem:[#allocation20_spill] sm:$0xff]  ;;  %v2344_v14 = vadd.f32 %v7118_v35, %v6217_v26  ;;  %v7123_v35 = vld [vmem:[#allocation25_spill] sm:$0xff] }
 0x26f   : > { %v6405_v58 = vpop.f32.mrf.mxu0  ;;  %v2682_v30 = vpop.f32.mrf.mxu1  ;;  %v2342_v2 = vadd.f32 %v7116_v28, %v6207_v9 }
 0x270   : > { %v3062_v5 = vpack.c.bf16 %v2950_v60, %v2948_v22  ;;  %v2683_v32 = vadd.f32 %v2682_v30, %v2330_v17  ;;  %v2951_v56 = vmax.f32 %v2681_v8, 0.0  ;;  %v7115_v22 = vld [vmem:[#allocation19_spill] sm:$0xff]  ;;  %v2338_v17 = vadd.f32 %v7117_v37, %v6207_v9 }
 0x271   : > { %v6413_v61 = vpop.f32.mrf.mxu0  ;;  %v2684_v24 = vpop.f32.mrf.mxu1  ;;  %v2340_v60 = vadd.f32 %v7115_v22, %v6217_v26 }
 0x272   : > { %v2685_v36 = vadd.f32 %v2684_v24, %v2332_v23  ;;  %3332 = vmatprep.mubr.bf16.mxu0 %v3062_v5  ;;  %v2952_v40 = vmax.f32 %v2683_v32, 0.0 }
 0x273   : > { %v6417_v10 = vpop.f32.mrf.mxu0  ;;  %v2686_v39 = vpop.f32.mrf.mxu1  ;;  %3333 = vmatmul.mubr.bf16.gmra.mxu0 %v3061_v46 }
 0x274   : > { %v2687_v50 = vadd.f32 %v2686_v39, %v2334_v6  ;;  %v2953_v27 = vmax.f32 %v2685_v36, 0.0 }
 0x275   : > { %v6419_v55 = vpop.f32.mrf.mxu0  ;;  %v2690_v57 = vpop.f32.mrf.mxu1 }
 0x276   : > { %v2954_v1 = vmax.f32 %v2687_v50, 0.0  ;;  %v3063_v29 = vpack.c.bf16 %v2953_v27, %v2951_v56  ;;  %v2691_v49 = vadd.f32 %v2690_v57, %v2338_v17  ;;  %v4809_v50 = vld [vmem:[%s7034_s4 + $0x18] sm:$0xff]   ;;  %v7121_v57 = vld [vmem:[#allocation24_spill] sm:$0xff] }
 0x277   : > { %v6421_v51 = vpop.f32.mrf.mxu0  ;;  %v2692_v52 = vpop.f32.mrf.mxu1  ;;  %4516 = vmatprep.subr.bf16.mxu1 %v4809_v50 }
 0x278   : > { %v3064_v30 = vpack.c.bf16 %v2954_v1, %v2952_v40  ;;  %v2693_v46 = vadd.f32 %v2692_v52, %v2340_v60  ;;  %v2955_v1 = vmax.f32 %v2691_v49, 0.0  ;;  %v7120_v52 = vld [vmem:[#allocation23_spill] sm:$0xff]  ;;  %v2352_v60 = vadd.f32 %v7121_v57, %v6207_v9  ;;  %4517 = vmatpush3.bf16.msra.mxu1 %v4809_v50 }
 0x279   : > { %v6429_v23 = vpop.f32.mrf.mxu0  ;;  %v2694_v5 = vpop.f32.mrf.mxu1  ;;  %v2350_v22 = vadd.f32 %v7120_v52, %v6217_v26 }
 0x27a   : > { %v2695_v24 = vadd.f32 %v2694_v5, %v2342_v2  ;;  %3340 = vmatprep.mubr.bf16.mxu0 %v3064_v30  ;;  %v2956_v27 = vmax.f32 %v2693_v46, 0.0  ;;  %v7122_v2 = vld [vmem:[#allocation22_spill] sm:$0xff]  ;;  %v4810_v5 = vld [vmem:[%s7034_s4 + $0x10] sm:$0xff]  }
 0x27b   : > { %v2696_v6 = vpop.f32.mrf.mxu1  ;;  %3341 = vmatmul.mubr.bf16.gmra.mxu0 %v3063_v29  ;;  %v6433_v8 = vpop.f32.mrf.mxu0  ;;  %v2348_v30 = vadd.f32 %v7122_v2, %v6207_v9  ;;  %4518 = vmatprep.subr.bf16.mxu1 %v4810_v5 }
 0x27c   : > { %v2697_v32 = vadd.f32 %v2696_v6, %v2344_v14  ;;  %v2957_v36 = vmax.f32 %v2695_v24, 0.0  ;;  %7119 = vst [vmem:[#allocation4_spill] sm:$0xff] %v6433_v8  ;;  %v2354_v14 = vadd.f32 %v7123_v35, %v6217_v26  ;;  %4519 = vmatpush3.bf16.msra.mxu1 %v4810_v5  ;;  %v7130_v8 = vld [vmem:[#allocation31_spill] sm:$0xff] }
 0x27d   : > { %v2700_v39 = vpop.f32.mrf.mxu1  ;;  %v6444_v17 = vpop.f32.mrf.mxu0 }
 0x27e   : > { %v2958_v40 = vmax.f32 %v2697_v32, 0.0  ;;  %v3065_v37 = vpack.c.bf16 %v2957_v36, %v2955_v1  ;;  %v2701_v49 = vadd.f32 %v2700_v39, %v2348_v30  ;;  %v7124_v39 = vld [vmem:[#allocation27_spill] sm:$0xff]  ;;  %v7126_v30 = vld [vmem:[#allocation26_spill] sm:$0xff] }
 0x27f   : > { %v2702_v56 = vpop.f32.mrf.mxu1  ;;  %v6451_v36 = vpop.f32.mrf.mxu0 }
 0x280   : > { %v3066_v28 = vpack.c.bf16 %v2958_v40, %v2956_v27  ;;  %v2703_v46 = vadd.f32 %v2702_v56, %v2350_v22  ;;  %v4811_v40 = vld [vmem:[%s7034_s4 + $0x8] sm:$0xff]   ;;  %v2959_v57 = vmax.f32 %v2701_v49, 0.0  ;;  %v2360_v22 = vadd.f32 %v7124_v39, %v6217_v26 }
 0x281   : > { %v2704_v29 = vpop.f32.mrf.mxu1  ;;  %4520 = vmatprep.subr.bf16.mxu1 %v4811_v40 }
 0x282   : > { %v2705_v24 = vadd.f32 %v2704_v29, %v2352_v60  ;;  %3348 = vmatprep.mubr.bf16.mxu0 %v3066_v28  ;;  %v2960_v1 = vmax.f32 %v2703_v46, 0.0  ;;  %v7125_v60 = vld [vmem:[#allocation28_spill] sm:$0xff]  ;;  %4521 = vmatpush3.bf16.msra.mxu1 %v4811_v40  ;;  %v6462_v29 = vpop.f32.mrf.mxu0  ;;  %v7128_v46 = vld [vmem:[#allocation29_spill] sm:$0xff] }
 0x283   : > { %v2706_v6 = vpop.f32.mrf.mxu1  ;;  %3349 = vmatmul.mubr.bf16.gmra.mxu0 %v3065_v37  ;;  %v2362_v28 = vadd.f32 %v7125_v60, %v6207_v9  ;;  %v2358_v37 = vadd.f32 %v7126_v30, %v6207_v9  ;;  %7127 = vst [vmem:[#allocation7_spill] sm:$0xff] %v6462_v29 }
 0x284   : > { %v2707_v32 = vadd.f32 %v2706_v6, %v2354_v14  ;;  %v2961_v50 = vmax.f32 %v2705_v24, 0.0  ;;  %v4812_v14 = vld [vmem:[%s7034_s4] sm:$0xff]   ;;  %v2364_v24 = vadd.f32 %v7128_v46, %v6217_v26  ;;  %v2370_v46 = vadd.f32 %v7130_v8, %v6217_v26 }
 0x285   : > { %v2710_v27 = vpop.f32.mrf.mxu1  ;;  %4522 = vmatprep.subr.bf16.mxu1 %v4812_v14 }
 0x286   : > { %v2962_v52 = vmax.f32 %v2707_v32, 0.0  ;;  %v3067_v5 = vpack.c.bf16 %v2961_v50, %v2959_v57  ;;  %v2711_v32 = vadd.f32 %v2710_v27, %v2358_v37  ;;  %4523 = vmatpush3.bf16.msra.mxu1 %v4812_v14  ;;  %v7134_v14 = vld [vmem:[#allocation33_spill] sm:$0xff] }
 0x287   : > { %v2712_v56 = vpop.f32.mrf.mxu1 }
 0x288   : > { %v3068_v2 = vpack.c.bf16 %v2962_v52, %v2960_v1  ;;  %v2713_v49 = vadd.f32 %v2712_v56, %v2360_v22  ;;  %v6469_v52 = vpop.f32.mrf.mxu0  ;;  %v2963_v30 = vmax.f32 %v2711_v32, 0.0  ;;  %v7131_v56 = vld [vmem:[#allocation32_spill] sm:$0xff] }
 0x289   : > { %v2714_v35 = vpop.f32.mrf.mxu1  ;;  %7129 = vst [vmem:[#allocation8_spill] sm:$0xff] %v6469_v52  ;;  %v2372_v22 = vadd.f32 %v7131_v56, %v6207_v9 }
 0x28a   : > { %v2715_v6 = vadd.f32 %v2714_v35, %v2362_v28  ;;  %3356 = vmatprep.mubr.bf16.mxu0 %v3068_v2  ;;  %v2964_v39 = vmax.f32 %v2713_v49, 0.0  ;;  %v7132_v28 = vld [vmem:[#allocation30_spill] sm:$0xff]  ;;  %v6477_v37 = vpop.f32.mrf.mxu0 }
 0x28b   : > { %v2716_v1 = vpop.f32.mrf.mxu1  ;;  %3357 = vmatmul.mubr.bf16.gmra.mxu0 %v3067_v5  ;;  %v2368_v2 = vadd.f32 %v7132_v28, %v6207_v9  ;;  %7133 = vst [vmem:[#allocation38_spill] sm:$0xff] %v6477_v37 }
 0x28c   : > { %v2717_v40 = vadd.f32 %v2716_v1, %v2364_v24  ;;  %v2965_v50 = vmax.f32 %v2715_v6, 0.0  ;;  %v2374_v24 = vadd.f32 %v7134_v14, %v6217_v26  ;;  %v7137_v14 = vld [vmem:[#allocation37_spill] sm:$0xff] }
 0x28d   : > { %v2720_v57 = vpop.f32.mrf.mxu1 }
 0x28e   : > { %v2966_v60 = vmax.f32 %v2717_v40, 0.0  ;;  %v3069_v5 = vpack.c.bf16 %v2965_v50, %v2963_v30  ;;  %v2721_v32 = vadd.f32 %v2720_v57, %v2368_v2  ;;  %v6481_v40 = vpop.f32.mrf.mxu0  ;;  %v7136_v50 = vld [vmem:[#allocation36_spill] sm:$0xff]  ;;  %v7138_v57 = vld [vmem:[#allocation34_spill] sm:$0xff] }
 0x28f   : > { %v2722_v29 = vpop.f32.mrf.mxu1  ;;  %7135 = vst [vmem:[#allocation35_spill] sm:$0xff] %v6481_v40  ;;  %v2380_v30 = vadd.f32 %v7136_v50, %v6217_v26 }
 0x290   : > { %v3070_v27 = vpack.c.bf16 %v2966_v60, %v2964_v39  ;;  %v2723_v49 = vadd.f32 %v2722_v29, %v2370_v46  ;;  %v2967_v52 = vmax.f32 %v2721_v32, 0.0  ;;  %v2382_v29 = vadd.f32 %v7137_v14, %v6207_v9 }
 0x291   : > { %v2724_v35 = vpop.f32.mrf.mxu1 }
 0x292   : > { %v2725_v6 = vadd.f32 %v2724_v35, %v2372_v22  ;;  %3364 = vmatprep.mubr.bf16.mxu0 %v3070_v27  ;;  %v2968_v56 = vmax.f32 %v2723_v49, 0.0  ;;  %v2378_v22 = vadd.f32 %v7138_v57, %v6207_v9  ;;  %v6489_v27 = vpop.f32.mrf.mxu0  ;;  %v7140_v35 = vld [vmem:[#allocation39_spill] sm:$0xff] }
 0x293   : > { %v2726_v1 = vpop.f32.mrf.mxu1  ;;  %3365 = vmatmul.mubr.bf16.gmra.mxu0 %v3069_v5  ;;  %7139 = vst [vmem:[#allocation3_spill] sm:$0xff] %v6489_v27 }
 0x294   : > { %v2727_v8 = vadd.f32 %v2726_v1, %v2374_v24  ;;  %v2969_v39 = vmax.f32 %v2725_v6, 0.0  ;;  %v2384_v24 = vadd.f32 %v7140_v35, %v6217_v26  ;;  %v6493_v50 = vpop.f32.mrf.mxu0  ;;  %v7143_v35 = vld [vmem:[#allocation41_spill] sm:$0xff] }
 0x295   : > { %v2730_v60 = vpop.f32.mrf.mxu1  ;;  %7141 = vst [vmem:[#allocation6_spill] sm:$0xff] %v6493_v50 }
 0x296   : > { %v2970_v28 = vmax.f32 %v2727_v8, 0.0  ;;  %v3071_v2 = vpack.c.bf16 %v2969_v39, %v2967_v52  ;;  %v2731_v32 = vadd.f32 %v2730_v60, %v2378_v22  ;;  %v7142_v52 = vld [vmem:[#allocation40_spill] sm:$0xff]  ;;  %v7144_v60 = vld [vmem:[#allocation2_spill] sm:$0xff] }
 0x297   : > { %v2732_v37 = vpop.f32.mrf.mxu1  ;;  %v2390_v39 = vadd.f32 %v7142_v52, %v6217_v26 }
 0x298   : > { %v3072_v46 = vpack.c.bf16 %v2970_v28, %v2968_v56  ;;  %v2733_v49 = vadd.f32 %v2732_v37, %v2380_v30  ;;  %v2971_v40 = vmax.f32 %v2731_v32, 0.0  ;;  %v2392_v37 = vadd.f32 %v7143_v35, %v6207_v9 }
 0x299   : > { %v2734_v5 = vpop.f32.mrf.mxu1 }
 0x29a   : > { %v2735_v6 = vadd.f32 %v2734_v5, %v2382_v29  ;;  %3372 = vmatprep.mubr.bf16.mxu0 %v3072_v46  ;;  %v2972_v14 = vmax.f32 %v2733_v49, 0.0  ;;  %v2388_v29 = vadd.f32 %v7144_v60, %v6207_v9  ;;  %v6501_v46 = vpop.f32.mrf.mxu0  ;;  %v7146_v5 = vld [vmem:[#allocation42_spill] sm:$0xff] }
 0x29b   : > { %v2736_v1 = vpop.f32.mrf.mxu1  ;;  %3373 = vmatmul.mubr.bf16.gmra.mxu0 %v3071_v2  ;;  %7145 = vst [vmem:[#allocation9_spill] sm:$0xff] %v6501_v46 }
 0x29c   : > { %v2737_v8 = vadd.f32 %v2736_v1, %v2384_v24  ;;  %v2973_v56 = vmax.f32 %v2735_v6, 0.0  ;;  %v2394_v24 = vadd.f32 %v7146_v5, %v6217_v26  ;;  %v6505_v52 = vpop.f32.mrf.mxu0 }
 0x29d   : > { %v2740_v28 = vpop.f32.mrf.mxu1 }
 0x29e   : > { %v2974_v57 = vmax.f32 %v2737_v8, 0.0  ;;  %v3073_v22 = vpack.c.bf16 %v2973_v56, %v2971_v40  ;;  %v2741_v32 = vadd.f32 %v2740_v28, %v2388_v29  ;;  %v2400_v40 = vadd.f32 %v6249_v3, %v6217_v26 }
 0x29f   : > { %v2742_v27 = vpop.f32.mrf.mxu1  ;;  %v2398_v28 = vadd.f32 %v6243_v59, %v6207_v9  ;;  %v2404_v29 = vadd.f32 %v6259_v13, %v6217_v26  ;;  %v2412_v13 = vadd.f32 %v6279_v47, %v6207_v9 }
 0x2a0   : > { %v3074_v30 = vpack.c.bf16 %v2974_v57, %v2972_v14  ;;  %v2743_v49 = vadd.f32 %v2742_v27, %v2390_v39  ;;  %v2975_v50 = vmax.f32 %v2741_v32, 0.0  ;;  %v2402_v27 = vadd.f32 %v6253_v12, %v6207_v9  ;;  %v6513_v39 = vpop.f32.mrf.mxu0 }
 0x2a1   : > { %v2744_v2 = vpop.f32.mrf.mxu1 }
 0x2a2   : > { %v2745_v6 = vadd.f32 %v2744_v2, %v2392_v37  ;;  %3380 = vmatprep.mubr.bf16.mxu0 %v3074_v30  ;;  %v2976_v35 = vmax.f32 %v2743_v49, 0.0  ;;  %v6517_v49 = vpop.f32.mrf.mxu0 }
 0x2a3   : > { %v2746_v1 = vpop.f32.mrf.mxu1  ;;  %3381 = vmatmul.mubr.bf16.gmra.mxu0 %v3073_v22 }
 0x2a4   : > { %v2747_v8 = vadd.f32 %v2746_v1, %v2394_v24  ;;  %v2977_v14 = vmax.f32 %v2745_v6, 0.0 }
 0x2a5   : > { %v2750_v57 = vpop.f32.mrf.mxu1 }
 0x2a6   : > { %v2978_v60 = vmax.f32 %v2747_v8, 0.0  ;;  %v3075_v37 = vpack.c.bf16 %v2977_v14, %v2975_v50  ;;  %v2751_v5 = vadd.f32 %v2750_v57, %v2398_v28  ;;  %v2410_v50 = vadd.f32 %v6273_v20, %v6217_v26  ;;  %v6525_v57 = vpop.f32.mrf.mxu0 }
 0x2a7   : > { %v2752_v46 = vpop.f32.mrf.mxu1  ;;  %v2408_v14 = vadd.f32 %v6265_v45, %v6207_v9 }
 0x2a8   : > { %v3076_v56 = vpack.c.bf16 %v2978_v60, %v2976_v35  ;;  %v2753_v22 = vadd.f32 %v2752_v46, %v2400_v40  ;;  %v2979_v1 = vmax.f32 %v2751_v5, 0.0  ;;  %v2414_v40 = vadd.f32 %v6283_v54, %v6217_v26 }
 0x2a9   : > { %v2754_v30 = vpop.f32.mrf.mxu1  ;;  %v2422_v54 = vadd.f32 %v6301_v34, %v6207_v9 }
 0x2aa   : > { %v2755_v2 = vadd.f32 %v2754_v30, %v2402_v27  ;;  %3388 = vmatprep.mubr.bf16.mxu0 %v3076_v56  ;;  %v2980_v32 = vmax.f32 %v2753_v22, 0.0  ;;  %v6529_v30 = vpop.f32.mrf.mxu0 }
 0x2ab   : > { %v2756_v24 = vpop.f32.mrf.mxu1  ;;  %3389 = vmatmul.mubr.bf16.gmra.mxu0 %v3075_v37 }
 0x2ac   : > { %v2757_v3 = vadd.f32 %v2756_v24, %v2404_v29  ;;  %v2981_v12 = vmax.f32 %v2755_v2, 0.0  ;;  %v2420_v24 = vadd.f32 %v6297_v43, %v6217_v26 }
 0x2ad   : > { %v2760_v6 = vpop.f32.mrf.mxu1 }
 0x2ae   : > { %v2982_v59 = vmax.f32 %v2757_v3, 0.0  ;;  %v3077_v35 = vpack.c.bf16 %v2981_v12, %v2979_v1  ;;  %v2761_v28 = vadd.f32 %v2760_v6, %v2408_v14  ;;  %v2418_v12 = vadd.f32 %v6291_v53, %v6207_v9  ;;  %v6537_v6 = vpop.f32.mrf.mxu0 }
 0x2af   : > { %v2762_v8 = vpop.f32.mrf.mxu1  ;;  %v2424_v1 = vadd.f32 %v6310_v63, %v6217_v26  ;;  %v2432_v63 = vadd.f32 %v6326_v44, %v6207_v9 }
 0x2b0   : > { %v3078_v46 = vpack.c.bf16 %v2982_v59, %v2980_v32  ;;  %v2763_v27 = vadd.f32 %v2762_v8, %v2410_v50  ;;  %v2983_v2 = vmax.f32 %v2761_v28, 0.0  ;;  %v6541_v14 = vpop.f32.mrf.mxu0 }
 0x2b1   : > { %v2764_v60 = vpop.f32.mrf.mxu1 }
 0x2b2   : > { %v2765_v56 = vadd.f32 %v2764_v60, %v2412_v13  ;;  %3396 = vmatprep.mubr.bf16.mxu0 %v3078_v46  ;;  %v2984_v22 = vmax.f32 %v2763_v27, 0.0 }
 0x2b3   : > { %v2766_v37 = vpop.f32.mrf.mxu1  ;;  %3397 = vmatmul.mubr.bf16.gmra.mxu0 %v3077_v35 }
 0x2b4   : > { %v2767_v20 = vadd.f32 %v2766_v37, %v2414_v40  ;;  %v2985_v47 = vmax.f32 %v2765_v56, 0.0  ;;  %v2430_v56 = vadd.f32 %v6322_v33, %v6217_v26  ;;  %v2428_v37 = vadd.f32 %v6316_v62, %v6207_v9 }
 0x2b5   : > { %v2770_v29 = vpop.f32.mrf.mxu1 }
 0x2b6   : > { %v2986_v45 = vmax.f32 %v2767_v20, 0.0  ;;  %v3079_v32 = vpack.c.bf16 %v2985_v47, %v2983_v2  ;;  %v2771_v13 = vadd.f32 %v2770_v29, %v2418_v12  ;;  %v6549_v20 = vpop.f32.mrf.mxu0 }
 0x2b7   : > { %v2772_v5 = vpop.f32.mrf.mxu1 }
 0x2b8   : > { %v3080_v3 = vpack.c.bf16 %v2986_v45, %v2984_v22  ;;  %v2773_v8 = vadd.f32 %v2772_v5, %v2420_v24  ;;  %v2987_v40 = vmax.f32 %v2771_v13, 0.0  ;;  %v2434_v22 = vadd.f32 %v6334_v48, %v6217_v26 }
 0x2b9   : > { %v2774_v59 = vpop.f32.mrf.mxu1  ;;  %v2442_v48 = vadd.f32 %v6350_v21, %v6207_v9 }
 0x2ba   : > { %v2775_v50 = vadd.f32 %v2774_v59, %v2422_v54  ;;  %3404 = vmatprep.mubr.bf16.mxu0 %v3080_v3  ;;  %v2988_v60 = vmax.f32 %v2773_v8, 0.0  ;;  %v6553_v54 = vpop.f32.mrf.mxu0 }
 0x2bb   : > { %v2776_v46 = vpop.f32.mrf.mxu1  ;;  %3405 = vmatmul.mubr.bf16.gmra.mxu0 %v3079_v32 }
 0x2bc   : > { %v2777_v43 = vadd.f32 %v2776_v46, %v2424_v1  ;;  %v2989_v34 = vmax.f32 %v2775_v50, 0.0  ;;  %v2440_v1 = vadd.f32 %v6346_v18, %v6217_v26  ;;  %v2438_v50 = vadd.f32 %v6340_v15, %v6207_v9  ;;  %v6561_v13 = vpop.f32.mrf.mxu0 }
 0x2bd   : > { %v2780_v35 = vpop.f32.mrf.mxu1 }
 0x2be   : > { %v2990_v53 = vmax.f32 %v2777_v43, 0.0  ;;  %v3081_v47 = vpack.c.bf16 %v2989_v34, %v2987_v40  ;;  %v2781_v5 = vadd.f32 %v2780_v35, %v2428_v37  ;;  %v2444_v34 = vadd.f32 %v6358_v11, %v6217_v26 }
 0x2bf   : > { %v2782_v27 = vpop.f32.mrf.mxu1  ;;  %v2452_v11 = vadd.f32 %v6370_v31, %v6207_v9 }
 0x2c0   : > { %v3082_v28 = vpack.c.bf16 %v2990_v53, %v2988_v60  ;;  %v2783_v45 = vadd.f32 %v2782_v27, %v2430_v56  ;;  %v2991_v32 = vmax.f32 %v2781_v5, 0.0  ;;  %v6565_v27 = vpop.f32.mrf.mxu0 }
 0x2c1   : > { %v2784_v29 = vpop.f32.mrf.mxu1 }
 0x2c2   : > { %v2785_v2 = vadd.f32 %v2784_v29, %v2432_v63  ;;  %3412 = vmatprep.mubr.bf16.mxu0 %v3082_v28  ;;  %v2992_v12 = vmax.f32 %v2783_v45, 0.0  ;;  %v6573_v45 = vpop.f32.mrf.mxu0 }
 0x2c3   : > { %v2786_v24 = vpop.f32.mrf.mxu1  ;;  %3413 = vmatmul.mubr.bf16.gmra.mxu0 %v3081_v47  ;;  %v2450_v47 = vadd.f32 %v6368_v41, %v6217_v26 }
 0x2c4   : > { %v2787_v33 = vadd.f32 %v2786_v24, %v2434_v22  ;;  %v2993_v44 = vmax.f32 %v2785_v2, 0.0  ;;  %v2448_v22 = vadd.f32 %v6364_v38, %v6207_v9  ;;  %v2454_v24 = vadd.f32 %v6378_v7, %v6217_v26 }
 0x2c5   : > { %v2790_v3 = vpop.f32.mrf.mxu1  ;;  %v2462_v7 = vadd.f32 %v6386_v0, %v6207_v9 }
 0x2c6   : > { %v2994_v62 = vmax.f32 %v2787_v33, 0.0  ;;  %v3083_v46 = vpack.c.bf16 %v2993_v44, %v2991_v32  ;;  %v2791_v53 = vadd.f32 %v2790_v3, %v2438_v50 }
 0x2c7   : > { %v2792_v59 = vpop.f32.mrf.mxu1 }
 0x2c8   : > { %v3084_v8 = vpack.c.bf16 %v2994_v62, %v2992_v12  ;;  %v2793_v35 = vadd.f32 %v2792_v59, %v2440_v1  ;;  %v2995_v28 = vmax.f32 %v2791_v53, 0.0  ;;  %v6577_v62 = vpop.f32.mrf.mxu0 }
 0x2c9   : > { %v2794_v43 = vpop.f32.mrf.mxu1 }
 0x2ca   : > { %v2795_v60 = vadd.f32 %v2794_v43, %v2442_v48  ;;  %3420 = vmatprep.mubr.bf16.mxu0 %v3084_v8  ;;  %v2996_v63 = vmax.f32 %v2793_v35, 0.0  ;;  %v2460_v8 = vadd.f32 %v6384_v42, %v6217_v26  ;;  %v6585_v43 = vpop.f32.mrf.mxu0 }
 0x2cb   : > { %v2796_v40 = vpop.f32.mrf.mxu1  ;;  %3421 = vmatmul.mubr.bf16.gmra.mxu0 %v3083_v46  ;;  %v2458_v46 = vadd.f32 %v6382_v4, %v6207_v9 }
 0x2cc   : > { %v2797_v18 = vadd.f32 %v2796_v40, %v2444_v34  ;;  %v2997_v21 = vmax.f32 %v2795_v60, 0.0  ;;  %v2464_v60 = vadd.f32 %v6397_v16, %v6217_v26  ;;  %v2472_v16 = vadd.f32 %v6405_v58, %v6207_v9 }
 0x2cd   : > { %v2800_v56 = vpop.f32.mrf.mxu1 }
 0x2ce   : > { %v2998_v15 = vmax.f32 %v2797_v18, 0.0  ;;  %v3085_v2 = vpack.c.bf16 %v2997_v21, %v2995_v28  ;;  %v2801_v3 = vadd.f32 %v2800_v56, %v2448_v22  ;;  %v6589_v56 = vpop.f32.mrf.mxu0 }
 0x2cf   : > { %v2802_v37 = vpop.f32.mrf.mxu1 }
 0x2d0   : > { %v3086_v29 = vpack.c.bf16 %v2998_v15, %v2996_v63  ;;  %v2803_v33 = vadd.f32 %v2802_v37, %v2450_v47  ;;  %v2999_v1 = vmax.f32 %v2801_v3, 0.0  ;;  %v2470_v47 = vadd.f32 %v6403_v25, %v6217_v26  ;;  %v6597_v22 = vpop.f32.mrf.mxu0 }
 0x2d1   : > { %v2804_v5 = vpop.f32.mrf.mxu1 }
 0x2d2   : > { %v2805_v44 = vadd.f32 %v2804_v5, %v2452_v11  ;;  %3428 = vmatprep.mubr.bf16.mxu0 %v3086_v29  ;;  %v3000_v59 = vmax.f32 %v2803_v33, 0.0  ;;  %v2468_v29 = vadd.f32 %v6401_v19, %v6207_v9 }
 0x2d3   : > { %v2806_v12 = vpop.f32.mrf.mxu1  ;;  %3429 = vmatmul.mubr.bf16.gmra.mxu0 %v3085_v2 }
 0x2d4   : > { %v2807_v41 = vadd.f32 %v2806_v12, %v2454_v24  ;;  %v3001_v31 = vmax.f32 %v2805_v44, 0.0  ;;  %v2474_v24 = vadd.f32 %v6413_v61, %v6217_v26  ;;  %v2482_v61 = vadd.f32 %v6421_v51, %v6207_v9 }
 0x2d5   : > { %v2810_v32 = vpop.f32.mrf.mxu1 }
 0x2d6   : > { %v3002_v38 = vmax.f32 %v2807_v41, 0.0  ;;  %v3087_v34 = vpack.c.bf16 %v3001_v31, %v2999_v1  ;;  %v2811_v18 = vadd.f32 %v2810_v32, %v2458_v46  ;;  %v6601_v41 = vpop.f32.mrf.mxu0  ;;  %v2480_v1 = vadd.f32 %v6419_v55, %v6217_v26 }
 0x2d7   : > { %v2812_v48 = vpop.f32.mrf.mxu1 }
 0x2d8   : > { %v3088_v50 = vpack.c.bf16 %v3002_v38, %v3000_v59  ;;  %v2813_v53 = vadd.f32 %v2812_v48, %v2460_v8  ;;  %v3003_v28 = vmax.f32 %v2811_v18, 0.0  ;;  %v2478_v8 = vadd.f32 %v6417_v10, %v6207_v9 }
 0x2d9   : > { %v2814_v35 = vpop.f32.mrf.mxu1 }
 0x2da   : > { %v2815_v40 = vadd.f32 %v2814_v35, %v2462_v7  ;;  %3436 = vmatprep.mubr.bf16.mxu0 %v3088_v50  ;;  %v3004_v15 = vmax.f32 %v2813_v53, 0.0  ;;  %v6609_v7 = vpop.f32.mrf.mxu0 }
 0x2db   : > { %v2816_v21 = vpop.f32.mrf.mxu1  ;;  %3437 = vmatmul.mubr.bf16.gmra.mxu0 %v3087_v34  ;;  %v2484_v34 = vadd.f32 %v6429_v23, %v6217_v26  ;;  %v2492_v23 = vadd.f32 %v6451_v36, %v6207_v9 }
 0x2dc   : > { %v2817_v42 = vadd.f32 %v2816_v21, %v2464_v60  ;;  %v3005_v0 = vmax.f32 %v2815_v40, 0.0  ;;  %v6613_v18 = vpop.f32.mrf.mxu0 }
 0x2dd   : > { %v2820_v63 = vpop.f32.mrf.mxu1 }
 0x2de   : > { %v3006_v4 = vmax.f32 %v2817_v42, 0.0  ;;  %v3089_v2 = vpack.c.bf16 %v3005_v0, %v3003_v28  ;;  %v2821_v3 = vadd.f32 %v2820_v63, %v2468_v29  ;;  %v7147_v28 = vld [vmem:[#allocation4_spill] sm:$0xff]  ;;  %v7148_v29 = vld [vmem:[#allocation7_spill] sm:$0xff] }
 0x2df   : > { %v2822_v37 = vpop.f32.mrf.mxu1 }
 0x2e0   : > { %v3090_v11 = vpack.c.bf16 %v3006_v4, %v3004_v15  ;;  %v2823_v33 = vadd.f32 %v2822_v37, %v2470_v47  ;;  %v3007_v59 = vmax.f32 %v2821_v3, 0.0  ;;  %v2490_v15 = vadd.f32 %v6444_v17, %v6217_v26  ;;  %v6621_v47 = vpop.f32.mrf.mxu0 }
 0x2e1   : > { %v2824_v5 = vpop.f32.mrf.mxu1  ;;  %v2488_v37 = vadd.f32 %v7147_v28, %v6207_v9 }
 0x2e2   : > { %v2825_v44 = vadd.f32 %v2824_v5, %v2472_v16  ;;  %3444 = vmatprep.mubr.bf16.mxu0 %v3090_v11  ;;  %v3008_v32 = vmax.f32 %v2823_v33, 0.0  ;;  %v6625_v3 = vpop.f32.mrf.mxu0 }
 0x2e3   : > { %v2826_v12 = vpop.f32.mrf.mxu1  ;;  %3445 = vmatmul.mubr.bf16.gmra.mxu0 %v3089_v2  ;;  %v2494_v2 = vadd.f32 %v7148_v29, %v6217_v26  ;;  %v7153_v29 = vld [vmem:[#allocation9_spill] sm:$0xff] }
 0x2e4   : > { %v2827_v25 = vadd.f32 %v2826_v12, %v2474_v24  ;;  %v3009_v58 = vmax.f32 %v2825_v44, 0.0 }
 0x2e5   : > { %v2830_v31 = vpop.f32.mrf.mxu1 }
 0x2e6   : > { %v3010_v19 = vmax.f32 %v2827_v25, 0.0  ;;  %v3091_v50 = vpack.c.bf16 %v3009_v58, %v3007_v59  ;;  %v2831_v53 = vadd.f32 %v2830_v31, %v2478_v8 }
 0x2e7   : > { %v2832_v38 = vpop.f32.mrf.mxu1 }
 0x2e8   : > { %v3092_v48 = vpack.c.bf16 %v3010_v19, %v3008_v32  ;;  %v2833_v35 = vadd.f32 %v2832_v38, %v2480_v1  ;;  %v3011_v0 = vmax.f32 %v2831_v53, 0.0  ;;  %v7149_v19 = vld [vmem:[#allocation38_spill] sm:$0xff]  ;;  %v7150_v38 = vld [vmem:[#allocation35_spill] sm:$0xff] }
 0x2e9   : > { %v2834_v46 = vpop.f32.mrf.mxu1  ;;  %v2500_v59 = vadd.f32 %v7149_v19, %v6217_v26  ;;  %v2502_v1 = vadd.f32 %v7150_v38, %v6207_v9 }
 0x2ea   : > { %v2835_v60 = vadd.f32 %v2834_v46, %v2482_v61  ;;  %3452 = vmatprep.mubr.bf16.mxu0 %v3092_v48  ;;  %v3012_v42 = vmax.f32 %v2833_v35, 0.0  ;;  %v7151_v48 = vld [vmem:[#allocation8_spill] sm:$0xff]  ;;  %v7152_v35 = vld [vmem:[#allocation3_spill] sm:$0xff] }
 0x2eb   : > { %v2836_v40 = vpop.f32.mrf.mxu1  ;;  %3453 = vmatmul.mubr.bf16.gmra.mxu0 %v3091_v50  ;;  %v2498_v8 = vadd.f32 %v7151_v48, %v6207_v9  ;;  %v6633_v50 = vpop.f32.mrf.mxu0 }
 0x2ec   : > { %v2837_v55 = vadd.f32 %v2836_v40, %v2484_v34  ;;  %v3013_v51 = vmax.f32 %v2835_v60, 0.0  ;;  %v2504_v60 = vadd.f32 %v7152_v35, %v6217_v26 }
 0x2ed   : > { %v2840_v21 = vpop.f32.mrf.mxu1 }
 0x2ee   : > { %v3014_v10 = vmax.f32 %v2837_v55, 0.0  ;;  %v3093_v16 = vpack.c.bf16 %v3013_v51, %v3011_v0  ;;  %v2841_v33 = vadd.f32 %v2840_v21, %v2488_v37  ;;  %v6640_v21 = vld [vmem:[%s7035_s5 + $0x2] ss:$0 sm:$0xff] }
 0x2ef   : > { %v2842_v63 = vpop.f32.mrf.mxu1 }
 0x2f0   : > { %v3094_v4 = vpack.c.bf16 %v3014_v10, %v3012_v42  ;;  %v2843_v5 = vadd.f32 %v2842_v63, %v2490_v15  ;;  %v3015_v31 = vmax.f32 %v2841_v33, 0.0 }
 0x2f1   : > { %v2844_v11 = vpop.f32.mrf.mxu1 }
 0x2f2   : > { %v2845_v24 = vadd.f32 %v2844_v11, %v2492_v23  ;;  %3460 = vmatprep.mubr.bf16.mxu0 %v3094_v4  ;;  %v3016_v25 = vmax.f32 %v2843_v5, 0.0  ;;  %v2512_v5 = vadd.f32 %v6505_v52, %v6207_v9 }
 0x2f3   : > { %v2846_v44 = vpop.f32.mrf.mxu1  ;;  %3461 = vmatmul.mubr.bf16.gmra.mxu0 %v3093_v16 }
 0x2f4   : > { %v2847_v17 = vadd.f32 %v2846_v44, %v2494_v2  ;;  %v3017_v36 = vmax.f32 %v2845_v24, 0.0  ;;  %v2510_v2 = vadd.f32 %v7153_v29, %v6217_v26  ;;  %v7154_v44 = vld [vmem:[#allocation6_spill] sm:$0xff] }
 0x2f5   : > { %v2850_v12 = vpop.f32.mrf.mxu1 }
 0x2f6   : > { %v3018_v58 = vmax.f32 %v2847_v17, 0.0  ;;  %v3095_v46 = vpack.c.bf16 %v3017_v36, %v3015_v31  ;;  %v2851_v55 = vadd.f32 %v2850_v12, %v2498_v8  ;;  %v2508_v17 = vadd.f32 %v7154_v44, %v6207_v9 }
 0x2f7   : > { %v2852_v32 = vpop.f32.mrf.mxu1  ;;  %v2514_v36 = vadd.f32 %v6513_v39, %v6217_v26 }
 0x2f8   : > { %v3096_v61 = vpack.c.bf16 %v3018_v58, %v3016_v25  ;;  %v2853_v53 = vadd.f32 %v2852_v32, %v2500_v59  ;;  %v3019_v37 = vmax.f32 %v2851_v55, 0.0 }
 0x2f9   : > { %v2854_v34 = vpop.f32.mrf.mxu1 }
 0x2fa   : > { %v2855_v40 = vadd.f32 %v2854_v34, %v2502_v1  ;;  %3468 = vmatprep.mubr.bf16.mxu0 %v3096_v61  ;;  %v3020_v23 = vmax.f32 %v2853_v53, 0.0 }
 0x2fb   : > { %v2856_v51 = vpop.f32.mrf.mxu1  ;;  %v3278_v42 = vpop.f32.mrf.mxu0  ;;  %3469 = vmatmul.mubr.bf16.gmra.mxu0 %v3095_v46 }
 0x2fc   : > { %v2857_v10 = vadd.f32 %v2856_v51, %v2504_v60  ;;  %v3021_v0 = vmax.f32 %v2855_v40, 0.0  ;;  %v3279_v28 = vadd.f32 %v6640_v21, %v3278_v42  ;;  %v2520_v51 = vadd.f32 %v6525_v57, %v6217_v26 }
 0x2fd   : > { %v2860_v63 = vpop.f32.mrf.mxu1  ;;  %v3280_v15 = vpop.f32.mrf.mxu0  ;;  %v2522_v42 = vadd.f32 %v6529_v30, %v6207_v9 }
 0x2fe   : > { %v3022_v4 = vmax.f32 %v2857_v10, 0.0  ;;  %v3097_v12 = vpack.c.bf16 %v3021_v0, %v3019_v37  ;;  %v3533_v31 = vmax.f32 %v3279_v28, 0.0  ;;  %v2861_v38 = vadd.f32 %v2860_v63, %v2508_v17 }
 0x2ff   : > { %v2862_v16 = vpop.f32.mrf.mxu1  ;;  %v3281_v11 = vpop.f32.mrf.mxu0  ;;  %v2518_v63 = vadd.f32 %v6517_v49, %v6207_v9  ;;  %v2524_v15 = vadd.f32 %v6537_v6, %v6217_v26 }
 0x300   : > { %v3098_v24 = vpack.c.bf16 %v3022_v4, %v3020_v23  ;;  %v3282_v33 = vadd.f32 %v6640_v21, %v3281_v11  ;;  %v2863_v32 = vadd.f32 %v2862_v16, %v2510_v2  ;;  %v3023_v53 = vmax.f32 %v2861_v38, 0.0 }
 0x301   : > { %v2864_v25 = vpop.f32.mrf.mxu1  ;;  %v3283_v58 = vpop.f32.mrf.mxu0  ;;  %v2528_v38 = vadd.f32 %v6541_v14, %v6207_v9 }
 0x302   : > { %v3534_v19 = vmax.f32 %v3282_v33, 0.0  ;;  %v2865_v59 = vadd.f32 %v2864_v25, %v2512_v5  ;;  %3476 = vmatprep.mubr.bf16.mxu0 %v3098_v24  ;;  %v3024_v35 = vmax.f32 %v2863_v32, 0.0  ;;  %v2532_v32 = vadd.f32 %v6553_v54, %v6207_v9 }
 0x303   : > { %v2866_v1 = vpop.f32.mrf.mxu1  ;;  %v3286_v52 = vpop.f32.mrf.mxu0  ;;  %3477 = vmatmul.mubr.bf16.gmra.mxu0 %v3097_v12 }
 0x304   : > { %v3597_v61 = vpack.c.bf16 %v3534_v19, %v3533_v31  ;;  %v2867_v48 = vadd.f32 %v2866_v1, %v2514_v36  ;;  %v3025_v8 = vmax.f32 %v2865_v59, 0.0  ;;  %v3287_v39 = vadd.f32 %v6640_v21, %v3286_v52 }
 0x305   : > { %v2870_v46 = vpop.f32.mrf.mxu1  ;;  %v3288_v34 = vpop.f32.mrf.mxu0  ;;  %v2530_v31 = vadd.f32 %v6549_v20, %v6217_v26  ;;  %v2534_v1 = vadd.f32 %v6561_v13, %v6217_v26 }
 0x306   : > { %v3026_v60 = vmax.f32 %v2867_v48, 0.0  ;;  %4524 = vmatprep.mubr.bf16.mxu1 %v3597_v61  ;;  %v3099_v23 = vpack.c.bf16 %v3025_v8, %v3023_v53  ;;  %v3535_v37 = vmax.f32 %v3287_v39, 0.0  ;;  %v2871_v57 = vadd.f32 %v2870_v46, %v2518_v63 }
 0x307   : > { %v2872_v40 = vpop.f32.mrf.mxu1  ;;  %v3289_v55 = vpop.f32.mrf.mxu0 }
 0x308   : > { %v3100_v10 = vpack.c.bf16 %v3026_v60, %v3024_v35  ;;  %v3290_v0 = vadd.f32 %v6640_v21, %v3289_v55  ;;  %v2873_v16 = vadd.f32 %v2872_v40, %v2520_v51  ;;  %v3027_v12 = vmax.f32 %v2871_v57, 0.0 }
 0x309   : > { %v2874_v4 = vpop.f32.mrf.mxu1  ;;  %v3291_v28 = vpop.f32.mrf.mxu0 }
 0x30a   : > { %v3536_v11 = vmax.f32 %v3290_v0, 0.0  ;;  %v2875_v29 = vadd.f32 %v2874_v4, %v2522_v42  ;;  %3484 = vmatprep.mubr.bf16.mxu0 %v3100_v10  ;;  %v3028_v17 = vmax.f32 %v2873_v16, 0.0  ;;  %v2544_v16 = vadd.f32 %v6585_v43, %v6217_v26 }
 0x30b   : > { %v2876_v2 = vpop.f32.mrf.mxu1  ;;  %v3294_v30 = vpop.f32.mrf.mxu0  ;;  %3485 = vmatmul.mubr.bf16.gmra.mxu0 %v3099_v23  ;;  %v2542_v23 = vadd.f32 %v6577_v62, %v6207_v9 }
 0x30c   : > { %v3598_v5 = vpack.c.bf16 %v3536_v11, %v3535_v37  ;;  %v2877_v24 = vadd.f32 %v2876_v2, %v2524_v15  ;;  %v3029_v33 = vmax.f32 %v2875_v29, 0.0  ;;  %v3295_v6 = vadd.f32 %v6640_v21, %v3294_v30 }
 0x30d   : > { %v2880_v44 = vpop.f32.mrf.mxu1  ;;  %v3296_v49 = vpop.f32.mrf.mxu0  ;;  %v2540_v15 = vadd.f32 %v6573_v45, %v6217_v26  ;;  %v2538_v37 = vadd.f32 %v6565_v27, %v6207_v9 }
 0x30e   : > { %v3030_v36 = vmax.f32 %v2877_v24, 0.0  ;;  %4525 = vmatmul.mubr.bf16.vlgmr.msra.gmra.mxu1 %v3598_v5  ;;  %v3101_v52 = vpack.c.bf16 %v3029_v33, %v3027_v12  ;;  %v3537_v8 = vmax.f32 %v3295_v6, 0.0  ;;  %v2881_v20 = vadd.f32 %v2880_v44, %v2528_v38 }
 0x30f   : > { %v2882_v25 = vpop.f32.mrf.mxu1  ;;  %v3297_v58 = vpop.f32.mrf.mxu0 }
 0x310   : > { %v3102_v19 = vpack.c.bf16 %v3030_v36, %v3028_v17  ;;  %v3298_v59 = vadd.f32 %v6640_v21, %v3297_v58  ;;  %v2883_v46 = vadd.f32 %v2882_v25, %v2530_v31  ;;  %v3031_v10 = vmax.f32 %v2881_v20, 0.0 }
 0x311   : > { %v2884_v61 = vpop.f32.mrf.mxu1  ;;  %v3299_v48 = vpop.f32.mrf.mxu0 }
 0x312   : > { %v3538_v34 = vmax.f32 %v3298_v59, 0.0  ;;  %v2885_v35 = vadd.f32 %v2884_v61, %v2532_v32  ;;  %3492 = vmatprep.mubr.bf16.mxu0 %v3102_v19  ;;  %v3032_v51 = vmax.f32 %v2883_v46, 0.0  ;;  %v2550_v32 = vadd.f32 %v6597_v22, %v6217_v26 }
 0x313   : > { %v2886_v60 = vpop.f32.mrf.mxu1  ;;  %v3302_v54 = vpop.f32.mrf.mxu0  ;;  %3493 = vmatmul.mubr.bf16.gmra.mxu0 %v3101_v52  ;;  %v2552_v19 = vadd.f32 %v6601_v41, %v6207_v9  ;;  %v2554_v52 = vadd.f32 %v6609_v7, %v6217_v26 }
 0x314   : > { %v3599_v39 = vpack.c.bf16 %v3538_v34, %v3537_v8  ;;  %v2887_v53 = vadd.f32 %v2886_v60, %v2534_v1  ;;  %v3033_v40 = vmax.f32 %v2885_v35, 0.0  ;;  %v3303_v13 = vadd.f32 %v6640_v21, %v3302_v54 }
 0x315   : > { %v2890_v55 = vpop.f32.mrf.mxu1  ;;  %v3304_v14 = vpop.f32.mrf.mxu0  ;;  %v2548_v1 = vadd.f32 %v6589_v56, %v6207_v9 }
 0x316   : > { %v3034_v42 = vmax.f32 %v2887_v53, 0.0  ;;  %4528 = vmatprep.mubr.bf16.mxu1 %v3599_v39  ;;  %v3103_v11 = vpack.c.bf16 %v3033_v40, %v3031_v10  ;;  %v3539_v2 = vmax.f32 %v3303_v13, 0.0  ;;  %v2891_v45 = vadd.f32 %v2890_v55, %v2538_v37 }
 0x317   : > { %v2892_v0 = vpop.f32.mrf.mxu1  ;;  %v3305_v63 = vpop.f32.mrf.mxu0  ;;  %v2560_v10 = vadd.f32 %v6621_v47, %v6217_v26 }
 0x318   : > { %v3104_v4 = vpack.c.bf16 %v3034_v42, %v3032_v51  ;;  %v3306_v28 = vadd.f32 %v6640_v21, %v3305_v63  ;;  %v2893_v30 = vadd.f32 %v2892_v0, %v2540_v15  ;;  %v3035_v25 = vmax.f32 %v2891_v45, 0.0 }
 0x319   : > { %v2894_v29 = vpop.f32.mrf.mxu1  ;;  %v3307_v57 = vpop.f32.mrf.mxu0  ;;  %v2562_v0 = vadd.f32 %v6625_v3, %v6207_v9 }
 0x31a   : > { %v3540_v5 = vmax.f32 %v3306_v28, 0.0  ;;  %v2895_v24 = vadd.f32 %v2894_v29, %v2542_v23  ;;  %3500 = vmatprep.mubr.bf16.mxu0 %v3104_v4  ;;  %v3036_v6 = vmax.f32 %v2893_v30, 0.0  ;;  %v2558_v23 = vadd.f32 %v6613_v18, %v6207_v9 }
 0x31b   : > { %v2896_v33 = vpop.f32.mrf.mxu1  ;;  %v3310_v62 = vpop.f32.mrf.mxu0  ;;  %3501 = vmatmul.mubr.bf16.gmra.mxu0 %v3103_v11  ;;  %v2564_v4 = vadd.f32 %v6633_v50, %v6217_v26 }
 0x31c   : > { %v3600_v44 = vpack.c.bf16 %v3540_v5, %v3539_v2  ;;  %v2897_v49 = vadd.f32 %v2896_v33, %v2544_v16  ;;  %v3037_v17 = vmax.f32 %v2895_v24, 0.0  ;;  %v3311_v43 = vadd.f32 %v6640_v21, %v3310_v62 }
 0x31d   : > { %v2900_v36 = vpop.f32.mrf.mxu1  ;;  %v3312_v27 = vpop.f32.mrf.mxu0 }
 0x31e   : > { %v3038_v12 = vmax.f32 %v2897_v49, 0.0  ;;  %4529 = vmatmul.mubr.bf16.gmra.mxu1 %v3600_v44  ;;  %v3105_v61 = vpack.c.bf16 %v3037_v17, %v3035_v25  ;;  %v3541_v46 = vmax.f32 %v3311_v43, 0.0  ;;  %v2901_v22 = vadd.f32 %v2900_v36, %v2548_v1 }
 0x31f   : > { %v2902_v58 = vpop.f32.mrf.mxu1  ;;  %v3313_v31 = vpop.f32.mrf.mxu0 }
 0x320   : > { %v3106_v59 = vpack.c.bf16 %v3038_v12, %v3036_v6  ;;  %v3314_v38 = vadd.f32 %v6640_v21, %v3313_v31  ;;  %v2903_v34 = vadd.f32 %v2902_v58, %v2550_v32  ;;  %v3039_v51 = vmax.f32 %v2901_v22, 0.0 }
 0x321   : > { %v2904_v48 = vpop.f32.mrf.mxu1  ;;  %v3315_v8 = vpop.f32.mrf.mxu0 }
 0x322   : > { %v3542_v35 = vmax.f32 %v3314_v38, 0.0  ;;  %v2905_v20 = vadd.f32 %v2904_v48, %v2552_v19  ;;  %3508 = vmatprep.mubr.bf16.mxu0 %v3106_v59  ;;  %v3040_v55 = vmax.f32 %v2903_v34, 0.0 }
 0x323   : > { %v2906_v60 = vpop.f32.mrf.mxu1  ;;  %v3318_v41 = vpop.f32.mrf.mxu0  ;;  %3509 = vmatmul.mubr.bf16.gmra.mxu0 %v3105_v61 }
 0x324   : > { %v3601_v54 = vpack.c.bf16 %v3542_v35, %v3541_v46  ;;  %v2907_v39 = vadd.f32 %v2906_v60, %v2554_v52  ;;  %v3041_v53 = vmax.f32 %v2905_v20, 0.0  ;;  %v3319_v7 = vadd.f32 %v6640_v21, %v3318_v41 }
 0x325   : > { %v2910_v40 = vpop.f32.mrf.mxu1  ;;  %v3320_v56 = vpop.f32.mrf.mxu0 }
 0x326   : > { %v3042_v14 = vmax.f32 %v2907_v39, 0.0  ;;  %4532 = vmatprep.mubr.bf16.mxu1 %v3601_v54  ;;  %v3107_v28 = vpack.c.bf16 %v3041_v53, %v3039_v51  ;;  %v3543_v11 = vmax.f32 %v3319_v7, 0.0  ;;  %v2911_v47 = vadd.f32 %v2910_v40, %v2558_v23 }
 0x327   : > { %v2912_v42 = vpop.f32.mrf.mxu1  ;;  %v3321_v13 = vpop.f32.mrf.mxu0 }
 0x328   : > { %v3108_v63 = vpack.c.bf16 %v3042_v14, %v3040_v55  ;;  %v3322_v15 = vadd.f32 %v6640_v21, %v3321_v13  ;;  %v2913_v29 = vadd.f32 %v2912_v42, %v2560_v10  ;;  %v3043_v50 = vmax.f32 %v2911_v47, 0.0 }
 0x329   : > { %v2914_v37 = vpop.f32.mrf.mxu1  ;;  %v3323_v16 = vpop.f32.mrf.mxu0 }
 0x32a   : > { %v3544_v57 = vmax.f32 %v3322_v15, 0.0  ;;  %v2915_v2 = vadd.f32 %v2914_v37, %v2562_v0  ;;  %3516 = vmatprep.mubr.bf16.mxu0 %v3108_v63  ;;  %v3044_v9 = vmax.f32 %v2913_v29, 0.0 }
 0x32b   : > { %v2916_v30 = vpop.f32.mrf.mxu1  ;;  %v3326_v3 = vpop.f32.mrf.mxu0  ;;  %3517 = vmatmul.mubr.bf16.gmra.mxu0 %v3107_v28 }
 0x32c   : > { %v3602_v5 = vpack.c.bf16 %v3544_v57, %v3543_v11  ;;  %v2917_v24 = vadd.f32 %v2916_v30, %v2564_v4  ;;  %v3045_v45 = vmax.f32 %v2915_v2, 0.0  ;;  %v3327_v26 = vadd.f32 %v6640_v21, %v3326_v3 }
 0x32d   : > { %v3328_v33 = vpop.f32.mrf.mxu0 }
 0x32e   : > { %v3046_v18 = vmax.f32 %v2917_v24, 0.0  ;;  %4533 = vmatmul.mubr.bf16.gmra.mxu1 %v3602_v5  ;;  %v3109_v17 = vpack.c.bf16 %v3045_v45, %v3043_v50  ;;  %v3545_v27 = vmax.f32 %v3327_v26, 0.0 }
 0x32f   : > { %v3329_v62 = vpop.f32.mrf.mxu0 }
 0x330   : > { %v3110_v44 = vpack.c.bf16 %v3046_v18, %v3044_v9  ;;  %v3330_v49 = vadd.f32 %v6640_v21, %v3329_v62 }
 0x331   : > { %v3331_v36 = vpop.f32.mrf.mxu0 }
 0x332   : > { %v3546_v6 = vmax.f32 %v3330_v49, 0.0  ;;  %3524 = vmatprep.mubr.bf16.mxu0 %v3110_v44 }
 0x333   : > { %v3334_v12 = vpop.f32.mrf.mxu0  ;;  %3525 = vmatmul.mubr.bf16.gmra.mxu0 %v3109_v17 }
 0x334   : > { %v3603_v43 = vpack.c.bf16 %v3546_v6, %v3545_v27  ;;  %v3335_v58 = vadd.f32 %v6640_v21, %v3334_v12 }
 0x335   : > { %v3336_v25 = vpop.f32.mrf.mxu0 }
 0x336   : > { %4536 = vmatprep.mubr.bf16.mxu1 %v3603_v43  ;;  %v3547_v59 = vmax.f32 %v3335_v58, 0.0 }
 0x337   : > { %v3337_v31 = vpop.f32.mrf.mxu0 }
 0x338   : > { %v3338_v32 = vadd.f32 %v6640_v21, %v3337_v31 }
 0x339   : > { %v3339_v19 = vpop.f32.mrf.mxu0 }
 0x33a   : > { %v3548_v38 = vmax.f32 %v3338_v32, 0.0 }
 0x33b   : > { %v3342_v1 = vpop.f32.mrf.mxu0 }
 0x33c   : > { %v3604_v52 = vpack.c.bf16 %v3548_v38, %v3547_v59  ;;  %v3343_v48 = vadd.f32 %v6640_v21, %v3342_v1 }
 0x33d   : > { %v3344_v61 = vpop.f32.mrf.mxu0 }
 0x33e   : > { %4537 = vmatmul.mubr.bf16.gmra.mxu1 %v3604_v52  ;;  %v3549_v35 = vmax.f32 %v3343_v48, 0.0 }
 0x33f   : > { %v3345_v8 = vpop.f32.mrf.mxu0 }
 0x340   : > { %v3346_v46 = vadd.f32 %v6640_v21, %v3345_v8 }
 0x341   : > { %v3347_v34 = vpop.f32.mrf.mxu0 }
 0x342   : > { %v3550_v20 = vmax.f32 %v3346_v46, 0.0 }
 0x343   : > { %v3350_v22 = vpop.f32.mrf.mxu0 }
 0x344   : > { %v3605_v60 = vpack.c.bf16 %v3550_v20, %v3549_v35  ;;  %v3351_v54 = vadd.f32 %v6640_v21, %v3350_v22 }
 0x345   : > { %v3352_v41 = vpop.f32.mrf.mxu0 }
 0x346   : > { %4540 = vmatprep.mubr.bf16.mxu1 %v3605_v60  ;;  %v3551_v56 = vmax.f32 %v3351_v54, 0.0 }
 0x347   : > { %v3353_v39 = vpop.f32.mrf.mxu0 }
 0x348   : > { %v3354_v53 = vadd.f32 %v6640_v21, %v3353_v39 }
 0x349   : > { %v3355_v40 = vpop.f32.mrf.mxu0 }
 0x34a   : > { %v3552_v55 = vmax.f32 %v3354_v53, 0.0 }
 0x34b   : > { %v3358_v14 = vpop.f32.mrf.mxu0 }
 0x34c   : > { %v3606_v7 = vpack.c.bf16 %v3552_v55, %v3551_v56  ;;  %v3359_v42 = vadd.f32 %v6640_v21, %v3358_v14 }
 0x34d   : > { %v3360_v51 = vpop.f32.mrf.mxu0 }
 0x34e   : > { %4541 = vmatmul.mubr.bf16.gmra.mxu1 %v3606_v7  ;;  %v3553_v63 = vmax.f32 %v3359_v42, 0.0 }
 0x34f   : > { %v3361_v13 = vpop.f32.mrf.mxu0 }
 0x350   : > { %v3362_v10 = vadd.f32 %v6640_v21, %v3361_v13 }
 0x351   : > { %v3363_v0 = vpop.f32.mrf.mxu0 }
 0x352   : > { %v3554_v15 = vmax.f32 %v3362_v10, 0.0 }
 0x353   : > { %v3366_v23 = vpop.f32.mrf.mxu0 }
 0x354   : > { %v3607_v4 = vpack.c.bf16 %v3554_v15, %v3553_v63  ;;  %v3367_v37 = vadd.f32 %v6640_v21, %v3366_v23 }
 0x355   : > { %v3368_v28 = vpop.f32.mrf.mxu0 }
 0x356   : > { %4544 = vmatprep.mubr.bf16.mxu1 %v3607_v4  ;;  %v3555_v57 = vmax.f32 %v3367_v37, 0.0 }
 0x357   : > { %v3369_v16 = vpop.f32.mrf.mxu0 }
 0x358   : > { %v3370_v11 = vadd.f32 %v6640_v21, %v3369_v16 }
 0x359   : > { %v3371_v29 = vpop.f32.mrf.mxu0 }
 0x35a   : > { %v3556_v2 = vmax.f32 %v3370_v11, 0.0 }
 0x35b   : > { %v3374_v47 = vpop.f32.mrf.mxu0 }
 0x35c   : > { %v3608_v30 = vpack.c.bf16 %v3556_v2, %v3555_v57  ;;  %v3375_v5 = vadd.f32 %v6640_v21, %v3374_v47 }
 0x35d   : > { %v3376_v3 = vpop.f32.mrf.mxu0 }
 0x35e   : > { %4545 = vmatmul.mubr.bf16.gmra.mxu1 %v3608_v30  ;;  %v3557_v9 = vmax.f32 %v3375_v5, 0.0 }
 0x35f   : > { %v3377_v24 = vpop.f32.mrf.mxu0 }
 0x360   : > { %v3378_v45 = vadd.f32 %v6640_v21, %v3377_v24 }
 0x361   : > { %v3379_v33 = vpop.f32.mrf.mxu0 }
 0x362   : > { %v3558_v18 = vmax.f32 %v3378_v45, 0.0 }
 0x363   : > { %v3382_v26 = vpop.f32.mrf.mxu0 }
 0x364   : > { %v3609_v50 = vpack.c.bf16 %v3558_v18, %v3557_v9  ;;  %v3383_v44 = vadd.f32 %v6640_v21, %v3382_v26 }
 0x365   : > { %v3384_v62 = vpop.f32.mrf.mxu0 }
 0x366   : > { %4548 = vmatprep.mubr.bf16.mxu1 %v3609_v50  ;;  %v3559_v27 = vmax.f32 %v3383_v44, 0.0 }
 0x367   : > { %v3385_v49 = vpop.f32.mrf.mxu0 }
 0x368   : > { %v3386_v17 = vadd.f32 %v6640_v21, %v3385_v49 }
 0x369   : > { %v3387_v36 = vpop.f32.mrf.mxu0 }
 0x36a   : > { %v3560_v6 = vmax.f32 %v3386_v17, 0.0 }
 0x36b   : > { %v3390_v12 = vpop.f32.mrf.mxu0 }
 0x36c   : > { %v3610_v43 = vpack.c.bf16 %v3560_v6, %v3559_v27  ;;  %v3391_v58 = vadd.f32 %v6640_v21, %v3390_v12 }
 0x36d   : > { %v3392_v25 = vpop.f32.mrf.mxu0 }
 0x36e   : > { %4549 = vmatmul.mubr.bf16.gmra.mxu1 %v3610_v43  ;;  %v3561_v59 = vmax.f32 %v3391_v58, 0.0 }
 0x36f   : > { %v3393_v31 = vpop.f32.mrf.mxu0 }
 0x370   : > { %v3394_v32 = vadd.f32 %v6640_v21, %v3393_v31 }
 0x371   : > { %v3395_v19 = vpop.f32.mrf.mxu0 }
 0x372   : > { %v3562_v38 = vmax.f32 %v3394_v32, 0.0 }
 0x373   : > { %v3398_v1 = vpop.f32.mrf.mxu0 }
 0x374   : > { %v3611_v52 = vpack.c.bf16 %v3562_v38, %v3561_v59  ;;  %v3399_v48 = vadd.f32 %v6640_v21, %v3398_v1 }
 0x375   : > { %v3400_v61 = vpop.f32.mrf.mxu0 }
 0x376   : > { %4552 = vmatprep.mubr.bf16.mxu1 %v3611_v52  ;;  %v3563_v35 = vmax.f32 %v3399_v48, 0.0 }
 0x377   : > { %v3401_v8 = vpop.f32.mrf.mxu0 }
 0x378   : > { %v3402_v46 = vadd.f32 %v6640_v21, %v3401_v8 }
 0x379   : > { %v3403_v34 = vpop.f32.mrf.mxu0 }
 0x37a   : > { %v3564_v20 = vmax.f32 %v3402_v46, 0.0 }
 0x37b   : > { %v3406_v22 = vpop.f32.mrf.mxu0 }
 0x37c   : > { %v3612_v60 = vpack.c.bf16 %v3564_v20, %v3563_v35  ;;  %v3407_v54 = vadd.f32 %v6640_v21, %v3406_v22 }
 0x37d   : > { %v3408_v41 = vpop.f32.mrf.mxu0 }
 0x37e   : > { %4553 = vmatmul.mubr.bf16.gmra.mxu1 %v3612_v60  ;;  %v3565_v56 = vmax.f32 %v3407_v54, 0.0 }
 0x37f   : > { %v3409_v39 = vpop.f32.mrf.mxu0 }
 0x380   : > { %v3410_v53 = vadd.f32 %v6640_v21, %v3409_v39 }
 0x381   : > { %v3411_v40 = vpop.f32.mrf.mxu0 }
 0x382   : > { %v3566_v55 = vmax.f32 %v3410_v53, 0.0 }
 0x383   : > { %v3414_v14 = vpop.f32.mrf.mxu0 }
 0x384   : > { %v3613_v7 = vpack.c.bf16 %v3566_v55, %v3565_v56  ;;  %v3415_v42 = vadd.f32 %v6640_v21, %v3414_v14 }
 0x385   : > { %v3416_v51 = vpop.f32.mrf.mxu0 }
 0x386   : > { %4556 = vmatprep.mubr.bf16.mxu1 %v3613_v7  ;;  %v3567_v63 = vmax.f32 %v3415_v42, 0.0 }
 0x387   : > { %v3417_v13 = vpop.f32.mrf.mxu0 }
 0x388   : > { %v3418_v10 = vadd.f32 %v6640_v21, %v3417_v13 }
 0x389   : > { %v3419_v0 = vpop.f32.mrf.mxu0 }
 0x38a   : > { %v3568_v15 = vmax.f32 %v3418_v10, 0.0 }
 0x38b   : > { %v3422_v23 = vpop.f32.mrf.mxu0 }
 0x38c   : > { %v3614_v4 = vpack.c.bf16 %v3568_v15, %v3567_v63  ;;  %v3423_v37 = vadd.f32 %v6640_v21, %v3422_v23 }
 0x38d   : > { %v3424_v28 = vpop.f32.mrf.mxu0 }
 0x38e   : > { %4557 = vmatmul.mubr.bf16.gmra.mxu1 %v3614_v4  ;;  %v3569_v57 = vmax.f32 %v3423_v37, 0.0 }
 0x38f   : > { %v3425_v16 = vpop.f32.mrf.mxu0 }
 0x390   : > { %v3426_v11 = vadd.f32 %v6640_v21, %v3425_v16 }
 0x391   : > { %v3427_v29 = vpop.f32.mrf.mxu0 }
 0x392   : > { %v3570_v2 = vmax.f32 %v3426_v11, 0.0 }
 0x393   : > { %v3430_v47 = vpop.f32.mrf.mxu0 }
 0x394   : > { %v3615_v30 = vpack.c.bf16 %v3570_v2, %v3569_v57  ;;  %v3431_v5 = vadd.f32 %v6640_v21, %v3430_v47 }
 0x395   : > { %v3432_v3 = vpop.f32.mrf.mxu0 }
 0x396   : > { %4560 = vmatprep.mubr.bf16.mxu1 %v3615_v30  ;;  %v3571_v9 = vmax.f32 %v3431_v5, 0.0  ;;  %v6745_v3 = vld [vmem:[%s7035_s5 + $0x3] ss:$0 sm:$0xff] }
 0x397   : > { %v3433_v24 = vpop.f32.mrf.mxu0 }
 0x398   : > { %v3434_v45 = vadd.f32 %v6640_v21, %v3433_v24 }
 0x399   : > { %v3435_v33 = vpop.f32.mrf.mxu0 }
 0x39a   : > { %v3572_v18 = vmax.f32 %v3434_v45, 0.0  ;;  %v7155_v33 = vlaneseq }
 0x39b   : > { %v3438_v26 = vpop.f32.mrf.mxu0 }
 0x39c   : > { %v3616_v50 = vpack.c.bf16 %v3572_v18, %v3571_v9  ;;  %v3439_v44 = vadd.f32 %v6640_v21, %v3438_v26  ;;  %v6749_v9 = vand.u32 127, %v7155_v33 }
 0x39d   : > { %v3440_v62 = vpop.f32.mrf.mxu0 }
 0x39e   : > { %4561 = vmatmul.mubr.bf16.gmra.mxu1 %v3616_v50  ;;  %v3573_v27 = vmax.f32 %v3439_v44, 0.0  ;;  %vm3989_vm0 = vcmp.ge.s32.totalorder %v6749_v9, 4 }
 0x39f   : > { %v3441_v49 = vpop.f32.mrf.mxu0 }
 0x3a0   : > { %v3442_v17 = vadd.f32 %v6640_v21, %v3441_v49 }
 0x3a1   : > { %v3443_v36 = vpop.f32.mrf.mxu0 }
 0x3a2   : > { %v3574_v6 = vmax.f32 %v3442_v17, 0.0 }
 0x3a3   : > { %v3446_v12 = vpop.f32.mrf.mxu0 }
 0x3a4   : > { %v3617_v43 = vpack.c.bf16 %v3574_v6, %v3573_v27  ;;  %v3447_v58 = vadd.f32 %v6640_v21, %v3446_v12 }
 0x3a5   : > { %v3448_v25 = vpop.f32.mrf.mxu0 }
 0x3a6   : > { %4564 = vmatprep.mubr.bf16.mxu1 %v3617_v43  ;;  %v3575_v59 = vmax.f32 %v3447_v58, 0.0 }
 0x3a7   : > { %v3449_v31 = vpop.f32.mrf.mxu0 }
 0x3a8   : > { %v3450_v32 = vadd.f32 %v6640_v21, %v3449_v31 }
 0x3a9   : > { %v3451_v19 = vpop.f32.mrf.mxu0 }
 0x3aa   : > { %v3576_v38 = vmax.f32 %v3450_v32, 0.0 }
 0x3ab   : > { %v3454_v1 = vpop.f32.mrf.mxu0 }
 0x3ac   : > { %v3618_v52 = vpack.c.bf16 %v3576_v38, %v3575_v59  ;;  %v3455_v48 = vadd.f32 %v6640_v21, %v3454_v1 }
 0x3ad   : > { %v3456_v61 = vpop.f32.mrf.mxu0 }
 0x3ae   : > { %4565 = vmatmul.mubr.bf16.gmra.mxu1 %v3618_v52  ;;  %v3577_v35 = vmax.f32 %v3455_v48, 0.0 }
 0x3af   : > { %v3457_v8 = vpop.f32.mrf.mxu0 }
 0x3b0   : > { %v3458_v46 = vadd.f32 %v6640_v21, %v3457_v8 }
 0x3b1   : > { %v3459_v34 = vpop.f32.mrf.mxu0 }
 0x3b2   : > { %v3578_v20 = vmax.f32 %v3458_v46, 0.0 }
 0x3b3   : > { %v3462_v22 = vpop.f32.mrf.mxu0 }
 0x3b4   : > { %v3619_v60 = vpack.c.bf16 %v3578_v20, %v3577_v35  ;;  %v3463_v54 = vadd.f32 %v6640_v21, %v3462_v22 }
 0x3b5   : > { %v3464_v41 = vpop.f32.mrf.mxu0 }
 0x3b6   : > { %4568 = vmatprep.mubr.bf16.mxu1 %v3619_v60  ;;  %v3579_v56 = vmax.f32 %v3463_v54, 0.0 }
 0x3b7   : > { %v3465_v39 = vpop.f32.mrf.mxu0 }
 0x3b8   : > { %v3466_v53 = vadd.f32 %v6640_v21, %v3465_v39 }
 0x3b9   : > { %v3467_v40 = vpop.f32.mrf.mxu0 }
 0x3ba   : > { %v3580_v55 = vmax.f32 %v3466_v53, 0.0 }
 0x3bb   : > { %v3470_v14 = vpop.f32.mrf.mxu0 }
 0x3bc   : > { %v3620_v7 = vpack.c.bf16 %v3580_v55, %v3579_v56  ;;  %v3471_v42 = vadd.f32 %v6640_v21, %v3470_v14 }
 0x3bd   : > { %v3472_v51 = vpop.f32.mrf.mxu0 }
 0x3be   : > { %4569 = vmatmul.mubr.bf16.gmra.mxu1 %v3620_v7  ;;  %v3581_v63 = vmax.f32 %v3471_v42, 0.0 }
 0x3bf   : > { %v3473_v13 = vpop.f32.mrf.mxu0 }
 0x3c0   : > { %v3474_v10 = vadd.f32 %v6640_v21, %v3473_v13 }
 0x3c1   : > { %v3475_v0 = vpop.f32.mrf.mxu0 }
 0x3c2   : > { %v3582_v15 = vmax.f32 %v3474_v10, 0.0 }
 0x3c3   : > { %v3478_v23 = vpop.f32.mrf.mxu0 }
 0x3c4   : > { %v3621_v4 = vpack.c.bf16 %v3582_v15, %v3581_v63  ;;  %v3479_v37 = vadd.f32 %v6640_v21, %v3478_v23 }
 0x3c5   : > { %v3480_v28 = vpop.f32.mrf.mxu0 }
 0x3c6   : > { %4572 = vmatprep.mubr.bf16.mxu1 %v3621_v4  ;;  %v3583_v57 = vmax.f32 %v3479_v37, 0.0 }
 0x3c7   : > { %v3481_v16 = vpop.f32.mrf.mxu0 }
 0x3c8   : > { %v3482_v11 = vadd.f32 %v6640_v21, %v3481_v16 }
 0x3c9   : > { %v3483_v29 = vpop.f32.mrf.mxu0 }
 0x3ca   : > { %v3584_v2 = vmax.f32 %v3482_v11, 0.0 }
 0x3cb   : > { %v3486_v47 = vpop.f32.mrf.mxu0 }
 0x3cc   : > { %v3622_v30 = vpack.c.bf16 %v3584_v2, %v3583_v57  ;;  %v3487_v24 = vadd.f32 %v6640_v21, %v3486_v47 }
 0x3cd   : > { %v3488_v5 = vpop.f32.mrf.mxu0 }
 0x3ce   : > { %v4526_v45 = vpop.f32.mrf.mxu1  ;;  %4573 = vmatmul.mubr.bf16.gmra.mxu1 %v3622_v30  ;;  %v3585_v36 = vmax.f32 %v3487_v24, 0.0 }
 0x3cf   : > { %v3741_v18 = vadd.f32 %v4526_v45, %v6745_v3  ;;  %v3489_v26 = vpop.f32.mrf.mxu0 }
 0x3d0   : > { %v3490_v50 = vadd.f32 %v6640_v21, %v3489_v26  ;;  %v3732_v62 = vpop.f32.mrf.mxu1 }
 0x3d1   : > { %v3992_v44 = vmax.f32 %v3741_v18, -20.0  ;;  %v3733_v49 = vadd.f32 %v6745_v3, %v3732_v62  ;;  %v3491_v17 = vpop.f32.mrf.mxu0 }
 0x3d2   : > { %v3586_v27 = vmax.f32 %v3490_v50, 0.0  ;;  %v4527_v6 = vpop.f32.mrf.mxu1 }
 0x3d3   : > { %v4056_v12 = vmin.f32 %v3992_v44, 2.0  ;;  %v3990_v43 = vmax.f32 %v3733_v49, -20.0  ;;  %v3744_v25 = vadd.f32 %v4527_v6, %v6745_v3  ;;  %v3494_v58 = vpop.f32.mrf.mxu0 }
 0x3d4   : > { %v3623_v31 = vpack.c.bf16 %v3586_v27, %v3585_v36  ;;  %v3735_v32 = vpop.f32.mrf.mxu1  ;;  %v3495_v61 = vadd.f32 %v6640_v21, %v3494_v58 }
 0x3d5   : > { %v4120_v19 = vsel %vm3989_vm0, %v4056_v12, %v3741_v18  ;;  %v4054_v59 = vmin.f32 %v3990_v43, 2.0  ;;  %v3993_v38 = vmax.f32 %v3744_v25, -20.0  ;;  %v3736_v1 = vadd.f32 %v6745_v3, %v3735_v32  ;;  %v3496_v52 = vpop.f32.mrf.mxu0 }
 0x3d6   : > { %4184 = vst [vmem:[%s6759_s23 + $0x10] sm:$0xff] %v4120_v19  ;;  %4576 = vmatprep.mubr.bf16.mxu1 %v3623_v31  ;;  %v3587_v41 = vmax.f32 %v3495_v61, 0.0 }
 0x3d7   : > { %v4118_v48 = vsel %vm3989_vm0, %v4054_v59, %v3733_v49  ;;  %v4057_v8 = vmin.f32 %v3993_v38, 2.0  ;;  %v3991_v46 = vmax.f32 %v3736_v1, -20.0  ;;  %v3497_v34 = vpop.f32.mrf.mxu0 }
 0x3d8   : > { %4182 = vst [vmem:[%s6759_s23] sm:$0xff] %v4118_v48  ;;  %v3498_v35 = vadd.f32 %v6640_v21, %v3497_v34 }
 0x3d9   : > { %v4121_v20 = vsel %vm3989_vm0, %v4057_v8, %v3744_v25  ;;  %v4055_v22 = vmin.f32 %v3991_v46, 2.0  ;;  %v3499_v60 = vpop.f32.mrf.mxu0 }
 0x3da   : > { %4185 = vst [vmem:[%s6759_s23 + $0x18] sm:$0xff] %v4121_v20  ;;  %v3588_v54 = vmax.f32 %v3498_v35, 0.0 }
 0x3db   : > { %v4119_v39 = vsel %vm3989_vm0, %v4055_v22, %v3736_v1  ;;  %v3502_v53 = vpop.f32.mrf.mxu0 }
 0x3dc   : > { %4183 = vst [vmem:[%s6759_s23 + $0x8] sm:$0xff] %v4119_v39  ;;  %v3624_v40 = vpack.c.bf16 %v3588_v54, %v3587_v41  ;;  %v3503_v55 = vadd.f32 %v6640_v21, %v3502_v53 }
 0x3dd   : > { %v3504_v56 = vpop.f32.mrf.mxu0 }
 0x3de   : > { %v4530_v14 = vpop.f32.mrf.mxu1  ;;  %4577 = vmatmul.mubr.bf16.gmra.mxu1 %v3624_v40  ;;  %v3589_v15 = vmax.f32 %v3503_v55, 0.0 }
 0x3df   : > { %v3757_v7 = vadd.f32 %v4530_v14, %v6745_v3  ;;  %v3505_v51 = vpop.f32.mrf.mxu0 }
 0x3e0   : > { %v3506_v42 = vadd.f32 %v6640_v21, %v3505_v51  ;;  %v3748_v13 = vpop.f32.mrf.mxu1 }
 0x3e1   : > { %v3996_v10 = vmax.f32 %v3757_v7, -20.0  ;;  %v3749_v0 = vadd.f32 %v6745_v3, %v3748_v13  ;;  %v3507_v63 = vpop.f32.mrf.mxu0  ;;  %v4821_v13 = vld [vmem:[%s7035_s5 + $0x2] ss:$0 sm:$0xff] }
 0x3e2   : > { %v3590_v23 = vmax.f32 %v3506_v42, 0.0  ;;  %v4531_v4 = vpop.f32.mrf.mxu1 }
 0x3e3   : > { %v4060_v28 = vmin.f32 %v3996_v10, 2.0  ;;  %v3994_v37 = vmax.f32 %v3749_v0, -20.0  ;;  %v3760_v16 = vadd.f32 %v4531_v4, %v6745_v3  ;;  %v3510_v11 = vpop.f32.mrf.mxu0 }
 0x3e4   : > { %v3625_v29 = vpack.c.bf16 %v3590_v23, %v3589_v15  ;;  %v3751_v57 = vpop.f32.mrf.mxu1  ;;  %v3511_v45 = vadd.f32 %v6640_v21, %v3510_v11 }
 0x3e5   : > { %v4124_v2 = vsel %vm3989_vm0, %v4060_v28, %v3757_v7  ;;  %v4058_v47 = vmin.f32 %v3994_v37, 2.0  ;;  %v3997_v30 = vmax.f32 %v3760_v16, -20.0  ;;  %v3752_v5 = vadd.f32 %v6745_v3, %v3751_v57  ;;  %v3512_v24 = vpop.f32.mrf.mxu0 }
 0x3e6   : > { %4188 = vst [vmem:[%s6759_s23 + $0x30] sm:$0xff] %v4124_v2  ;;  %4580 = vmatprep.mubr.bf16.mxu1 %v3625_v29  ;;  %v3591_v36 = vmax.f32 %v3511_v45, 0.0 }
 0x3e7   : > { %v4122_v33 = vsel %vm3989_vm0, %v4058_v47, %v3749_v0  ;;  %v4061_v18 = vmin.f32 %v3997_v30, 2.0  ;;  %v3995_v26 = vmax.f32 %v3752_v5, -20.0  ;;  %v3513_v50 = vpop.f32.mrf.mxu0 }
 0x3e8   : > { %4186 = vst [vmem:[%s6759_s23 + $0x20] sm:$0xff] %v4122_v33  ;;  %v3514_v62 = vadd.f32 %v6640_v21, %v3513_v50 }
 0x3e9   : > { %v4125_v44 = vsel %vm3989_vm0, %v4061_v18, %v3760_v16  ;;  %v4059_v49 = vmin.f32 %v3995_v26, 2.0  ;;  %v3515_v17 = vpop.f32.mrf.mxu0 }
 0x3ea   : > { %4189 = vst [vmem:[%s6759_s23 + $0x38] sm:$0xff] %v4125_v44  ;;  %v3592_v27 = vmax.f32 %v3514_v62, 0.0 }
 0x3eb   : > { %v4123_v6 = vsel %vm3989_vm0, %v4059_v49, %v3752_v5  ;;  %v3518_v12 = vpop.f32.mrf.mxu0 }
 0x3ec   : > { %4187 = vst [vmem:[%s6759_s23 + $0x28] sm:$0xff] %v4123_v6  ;;  %v3626_v43 = vpack.c.bf16 %v3592_v27, %v3591_v36  ;;  %v3519_v58 = vadd.f32 %v6640_v21, %v3518_v12 }
 0x3ed   : > { %v3520_v25 = vpop.f32.mrf.mxu0 }
 0x3ee   : > { %v4534_v31 = vpop.f32.mrf.mxu1  ;;  %4581 = vmatmul.mubr.bf16.gmra.mxu1 %v3626_v43  ;;  %v3593_v48 = vmax.f32 %v3519_v58, 0.0 }
 0x3ef   : > { %v3773_v32 = vadd.f32 %v4534_v31, %v6745_v3  ;;  %v3521_v19 = vpop.f32.mrf.mxu0 }
 0x3f0   : > { %v3522_v59 = vadd.f32 %v6640_v21, %v3521_v19  ;;  %v3764_v38 = vpop.f32.mrf.mxu1 }
 0x3f1   : > { %v4000_v1 = vmax.f32 %v3773_v32, -20.0  ;;  %v3765_v52 = vadd.f32 %v6745_v3, %v3764_v38  ;;  %v3523_v61 = vpop.f32.mrf.mxu0 }
 0x3f2   : > { %v3594_v8 = vmax.f32 %v3522_v59, 0.0  ;;  %v4535_v46 = vpop.f32.mrf.mxu1 }
 0x3f3   : > { %v4064_v34 = vmin.f32 %v4000_v1, 2.0  ;;  %v3998_v35 = vmax.f32 %v3765_v52, -20.0  ;;  %v3776_v20 = vadd.f32 %v4535_v46, %v6745_v3  ;;  %v3526_v22 = vpop.f32.mrf.mxu0 }
 0x3f4   : > { %v3627_v60 = vpack.c.bf16 %v3594_v8, %v3593_v48  ;;  %v3767_v41 = vpop.f32.mrf.mxu1  ;;  %v3527_v55 = vadd.f32 %v6640_v21, %v3526_v22 }
 0x3f5   : > { %v4128_v54 = vsel %vm3989_vm0, %v4064_v34, %v3773_v32  ;;  %v4062_v39 = vmin.f32 %v3998_v35, 2.0  ;;  %v4001_v53 = vmax.f32 %v3776_v20, -20.0  ;;  %v3768_v40 = vadd.f32 %v6745_v3, %v3767_v41  ;;  %v3528_v56 = vpop.f32.mrf.mxu0 }
 0x3f6   : > { %4192 = vst [vmem:[%s6759_s23 + $0x50] sm:$0xff] %v4128_v54  ;;  %4584 = vmatprep.mubr.bf16.mxu1 %v3627_v60  ;;  %v3595_v21 = vmax.f32 %v3527_v55, 0.0 }
 0x3f7   : > { %v4126_v14 = vsel %vm3989_vm0, %v4062_v39, %v3765_v52  ;;  %v4065_v7 = vmin.f32 %v4001_v53, 2.0  ;;  %v3999_v51 = vmax.f32 %v3768_v40, -20.0  ;;  %v3529_v42 = vpop.f32.mrf.mxu0 }
 0x3f8   : > { %4190 = vst [vmem:[%s6759_s23 + $0x40] sm:$0xff] %v4126_v14  ;;  %v3530_v10 = vadd.f32 %v4821_v13, %v3529_v42 }
 0x3f9   : > { %v4129_v0 = vsel %vm3989_vm0, %v4065_v7, %v3776_v20  ;;  %v4063_v63 = vmin.f32 %v3999_v51, 2.0  ;;  %v3531_v15 = vpop.f32.mrf.mxu0 }
 0x3fa   : > { %4193 = vst [vmem:[%s6759_s23 + $0x58] sm:$0xff] %v4129_v0  ;;  %v3596_v23 = vmax.f32 %v3530_v10, 0.0 }
 0x3fb   : > { %v4127_v4 = vsel %vm3989_vm0, %v4063_v63, %v3768_v40 }
 0x3fc   : > { %4191 = vst [vmem:[%s6759_s23 + $0x48] sm:$0xff] %v4127_v4  ;;  %v3628_v28 = vpack.c.bf16 %v3596_v23, %v3595_v21 }
 0x3fe   : > { %v4538_v37 = vpop.f32.mrf.mxu1  ;;  %4585 = vmatmul.mubr.bf16.gmra.mxu1 %v3628_v28 }
 0x3ff   : > { %v3789_v16 = vadd.f32 %v4538_v37, %v6745_v3 }
 0x400   : > { %v3780_v11 = vpop.f32.mrf.mxu1 }
 0x401   : > { %v4004_v29 = vmax.f32 %v3789_v16, -20.0  ;;  %v3781_v57 = vadd.f32 %v6745_v3, %v3780_v11 }
 0x402   : > { %v4539_v2 = vpop.f32.mrf.mxu1 }
 0x403   : > { %v4068_v47 = vmin.f32 %v4004_v29, 2.0  ;;  %v4002_v30 = vmax.f32 %v3781_v57, -20.0  ;;  %v3792_v5 = vadd.f32 %v4539_v2, %v6745_v3 }
 0x404   : > { %v3783_v24 = vpop.f32.mrf.mxu1 }
 0x405   : > { %v4132_v45 = vsel %vm3989_vm0, %v4068_v47, %v3789_v16  ;;  %v4066_v33 = vmin.f32 %v4002_v30, 2.0  ;;  %v4005_v18 = vmax.f32 %v3792_v5, -20.0  ;;  %v3784_v26 = vadd.f32 %v6745_v3, %v3783_v24 }
 0x406   : > { %4196 = vst [vmem:[%s6759_s23 + $0x70] sm:$0xff] %v4132_v45 }
 0x407   : > { %v4130_v50 = vsel %vm3989_vm0, %v4066_v33, %v3781_v57  ;;  %v4069_v62 = vmin.f32 %v4005_v18, 2.0  ;;  %v4003_v44 = vmax.f32 %v3784_v26, -20.0 }
 0x408   : > { %4194 = vst [vmem:[%s6759_s23 + $0x60] sm:$0xff] %v4130_v50 }
 0x409   : > { %v4133_v49 = vsel %vm3989_vm0, %v4069_v62, %v3792_v5  ;;  %v4067_v17 = vmin.f32 %v4003_v44, 2.0 }
 0x40a   : > { %4197 = vst [vmem:[%s6759_s23 + $0x78] sm:$0xff] %v4133_v49 }
 0x40b   : > { %v4131_v36 = vsel %vm3989_vm0, %v4067_v17, %v3784_v26 }
 0x40c   : > { %4195 = vst [vmem:[%s6759_s23 + $0x68] sm:$0xff] %v4131_v36 }
 0x40e   : > { %v4542_v27 = vpop.f32.mrf.mxu1 }
 0x40f   : > { %v3805_v6 = vadd.f32 %v4542_v27, %v6745_v3 }
 0x410   : > { %v3796_v12 = vpop.f32.mrf.mxu1 }
 0x411   : > { %v4008_v43 = vmax.f32 %v3805_v6, -20.0  ;;  %v3797_v25 = vadd.f32 %v6745_v3, %v3796_v12 }
 0x412   : > { %v4543_v58 = vpop.f32.mrf.mxu1 }
 0x413   : > { %v4072_v31 = vmin.f32 %v4008_v43, 2.0  ;;  %v4006_v32 = vmax.f32 %v3797_v25, -20.0  ;;  %v3808_v19 = vadd.f32 %v4543_v58, %v6745_v3 }
 0x414   : > { %v3799_v59 = vpop.f32.mrf.mxu1 }
 0x415   : > { %v4136_v38 = vsel %vm3989_vm0, %v4072_v31, %v3805_v6  ;;  %v4070_v1 = vmin.f32 %v4006_v32, 2.0  ;;  %v4009_v52 = vmax.f32 %v3808_v19, -20.0  ;;  %v3800_v61 = vadd.f32 %v6745_v3, %v3799_v59 }
 0x416   : > { %4200 = vst [vmem:[%s6759_s23 + $0x90] sm:$0xff] %v4136_v38 }
 0x417   : > { %v4134_v48 = vsel %vm3989_vm0, %v4070_v1, %v3797_v25  ;;  %v4073_v8 = vmin.f32 %v4009_v52, 2.0  ;;  %v4007_v46 = vmax.f32 %v3800_v61, -20.0 }
 0x418   : > { %4198 = vst [vmem:[%s6759_s23 + $0x80] sm:$0xff] %v4134_v48 }
 0x419   : > { %v4137_v34 = vsel %vm3989_vm0, %v4073_v8, %v3808_v19  ;;  %v4071_v35 = vmin.f32 %v4007_v46, 2.0 }
 0x41a   : > { %4201 = vst [vmem:[%s6759_s23 + $0x98] sm:$0xff] %v4137_v34 }
 0x41b   : > { %v4135_v20 = vsel %vm3989_vm0, %v4071_v35, %v3800_v61 }
 0x41c   : > { %4199 = vst [vmem:[%s6759_s23 + $0x88] sm:$0xff] %v4135_v20 }
 0x41e   : > { %v4546_v22 = vpop.f32.mrf.mxu1 }
 0x41f   : > { %v3821_v60 = vadd.f32 %v4546_v22, %v6745_v3 }
 0x420   : > { %v3812_v41 = vpop.f32.mrf.mxu1 }
 0x421   : > { %v4012_v54 = vmax.f32 %v3821_v60, -20.0  ;;  %v3813_v39 = vadd.f32 %v6745_v3, %v3812_v41 }
 0x422   : > { %v4547_v53 = vpop.f32.mrf.mxu1 }
 0x423   : > { %v4076_v40 = vmin.f32 %v4012_v54, 2.0  ;;  %v4010_v56 = vmax.f32 %v3813_v39, -20.0  ;;  %v3824_v55 = vadd.f32 %v4547_v53, %v6745_v3 }
 0x424   : > { %v3815_v14 = vpop.f32.mrf.mxu1 }
 0x425   : > { %v4140_v7 = vsel %vm3989_vm0, %v4076_v40, %v3821_v60  ;;  %v4074_v51 = vmin.f32 %v4010_v56, 2.0  ;;  %v4013_v42 = vmax.f32 %v3824_v55, -20.0  ;;  %v3816_v13 = vadd.f32 %v6745_v3, %v3815_v14 }
 0x426   : > { %4204 = vst [vmem:[%s6759_s23 + $0xb0] sm:$0xff] %v4140_v7 }
 0x427   : > { %v4138_v10 = vsel %vm3989_vm0, %v4074_v51, %v3813_v39  ;;  %v4077_v0 = vmin.f32 %v4013_v42, 2.0  ;;  %v4011_v63 = vmax.f32 %v3816_v13, -20.0 }
 0x428   : > { %4202 = vst [vmem:[%s6759_s23 + $0xa0] sm:$0xff] %v4138_v10 }
 0x429   : > { %v4141_v15 = vsel %vm3989_vm0, %v4077_v0, %v3824_v55  ;;  %v4075_v21 = vmin.f32 %v4011_v63, 2.0 }
 0x42a   : > { %4205 = vst [vmem:[%s6759_s23 + $0xb8] sm:$0xff] %v4141_v15 }
 0x42b   : > { %v4139_v23 = vsel %vm3989_vm0, %v4075_v21, %v3816_v13 }
 0x42c   : > { %4203 = vst [vmem:[%s6759_s23 + $0xa8] sm:$0xff] %v4139_v23 }
 0x42e   : > { %v4550_v4 = vpop.f32.mrf.mxu1 }
 0x42f   : > { %v3837_v28 = vadd.f32 %v4550_v4, %v6745_v3 }
 0x430   : > { %v3828_v37 = vpop.f32.mrf.mxu1 }
 0x431   : > { %v4016_v16 = vmax.f32 %v3837_v28, -20.0  ;;  %v3829_v11 = vadd.f32 %v6745_v3, %v3828_v37 }
 0x432   : > { %v4551_v29 = vpop.f32.mrf.mxu1 }
 0x433   : > { %v4080_v57 = vmin.f32 %v4016_v16, 2.0  ;;  %v4014_v2 = vmax.f32 %v3829_v11, -20.0  ;;  %v3840_v47 = vadd.f32 %v4551_v29, %v6745_v3 }
 0x434   : > { %v3831_v30 = vpop.f32.mrf.mxu1 }
 0x435   : > { %v4144_v5 = vsel %vm3989_vm0, %v4080_v57, %v3837_v28  ;;  %v4078_v24 = vmin.f32 %v4014_v2, 2.0  ;;  %v4017_v45 = vmax.f32 %v3840_v47, -20.0  ;;  %v3832_v33 = vadd.f32 %v6745_v3, %v3831_v30 }
 0x436   : > { %4208 = vst [vmem:[%s6759_s23 + $0xd0] sm:$0xff] %v4144_v5 }
 0x437   : > { %v4142_v18 = vsel %vm3989_vm0, %v4078_v24, %v3829_v11  ;;  %v4081_v26 = vmin.f32 %v4017_v45, 2.0  ;;  %v4015_v50 = vmax.f32 %v3832_v33, -20.0 }
 0x438   : > { %4206 = vst [vmem:[%s6759_s23 + $0xc0] sm:$0xff] %v4142_v18 }
 0x439   : > { %v4145_v62 = vsel %vm3989_vm0, %v4081_v26, %v3840_v47  ;;  %v4079_v44 = vmin.f32 %v4015_v50, 2.0 }
 0x43a   : > { %4209 = vst [vmem:[%s6759_s23 + $0xd8] sm:$0xff] %v4145_v62 }
 0x43b   : > { %v4143_v49 = vsel %vm3989_vm0, %v4079_v44, %v3832_v33 }
 0x43c   : > { %4207 = vst [vmem:[%s6759_s23 + $0xc8] sm:$0xff] %v4143_v49 }
 0x43e   : > { %v4554_v17 = vpop.f32.mrf.mxu1 }
 0x43f   : > { %v3853_v36 = vadd.f32 %v4554_v17, %v6745_v3 }
 0x440   : > { %v3844_v27 = vpop.f32.mrf.mxu1 }
 0x441   : > { %v4020_v6 = vmax.f32 %v3853_v36, -20.0  ;;  %v3845_v12 = vadd.f32 %v6745_v3, %v3844_v27 }
 0x442   : > { %v4555_v43 = vpop.f32.mrf.mxu1 }
 0x443   : > { %v4084_v25 = vmin.f32 %v4020_v6, 2.0  ;;  %v4018_v58 = vmax.f32 %v3845_v12, -20.0  ;;  %v3856_v31 = vadd.f32 %v4555_v43, %v6745_v3 }
 0x444   : > { %v3847_v32 = vpop.f32.mrf.mxu1 }
 0x445   : > { %v4148_v19 = vsel %vm3989_vm0, %v4084_v25, %v3853_v36  ;;  %v4082_v59 = vmin.f32 %v4018_v58, 2.0  ;;  %v4021_v38 = vmax.f32 %v3856_v31, -20.0  ;;  %v3848_v1 = vadd.f32 %v6745_v3, %v3847_v32 }
 0x446   : > { %4212 = vst [vmem:[%s6759_s23 + $0xf0] sm:$0xff] %v4148_v19 }
 0x447   : > { %v4146_v52 = vsel %vm3989_vm0, %v4082_v59, %v3845_v12  ;;  %v4085_v61 = vmin.f32 %v4021_v38, 2.0  ;;  %v4019_v48 = vmax.f32 %v3848_v1, -20.0 }
 0x448   : > { %4210 = vst [vmem:[%s6759_s23 + $0xe0] sm:$0xff] %v4146_v52 }
 0x449   : > { %v4149_v8 = vsel %vm3989_vm0, %v4085_v61, %v3856_v31  ;;  %v4083_v46 = vmin.f32 %v4019_v48, 2.0 }
 0x44a   : > { %4213 = vst [vmem:[%s6759_s23 + $0xf8] sm:$0xff] %v4149_v8 }
 0x44b   : > { %v4147_v34 = vsel %vm3989_vm0, %v4083_v46, %v3848_v1 }
 0x44c   : > { %4211 = vst [vmem:[%s6759_s23 + $0xe8] sm:$0xff] %v4147_v34 }
 0x44e   : > { %v4558_v35 = vpop.f32.mrf.mxu1 }
 0x44f   : > { %v3869_v20 = vadd.f32 %v4558_v35, %v6745_v3 }
 0x450   : > { %v3860_v22 = vpop.f32.mrf.mxu1 }
 0x451   : > { %v4024_v60 = vmax.f32 %v3869_v20, -20.0  ;;  %v3861_v41 = vadd.f32 %v6745_v3, %v3860_v22 }
 0x452   : > { %v4559_v54 = vpop.f32.mrf.mxu1 }
 0x453   : > { %v4088_v39 = vmin.f32 %v4024_v60, 2.0  ;;  %v4022_v53 = vmax.f32 %v3861_v41, -20.0  ;;  %v3872_v40 = vadd.f32 %v4559_v54, %v6745_v3 }
 0x454   : > { %v3863_v56 = vpop.f32.mrf.mxu1 }
 0x455   : > { %v4152_v55 = vsel %vm3989_vm0, %v4088_v39, %v3869_v20  ;;  %v4086_v14 = vmin.f32 %v4022_v53, 2.0  ;;  %v4025_v7 = vmax.f32 %v3872_v40, -20.0  ;;  %v3864_v51 = vadd.f32 %v6745_v3, %v3863_v56 }
 0x456   : > { %4216 = vst [vmem:[%s6759_s23 + $0x110] sm:$0xff] %v4152_v55 }
 0x457   : > { %v4150_v42 = vsel %vm3989_vm0, %v4086_v14, %v3861_v41  ;;  %v4089_v13 = vmin.f32 %v4025_v7, 2.0  ;;  %v4023_v10 = vmax.f32 %v3864_v51, -20.0 }
 0x458   : > { %4214 = vst [vmem:[%s6759_s23 + $0x100] sm:$0xff] %v4150_v42 }
 0x459   : > { %v4153_v0 = vsel %vm3989_vm0, %v4089_v13, %v3872_v40  ;;  %v4087_v63 = vmin.f32 %v4023_v10, 2.0 }
 0x45a   : > { %4217 = vst [vmem:[%s6759_s23 + $0x118] sm:$0xff] %v4153_v0 }
 0x45b   : > { %v4151_v15 = vsel %vm3989_vm0, %v4087_v63, %v3864_v51 }
 0x45c   : > { %4215 = vst [vmem:[%s6759_s23 + $0x108] sm:$0xff] %v4151_v15 }
 0x45e   : > { %v4562_v21 = vpop.f32.mrf.mxu1 }
 0x45f   : > { %v3885_v23 = vadd.f32 %v4562_v21, %v6745_v3 }
 0x460   : > { %v3876_v4 = vpop.f32.mrf.mxu1 }
 0x461   : > { %v4028_v28 = vmax.f32 %v3885_v23, -20.0  ;;  %v3877_v37 = vadd.f32 %v6745_v3, %v3876_v4 }
 0x462   : > { %v4563_v16 = vpop.f32.mrf.mxu1 }
 0x463   : > { %v4092_v11 = vmin.f32 %v4028_v28, 2.0  ;;  %v4026_v29 = vmax.f32 %v3877_v37, -20.0  ;;  %v3888_v57 = vadd.f32 %v4563_v16, %v6745_v3 }
 0x464   : > { %v3879_v2 = vpop.f32.mrf.mxu1 }
 0x465   : > { %v4156_v47 = vsel %vm3989_vm0, %v4092_v11, %v3885_v23  ;;  %v4090_v30 = vmin.f32 %v4026_v29, 2.0  ;;  %v4029_v5 = vmax.f32 %v3888_v57, -20.0  ;;  %v3880_v24 = vadd.f32 %v6745_v3, %v3879_v2 }
 0x466   : > { %4220 = vst [vmem:[%s6759_s23 + $0x130] sm:$0xff] %v4156_v47 }
 0x467   : > { %v4154_v45 = vsel %vm3989_vm0, %v4090_v30, %v3877_v37  ;;  %v4093_v33 = vmin.f32 %v4029_v5, 2.0  ;;  %v4027_v18 = vmax.f32 %v3880_v24, -20.0 }
 0x468   : > { %4218 = vst [vmem:[%s6759_s23 + $0x120] sm:$0xff] %v4154_v45 }
 0x469   : > { %v4157_v26 = vsel %vm3989_vm0, %v4093_v33, %v3888_v57  ;;  %v4091_v50 = vmin.f32 %v4027_v18, 2.0 }
 0x46a   : > { %4221 = vst [vmem:[%s6759_s23 + $0x138] sm:$0xff] %v4157_v26 }
 0x46b   : > { %v4155_v62 = vsel %vm3989_vm0, %v4091_v50, %v3880_v24 }
 0x46c   : > { %4219 = vst [vmem:[%s6759_s23 + $0x128] sm:$0xff] %v4155_v62 }
 0x46e   : > { %v4566_v44 = vpop.f32.mrf.mxu1 }
 0x46f   : > { %v3901_v49 = vadd.f32 %v4566_v44, %v6745_v3 }
 0x470   : > { %v3892_v17 = vpop.f32.mrf.mxu1 }
 0x471   : > { %v4032_v36 = vmax.f32 %v3901_v49, -20.0  ;;  %v3893_v27 = vadd.f32 %v6745_v3, %v3892_v17 }
 0x472   : > { %v4567_v6 = vpop.f32.mrf.mxu1 }
 0x473   : > { %v4096_v12 = vmin.f32 %v4032_v36, 2.0  ;;  %v4030_v43 = vmax.f32 %v3893_v27, -20.0  ;;  %v3904_v25 = vadd.f32 %v4567_v6, %v6745_v3 }
 0x474   : > { %v3895_v58 = vpop.f32.mrf.mxu1 }
 0x475   : > { %v4160_v31 = vsel %vm3989_vm0, %v4096_v12, %v3901_v49  ;;  %v4094_v32 = vmin.f32 %v4030_v43, 2.0  ;;  %v4033_v19 = vmax.f32 %v3904_v25, -20.0  ;;  %v3896_v59 = vadd.f32 %v6745_v3, %v3895_v58 }
 0x476   : > { %4224 = vst [vmem:[%s6759_s23 + $0x150] sm:$0xff] %v4160_v31 }
 0x477   : > { %v4158_v38 = vsel %vm3989_vm0, %v4094_v32, %v3893_v27  ;;  %v4097_v1 = vmin.f32 %v4033_v19, 2.0  ;;  %v4031_v52 = vmax.f32 %v3896_v59, -20.0 }
 0x478   : > { %4222 = vst [vmem:[%s6759_s23 + $0x140] sm:$0xff] %v4158_v38 }
 0x479   : > { %v4161_v61 = vsel %vm3989_vm0, %v4097_v1, %v3904_v25  ;;  %v4095_v48 = vmin.f32 %v4031_v52, 2.0 }
 0x47a   : > { %4225 = vst [vmem:[%s6759_s23 + $0x158] sm:$0xff] %v4161_v61 }
 0x47b   : > { %v4159_v8 = vsel %vm3989_vm0, %v4095_v48, %v3896_v59 }
 0x47c   : > { %4223 = vst [vmem:[%s6759_s23 + $0x148] sm:$0xff] %v4159_v8 }
 0x47e   : > { %v4570_v46 = vpop.f32.mrf.mxu1 }
 0x47f   : > { %v3917_v34 = vadd.f32 %v4570_v46, %v6745_v3 }
 0x480   : > { %v3908_v35 = vpop.f32.mrf.mxu1 }
 0x481   : > { %v4036_v20 = vmax.f32 %v3917_v34, -20.0  ;;  %v3909_v22 = vadd.f32 %v6745_v3, %v3908_v35 }
 0x482   : > { %v4571_v60 = vpop.f32.mrf.mxu1 }
 0x483   : > { %v4100_v41 = vmin.f32 %v4036_v20, 2.0  ;;  %v4034_v54 = vmax.f32 %v3909_v22, -20.0  ;;  %v3920_v39 = vadd.f32 %v4571_v60, %v6745_v3 }
 0x484   : > { %v3911_v53 = vpop.f32.mrf.mxu1 }
 0x485   : > { %v4164_v40 = vsel %vm3989_vm0, %v4100_v41, %v3917_v34  ;;  %v4098_v56 = vmin.f32 %v4034_v54, 2.0  ;;  %v4037_v55 = vmax.f32 %v3920_v39, -20.0  ;;  %v3912_v14 = vadd.f32 %v6745_v3, %v3911_v53 }
 0x486   : > { %4228 = vst [vmem:[%s6759_s23 + $0x170] sm:$0xff] %v4164_v40 }
 0x487   : > { %v4162_v7 = vsel %vm3989_vm0, %v4098_v56, %v3909_v22  ;;  %v4101_v51 = vmin.f32 %v4037_v55, 2.0  ;;  %v4035_v42 = vmax.f32 %v3912_v14, -20.0 }
 0x488   : > { %4226 = vst [vmem:[%s6759_s23 + $0x160] sm:$0xff] %v4162_v7 }
 0x489   : > { %v4165_v13 = vsel %vm3989_vm0, %v4101_v51, %v3920_v39  ;;  %v4099_v10 = vmin.f32 %v4035_v42, 2.0 }
 0x48a   : > { %4229 = vst [vmem:[%s6759_s23 + $0x178] sm:$0xff] %v4165_v13 }
 0x48b   : > { %v4163_v0 = vsel %vm3989_vm0, %v4099_v10, %v3912_v14 }
 0x48c   : > { %4227 = vst [vmem:[%s6759_s23 + $0x168] sm:$0xff] %v4163_v0 }
 0x48e   : > { %v4574_v63 = vpop.f32.mrf.mxu1 }
 0x48f   : > { %v3933_v15 = vadd.f32 %v4574_v63, %v6745_v3 }
 0x490   : > { %v3924_v21 = vpop.f32.mrf.mxu1 }
 0x491   : > { %v4040_v23 = vmax.f32 %v3933_v15, -20.0  ;;  %v3925_v4 = vadd.f32 %v6745_v3, %v3924_v21 }
 0x492   : > { %v4575_v28 = vpop.f32.mrf.mxu1 }
 0x493   : > { %v4104_v37 = vmin.f32 %v4040_v23, 2.0  ;;  %v4038_v16 = vmax.f32 %v3925_v4, -20.0  ;;  %v3936_v11 = vadd.f32 %v4575_v28, %v6745_v3 }
 0x494   : > { %v3927_v29 = vpop.f32.mrf.mxu1 }
 0x495   : > { %v4168_v57 = vsel %vm3989_vm0, %v4104_v37, %v3933_v15  ;;  %v4102_v2 = vmin.f32 %v4038_v16, 2.0  ;;  %v4041_v47 = vmax.f32 %v3936_v11, -20.0  ;;  %v3928_v30 = vadd.f32 %v6745_v3, %v3927_v29 }
 0x496   : > { %4232 = vst [vmem:[%s6759_s23 + $0x190] sm:$0xff] %v4168_v57 }
 0x497   : > { %v4166_v5 = vsel %vm3989_vm0, %v4102_v2, %v3925_v4  ;;  %v4105_v24 = vmin.f32 %v4041_v47, 2.0  ;;  %v4039_v45 = vmax.f32 %v3928_v30, -20.0 }
 0x498   : > { %4230 = vst [vmem:[%s6759_s23 + $0x180] sm:$0xff] %v4166_v5 }
 0x499   : > { %v4169_v33 = vsel %vm3989_vm0, %v4105_v24, %v3936_v11  ;;  %v4103_v18 = vmin.f32 %v4039_v45, 2.0 }
 0x49a   : > { %4233 = vst [vmem:[%s6759_s23 + $0x198] sm:$0xff] %v4169_v33 }
 0x49b   : > { %v4167_v26 = vsel %vm3989_vm0, %v4103_v18, %v3928_v30 }
 0x49c   : > { %4231 = vst [vmem:[%s6759_s23 + $0x188] sm:$0xff] %v4167_v26 }
 0x49e   : > { %v4578_v50 = vpop.f32.mrf.mxu1 }
 0x49f   : > { %v3949_v62 = vadd.f32 %v4578_v50, %v6745_v3 }
 0x4a0   : > { %v3940_v44 = vpop.f32.mrf.mxu1 }
 0x4a1   : > { %v4044_v49 = vmax.f32 %v3949_v62, -20.0  ;;  %v3941_v17 = vadd.f32 %v6745_v3, %v3940_v44 }
 0x4a2   : > { %v4579_v36 = vpop.f32.mrf.mxu1 }
 0x4a3   : > { %v4108_v27 = vmin.f32 %v4044_v49, 2.0  ;;  %v4042_v6 = vmax.f32 %v3941_v17, -20.0  ;;  %v3952_v12 = vadd.f32 %v4579_v36, %v6745_v3 }
 0x4a4   : > { %v3943_v43 = vpop.f32.mrf.mxu1 }
 0x4a5   : > { %v4172_v25 = vsel %vm3989_vm0, %v4108_v27, %v3949_v62  ;;  %v4106_v58 = vmin.f32 %v4042_v6, 2.0  ;;  %v4045_v31 = vmax.f32 %v3952_v12, -20.0  ;;  %v3944_v32 = vadd.f32 %v6745_v3, %v3943_v43 }
 0x4a6   : > { %4236 = vst [vmem:[%s6759_s23 + $0x1b0] sm:$0xff] %v4172_v25 }
 0x4a7   : > { %v4170_v19 = vsel %vm3989_vm0, %v4106_v58, %v3941_v17  ;;  %v4109_v59 = vmin.f32 %v4045_v31, 2.0  ;;  %v4043_v38 = vmax.f32 %v3944_v32, -20.0 }
 0x4a8   : > { %4234 = vst [vmem:[%s6759_s23 + $0x1a0] sm:$0xff] %v4170_v19 }
 0x4a9   : > { %v4173_v1 = vsel %vm3989_vm0, %v4109_v59, %v3952_v12  ;;  %v4107_v52 = vmin.f32 %v4043_v38, 2.0 }
 0x4aa   : > { %4237 = vst [vmem:[%s6759_s23 + $0x1b8] sm:$0xff] %v4173_v1 }
 0x4ab   : > { %v4171_v61 = vsel %vm3989_vm0, %v4107_v52, %v3944_v32 }
 0x4ac   : > { %4235 = vst [vmem:[%s6759_s23 + $0x1a8] sm:$0xff] %v4171_v61 }
 0x4ae   : > { %v4582_v48 = vpop.f32.mrf.mxu1 }
 0x4af   : > { %v3965_v8 = vadd.f32 %v4582_v48, %v6745_v3 }
 0x4b0   : > { %v3956_v46 = vpop.f32.mrf.mxu1 }
 0x4b1   : > { %v4048_v34 = vmax.f32 %v3965_v8, -20.0  ;;  %v3957_v35 = vadd.f32 %v6745_v3, %v3956_v46 }
 0x4b2   : > { %v4583_v20 = vpop.f32.mrf.mxu1 }
 0x4b3   : > { %v4112_v22 = vmin.f32 %v4048_v34, 2.0  ;;  %v4046_v60 = vmax.f32 %v3957_v35, -20.0  ;;  %v3968_v41 = vadd.f32 %v4583_v20, %v6745_v3 }
 0x4b4   : > { %v3959_v54 = vpop.f32.mrf.mxu1 }
 0x4b5   : > { %v4176_v39 = vsel %vm3989_vm0, %v4112_v22, %v3965_v8  ;;  %v4110_v53 = vmin.f32 %v4046_v60, 2.0  ;;  %v4049_v40 = vmax.f32 %v3968_v41, -20.0  ;;  %v3960_v56 = vadd.f32 %v6745_v3, %v3959_v54 }
 0x4b6   : > { %4240 = vst [vmem:[%s6759_s23 + $0x1d0] sm:$0xff] %v4176_v39 }
 0x4b7   : > { %v4174_v55 = vsel %vm3989_vm0, %v4110_v53, %v3957_v35  ;;  %v4113_v14 = vmin.f32 %v4049_v40, 2.0  ;;  %v4047_v7 = vmax.f32 %v3960_v56, -20.0 }
 0x4b8   : > { %4238 = vst [vmem:[%s6759_s23 + $0x1c0] sm:$0xff] %v4174_v55 }
 0x4b9   : > { %v4177_v51 = vsel %vm3989_vm0, %v4113_v14, %v3968_v41  ;;  %v4111_v42 = vmin.f32 %v4047_v7, 2.0 }
 0x4ba   : > { %4241 = vst [vmem:[%s6759_s23 + $0x1d8] sm:$0xff] %v4177_v51 }
 0x4bb   : > { %v4175_v13 = vsel %vm3989_vm0, %v4111_v42, %v3960_v56 }
 0x4bc   : > { %4239 = vst [vmem:[%s6759_s23 + $0x1c8] sm:$0xff] %v4175_v13 }
 0x4be   : > { %v4586_v10 = vpop.f32.mrf.mxu1 }
 0x4bf   : > { %v3981_v0 = vadd.f32 %v4586_v10, %v6745_v3 }
 0x4c0   : > { %v3972_v63 = vpop.f32.mrf.mxu1 }
 0x4c1   : > { %v4052_v15 = vmax.f32 %v3981_v0, -20.0  ;;  %v3973_v21 = vadd.f32 %v6745_v3, %v3972_v63 }
 0x4c2   : > { %v4587_v23 = vpop.f32.mrf.mxu1 }
 0x4c3   : > { %v4116_v4 = vmin.f32 %v4052_v15, 2.0  ;;  %v4050_v28 = vmax.f32 %v3973_v21, -20.0  ;;  %v3984_v37 = vadd.f32 %v4587_v23, %v6745_v3 }
 0x4c4   : > { %v3975_v16 = vpop.f32.mrf.mxu1 }
 0x4c5   : > { %v4180_v11 = vsel %vm3989_vm0, %v4116_v4, %v3981_v0  ;;  %v4114_v29 = vmin.f32 %v4050_v28, 2.0  ;;  %v4053_v57 = vmax.f32 %v3984_v37, -20.0  ;;  %v3976_v2 = vadd.f32 %v6745_v3, %v3975_v16 }
 0x4c6   : > { %4244 = vst [vmem:[%s6759_s23 + $0x1f0] sm:$0xff] %v4180_v11 }
 0x4c7   : > { %v4178_v47 = vsel %vm3989_vm0, %v4114_v29, %v3973_v21  ;;  %v4117_v30 = vmin.f32 %v4053_v57, 2.0  ;;  %v4051_v5 = vmax.f32 %v3976_v2, -20.0 }
 0x4c8   : > { %4242 = vst [vmem:[%s6759_s23 + $0x1e0] sm:$0xff] %v4178_v47 }
 0x4c9   : > { %v4181_v24 = vsel %vm3989_vm0, %v4117_v30, %v3984_v37  ;;  %v4115_v45 = vmin.f32 %v4051_v5, 2.0 }
 0x4ca   : > { %4245 = vst [vmem:[%s6759_s23 + $0x1f8] sm:$0xff] %v4181_v24 }
 0x4cb   : > { %v4179_v33 = vsel %vm3989_vm0, %v4115_v45, %v3976_v2 }
 0x4cc   : > { %4243 = vst [vmem:[%s6759_s23 + $0x1e8] sm:$0xff] %v4179_v33 }
 0x4cd PF: > { %s16_s21 = sadd.s32 1, %s4828_s21  }
 0x4ce   : > { %p13_p4 = scmp.ge.s32.totalorder %s16_s21, 4  }
 0x4d0   :  { %15 = sbr.rel (!%p13_p4) target bundleno = 1 (0x1), region = 75 }

</bundles_post_ra>
